<compile_context>
chip_gen: v5e
topology: v5e:2x2
jax: 0.10.0
libtpu: 0.0.40
codegen_flags: <defaults>
</compile_context>

<pallas_src>
import jax
import jax.numpy as jnp
from jax.experimental import pallas as pl
from jax.experimental.pallas import tpu as pltpu


def _round_up(n, m):
    return ((n + m - 1) // m) * m


# ---------------------------------------------------------------------------
# Fused kernel: input projection + LSTM recurrence + all classifier heads
# ---------------------------------------------------------------------------
def _fused_lstm_heads_kernel(x_ref, wih_ref, whh_ref, b_ref, fcw_ref, fcb_ref,
                             rout_ref, head_ref, gx_scr, h_scr, c_scr):
    # x_ref   : (T*Bp, I)        time-major, batch padded to Bp
    # wih_ref : (I, 4*Hp)        gate blocks at 128-lane boundaries
    # whh_ref : (Hp, 4*Hp)
    # b_ref   : (1, 4*Hp)        b_ih + b_hh, gate-block padded
    # fcw_ref : (Hp, FCp)        all F heads concatenated along columns
    # fcb_ref : (1, FCp)
    # rout_ref: (T*Bp, Hp)       hidden states (output)
    # head_ref: (T*Bp, FCp)      concatenated head logits (output)
    n_rows = x_ref.shape[0]
    Bp, Hp = h_scr.shape
    T = n_rows // Bp

    # ---- Prologue: input projection for ALL timesteps in one MXU matmul ----
    # (bias broadcast hoisted here once instead of once per timestep)
    gx_scr[...] = (
        jnp.dot(x_ref[...], wih_ref[...], preferred_element_type=jnp.float32)
        + b_ref[...]
    )

    h_scr[...] = jnp.zeros_like(h_scr)
    c_scr[...] = jnp.zeros_like(c_scr)

    # ---- Recurrence: one (Bp,Hp)@(Hp,4Hp) dot + elementwise per timestep ----
    def step(t, carry):
        row = pl.multiple_of(t * Bp, Bp)            # sublane-aligned row offset
        h = h_scr[...]
        gates = gx_scr[pl.ds(row, Bp), :] + jnp.dot(
            h, whh_ref[...], preferred_element_type=jnp.float32)
        # PyTorch gate order i, f, g, o; slices fall on 128-lane boundaries.
        i_g = jax.nn.sigmoid(gates[:, 0 * Hp:1 * Hp])
        f_g = jax.nn.sigmoid(gates[:, 1 * Hp:2 * Hp])
        g_g = jnp.tanh(gates[:, 2 * Hp:3 * Hp])
        o_g = jax.nn.sigmoid(gates[:, 3 * Hp:4 * Hp])
        c_new = f_g * c_scr[...] + i_g * g_g
        h_new = o_g * jnp.tanh(c_new)
        c_scr[...] = c_new
        h_scr[...] = h_new
        rout_ref[pl.ds(row, Bp), :] = h_new
        return carry

    jax.lax.fori_loop(0, T, step, 0, unroll=True)

    # ---- Epilogue: all F heads as one lane-dense matmul over the sequence ---
    head_ref[...] = (
        jnp.dot(rout_ref[...], fcw_ref[...], preferred_element_type=jnp.float32)
        + fcb_ref[...]
    )


# ---------------------------------------------------------------------------
# Parameter packing: PyTorch layout -> padded, kernel-friendly layout
# ---------------------------------------------------------------------------
def pack_params(w_ih, w_hh, b_ih, b_hh, fc_w, fc_b):
    """w_ih: (4H, I), w_hh: (4H, H), b_ih/b_hh: (4H,)  (PyTorch nn.LSTM layout)
       fc_w: (F, C, H), fc_b: (F, C)                   (PyTorch nn.Linear layout)
    """
    I = w_ih.shape[1]
    H = w_hh.shape[1]
    F, C, _ = fc_w.shape
    Hp = _round_up(H, 128)          # gate slice boundaries at 128-lane multiples
    FCp = _round_up(F * C, 128)     # lane-dense head output

    def pad_gate_cols(w):  # (rows, 4H) -> (rows, 4*Hp); zero-pad each gate block
        r = w.shape[0]
        w3 = w.reshape(r, 4, H)
        w3 = jnp.pad(w3, ((0, 0), (0, 0), (0, Hp - H)))
        return w3.reshape(r, 4 * Hp)

    w_ih_t = pad_gate_cols(jnp.transpose(w_ih))                     # (I, 4Hp)
    w_hh_t = jnp.pad(pad_gate_cols(jnp.transpose(w_hh)),
                     ((0, Hp - H), (0, 0)))                         # (Hp, 4Hp)
    b = pad_gate_cols((b_ih + b_hh).reshape(1, 4 * H))              # (1, 4Hp)

    fc_w_cat = jnp.transpose(fc_w, (2, 0, 1)).reshape(H, F * C)     # (H, F*C)
    fc_w_cat = jnp.pad(fc_w_cat, ((0, Hp - H), (0, FCp - F * C)))   # (Hp, FCp)
    fc_b_cat = jnp.pad(fc_b.reshape(1, F * C), ((0, 0), (0, FCp - F * C)))

    return {"w_ih_t": w_ih_t, "w_hh_t": w_hh_t, "b": b,
            "fc_w": fc_w_cat, "fc_b": fc_b_cat,
            "I": I, "H": H, "Hp": Hp, "F": F, "C": C, "FCp": FCp}


# ---------------------------------------------------------------------------
# Module wrapper: replicates LSTMmultiLabel.forward
# ---------------------------------------------------------------------------
def lstm_multilabel_forward(x, params):
    B, T, I = x.shape
    H, Hp = params["H"], params["Hp"]
    F, C, FCp = params["F"], params["C"], params["FCp"]
    Bp = _round_up(B, 8)                       # pad batch to sublane width

    # Host-side layout plumbing: time-major, batch-padded, flattened 2-D.
    x_tb = jnp.transpose(x, (1, 0, 2))         # (T, B, I)
    if Bp != B:
        x_tb = jnp.pad(x_tb, ((0, 0), (0, Bp - B), (0, 0)))
    x2d = x_tb.reshape(T * Bp, I)

    r2d, head2d = pl.pallas_call(
        _fused_lstm_heads_kernel,
        out_shape=(
            jax.ShapeDtypeStruct((T * Bp, Hp), jnp.float32),
            jax.ShapeDtypeStruct((T * Bp, FCp), jnp.float32),
        ),
        grid=(1,),
        in_specs=[
            pl.BlockSpec((T * Bp, I), lambda i: (0, 0)),
            pl.BlockSpec((I, 4 * Hp), lambda i: (0, 0)),
            pl.BlockSpec((Hp, 4 * Hp), lambda i: (0, 0)),
            pl.BlockSpec((1, 4 * Hp), lambda i: (0, 0)),
            pl.BlockSpec((Hp, FCp), lambda i: (0, 0)),
            pl.BlockSpec((1, FCp), lambda i: (0, 0)),
        ],
        out_specs=(
            pl.BlockSpec((T * Bp, Hp), lambda i: (0, 0)),
            pl.BlockSpec((T * Bp, FCp), lambda i: (0, 0)),
        ),
        scratch_shapes=[
            pltpu.VMEM((T * Bp, 4 * Hp), jnp.float32),   # precomputed gates_x
            pltpu.VMEM((Bp, Hp), jnp.float32),           # h
            pltpu.VMEM((Bp, Hp), jnp.float32),           # c
        ],
        compiler_params=pltpu.CompilerParams(
            dimension_semantics=("arbitrary",)),
    )(x2d, params["w_ih_t"], params["w_hh_t"], params["b"],
      params["fc_w"], params["fc_b"])

    # Strip padding, back to batch-major.
    r_out = jnp.transpose(r2d.reshape(T, Bp, Hp)[:, :B, :H], (1, 0, 2))
    head = jnp.transpose(head2d.reshape(T, Bp, FCp)[:, :B, :F * C], (1, 0, 2))
    model_out = [head[..., f * C:(f + 1) * C] for f in range(F)]
    return model_out, r_out


# ---------------------------------------------------------------------------
# Pure-JAX reference (correctness check only), on unpadded PyTorch-layout params
# ---------------------------------------------------------------------------
def reference_forward(x, w_ih, w_hh, b_ih, b_hh, fc_w, fc_b):
    B, T, I = x.shape
    H = w_hh.shape[1]

    def step(carry, x_t):
        h, c = carry
        gates = x_t @ w_ih.T + h @ w_hh.T + b_ih + b_hh
        i_g = jax.nn.sigmoid(gates[:, 0 * H:1 * H])
        f_g = jax.nn.sigmoid(gates[:, 1 * H:2 * H])
        g_g = jnp.tanh(gates[:, 2 * H:3 * H])
        o_g = jax.nn.sigmoid(gates[:, 3 * H:4 * H])
        c_new = f_g * c + i_g * g_g
        h_new = o_g * jnp.tanh(c_new)
        return (h_new, c_new), h_new

    h0 = jnp.zeros((B, H), jnp.float32)
    c0 = jnp.zeros((B, H), jnp.float32)
    _, hs = jax.lax.scan(step, (h0, c0), jnp.transpose(x, (1, 0, 2)))
    r_out = jnp.transpose(hs, (1, 0, 2))                    # (B, T, H)
    heads = [r_out @ fc_w[f].T + fc_b[f] for f in range(fc_w.shape[0])]
    return heads, r_out


if __name__ == "__main__":
    # Small shapes implied by the module's forward.
    batch, time_step, input_size = 2, 8, 16
    hidden_dim, n_class, f_length = 32, 10, 5

    key = jax.random.PRNGKey(0)
    kx, k1, k2, k3, k4, k5, k6 = jax.random.split(key, 7)
    x = jax.random.normal(kx, (batch, time_step, input_size), jnp.float32)

    s = 1.0 / float(hidden_dim) ** 0.5
    # PyTorch-layout parameters.
    w_ih = jax.random.uniform(k1, (4 * hidden_dim, input_size), jnp.float32, -s, s)
    w_hh = jax.random.uniform(k2, (4 * hidden_dim, hidden_dim), jnp.float32, -s, s)
    b_ih = jax.random.uniform(k3, (4 * hidden_dim,), jnp.float32, -s, s)
    b_hh = jax.random.uniform(k4, (4 * hidden_dim,), jnp.float32, -s, s)
    fc_w = jax.random.uniform(k5, (f_length, n_class, hidden_dim), jnp.float32, -s, s)
    fc_b = jax.random.uniform(k6, (f_length, n_class), jnp.float32, -s, s)

    params = pack_params(w_ih, w_hh, b_ih, b_hh, fc_w, fc_b)

    model_out, r_out = lstm_multilabel_forward(x, params)
    jax.block_until_ready(r_out)
    for m in model_out:
        jax.block_until_ready(m)

    # Sanity check against the pure-JAX reference.
    ref_heads, ref_rout = reference_forward(x, w_ih, w_hh, b_ih, b_hh, fc_w, fc_b)
    assert r_out.shape == (batch, time_step, hidden_dim)
    assert jnp.allclose(r_out, ref_rout, atol=1e-4, rtol=1e-4)
    for m, rm in zip(model_out, ref_heads):
        assert m.shape == (batch, time_step, n_class)
        assert jnp.allclose(m, rm, atol=1e-4, rtol=1e-4)

    print("KERNEL_OK")
</pallas_src>

<mosaic_0001>
module attributes {stable_mosaic.version = 11 : i64} {
  func.func @_fused_lstm_heads_kernel(%arg0: i32, %arg1: memref<64x16xf32, #tpu.memory_space<vmem>>, %arg2: memref<16x512xf32, #tpu.memory_space<vmem>>, %arg3: memref<128x512xf32, #tpu.memory_space<vmem>>, %arg4: memref<1x512xf32, #tpu.memory_space<vmem>>, %arg5: memref<128x128xf32, #tpu.memory_space<vmem>>, %arg6: memref<1x128xf32, #tpu.memory_space<vmem>>, %arg7: memref<64x128xf32, #tpu.memory_space<vmem>>, %arg8: memref<64x128xf32, #tpu.memory_space<vmem>>, %arg9: memref<64x512xf32, #tpu.memory_space<vmem>>, %arg10: memref<8x128xf32, #tpu.memory_space<vmem>>, %arg11: memref<8x128xf32, #tpu.memory_space<vmem>>) attributes {dimension_semantics = [#tpu.dimension_semantics<arbitrary>], iteration_bounds = array<i64: 1>, scalar_prefetch = 0 : i64, scratch_operands = 3 : i64, tpu.core_type = #tpu.core_type<tc>, window_params = [{pipeline_mode = #tpu.pipeline_mode<synchronous>, transform_indices = @transform_0, window_bounds = array<i64: 64, 16>}, {pipeline_mode = #tpu.pipeline_mode<synchronous>, transform_indices = @transform_1, window_bounds = array<i64: 16, 512>}, {pipeline_mode = #tpu.pipeline_mode<synchronous>, transform_indices = @transform_2, window_bounds = array<i64: 128, 512>}, {pipeline_mode = #tpu.pipeline_mode<synchronous>, transform_indices = @transform_3, window_bounds = array<i64: 1, 512>}, {pipeline_mode = #tpu.pipeline_mode<synchronous>, transform_indices = @transform_4, window_bounds = array<i64: 128, 128>}, {pipeline_mode = #tpu.pipeline_mode<synchronous>, transform_indices = @transform_5, window_bounds = array<i64: 1, 128>}, {pipeline_mode = #tpu.pipeline_mode<synchronous>, transform_indices = @transform_6, window_bounds = array<i64: 64, 128>}, {pipeline_mode = #tpu.pipeline_mode<synchronous>, transform_indices = @transform_7, window_bounds = array<i64: 64, 128>}]} {
    %c0 = arith.constant 0 : index
    %c0_0 = arith.constant 0 : index
    %0 = vector.load %arg1[%c0, %c0_0] : memref<64x16xf32, #tpu.memory_space<vmem>>, vector<64x16xf32>
    %c0_1 = arith.constant 0 : index
    %c0_2 = arith.constant 0 : index
    %1 = vector.load %arg2[%c0_1, %c0_2] : memref<16x512xf32, #tpu.memory_space<vmem>>, vector<16x512xf32>
    %cst = arith.constant dense<0.000000e+00> : vector<64x512xf32>
    %2 = tpu.matmul %0, %1, %cst {dimension_numbers = #tpu.dot_dimension_numbers<[1], [0], [0], [1], [0, 0, 1, 1], [], []>} : vector<64x16xf32>, vector<16x512xf32>, vector<64x512xf32> -> vector<64x512xf32>
    %c0_3 = arith.constant 0 : index
    %c0_4 = arith.constant 0 : index
    %3 = vector.load %arg4[%c0_3, %c0_4] : memref<1x512xf32, #tpu.memory_space<vmem>>, vector<1x512xf32>
    %4 = vector.broadcast %3 : vector<1x512xf32> to vector<64x512xf32>
    %5 = arith.addf %2, %4 : vector<64x512xf32>
    %c0_5 = arith.constant 0 : index
    %c0_6 = arith.constant 0 : index
    %6 = vector.load %arg9[%c0_5, %c0_6] : memref<64x512xf32, #tpu.memory_space<vmem>>, vector<64x512xf32>
    tpu.vector_store %arg9[%c0_5, %c0_6], %5 {strides = array<i32>} : memref<64x512xf32, #tpu.memory_space<vmem>>, vector<64x512xf32>,
    %cst_7 = arith.constant 0.000000e+00 : f32
    %7 = vector.broadcast %cst_7 : f32 to vector<8x128xf32>
    %c0_8 = arith.constant 0 : index
    %c0_9 = arith.constant 0 : index
    %8 = vector.load %arg10[%c0_8, %c0_9] : memref<8x128xf32, #tpu.memory_space<vmem>>, vector<8x128xf32>
    tpu.vector_store %arg10[%c0_8, %c0_9], %7 {strides = array<i32>} : memref<8x128xf32, #tpu.memory_space<vmem>>, vector<8x128xf32>,
    %cst_10 = arith.constant 0.000000e+00 : f32
    %9 = vector.broadcast %cst_10 : f32 to vector<8x128xf32>
    %c0_11 = arith.constant 0 : index
    %c0_12 = arith.constant 0 : index
    %10 = vector.load %arg11[%c0_11, %c0_12] : memref<8x128xf32, #tpu.memory_space<vmem>>, vector<8x128xf32>
    tpu.vector_store %arg11[%c0_11, %c0_12], %9 {strides = array<i32>} : memref<8x128xf32, #tpu.memory_space<vmem>>, vector<8x128xf32>,
    %c0_i32 = arith.constant 0 : i32
    %c8_i32 = arith.constant 8 : i32
    %11 = arith.muli %c0_i32, %c8_i32 : i32
    %12 = tpu.assume_multiple %11, 8 : i32
    %c0_13 = arith.constant 0 : index
    %c0_14 = arith.constant 0 : index
    %13 = vector.load %arg10[%c0_13, %c0_14] : memref<8x128xf32, #tpu.memory_space<vmem>>, vector<8x128xf32>
    %14 = arith.index_cast %12 : i32 to index
    %c0_15 = arith.constant 0 : index
    %15 = vector.load %arg9[%14, %c0_15] : memref<64x512xf32, #tpu.memory_space<vmem>>, vector<8x512xf32>
    %c0_16 = arith.constant 0 : index
    %c0_17 = arith.constant 0 : index
    %16 = vector.load %arg3[%c0_16, %c0_17] : memref<128x512xf32, #tpu.memory_space<vmem>>, vector<128x512xf32>
    %cst_18 = arith.constant dense<0.000000e+00> : vector<8x512xf32>
    %17 = tpu.matmul %13, %16, %cst_18 {dimension_numbers = #tpu.dot_dimension_numbers<[1], [0], [0], [1], [0, 0, 1, 1], [], []>} : vector<8x128xf32>, vector<128x512xf32>, vector<8x512xf32> -> vector<8x512xf32>
    %18 = arith.addf %15, %17 : vector<8x512xf32>
    %19 = vector.extract_strided_slice %18 {offsets = [0, 0], sizes = [8, 128], strides = [1, 1]} : vector<8x512xf32> to vector<8x128xf32>
    %20 = arith.negf %19 : vector<8x128xf32>
    %21 = math.exp %20 : vector<8x128xf32>
    %cst_19 = arith.constant 1.000000e+00 : f32
    %22 = vector.broadcast %cst_19 : f32 to vector<8x128xf32>
    %23 = arith.addf %22, %21 : vector<8x128xf32>
    %24 = arith.divf %22, %23 : vector<8x128xf32>
    %25 = vector.extract_strided_slice %18 {offsets = [0, 128], sizes = [8, 128], strides = [1, 1]} : vector<8x512xf32> to vector<8x128xf32>
    %26 = arith.negf %25 : vector<8x128xf32>
    %27 = math.exp %26 : vector<8x128xf32>
    %cst_20 = arith.constant 1.000000e+00 : f32
    %28 = vector.broadcast %cst_20 : f32 to vector<8x128xf32>
    %29 = arith.addf %28, %27 : vector<8x128xf32>
    %30 = arith.divf %28, %29 : vector<8x128xf32>
    %31 = vector.extract_strided_slice %18 {offsets = [0, 256], sizes = [8, 128], strides = [1, 1]} : vector<8x512xf32> to vector<8x128xf32>
    %32 = math.tanh %31 : vector<8x128xf32>
    %33 = vector.extract_strided_slice %18 {offsets = [0, 384], sizes = [8, 128], strides = [1, 1]} : vector<8x512xf32> to vector<8x128xf32>
    %34 = arith.negf %33 : vector<8x128xf32>
    %35 = math.exp %34 : vector<8x128xf32>
    %cst_21 = arith.constant 1.000000e+00 : f32
    %36 = vector.broadcast %cst_21 : f32 to vector<8x128xf32>
    %37 = arith.addf %36, %35 : vector<8x128xf32>
    %38 = arith.divf %36, %37 : vector<8x128xf32>
    %c0_22 = arith.constant 0 : index
    %c0_23 = arith.constant 0 : index
    %39 = vector.load %arg11[%c0_22, %c0_23] : memref<8x128xf32, #tpu.memory_space<vmem>>, vector<8x128xf32>
    %40 = arith.mulf %30, %39 : vector<8x128xf32>
    %41 = arith.mulf %24, %32 : vector<8x128xf32>
    %42 = arith.addf %40, %41 : vector<8x128xf32>
    %43 = math.tanh %42 : vector<8x128xf32>
    %44 = arith.mulf %38, %43 : vector<8x128xf32>
    %c0_24 = arith.constant 0 : index
    %c0_25 = arith.constant 0 : index
    %45 = vector.load %arg11[%c0_24, %c0_25] : memref<8x128xf32, #tpu.memory_space<vmem>>, vector<8x128xf32>
    tpu.vector_store %arg11[%c0_24, %c0_25], %42 {strides = array<i32>} : memref<8x128xf32, #tpu.memory_space<vmem>>, vector<8x128xf32>,
    %c0_26 = arith.constant 0 : index
    %c0_27 = arith.constant 0 : index
    %46 = vector.load %arg10[%c0_26, %c0_27] : memref<8x128xf32, #tpu.memory_space<vmem>>, vector<8x128xf32>
    tpu.vector_store %arg10[%c0_26, %c0_27], %44 {strides = array<i32>} : memref<8x128xf32, #tpu.memory_space<vmem>>, vector<8x128xf32>,
    %47 = arith.index_cast %12 : i32 to index
    %c0_28 = arith.constant 0 : index
    %48 = vector.load %arg7[%47, %c0_28] : memref<64x128xf32, #tpu.memory_space<vmem>>, vector<8x128xf32>
    tpu.vector_store %arg7[%47, %c0_28], %44 {strides = array<i32>} : memref<64x128xf32, #tpu.memory_space<vmem>>, vector<8x128xf32>,
    %c1_i32 = arith.constant 1 : i32
    %c8_i32_29 = arith.constant 8 : i32
    %49 = arith.muli %c1_i32, %c8_i32_29 : i32
    %50 = tpu.assume_multiple %49, 8 : i32
    %c0_30 = arith.constant 0 : index
    %c0_31 = arith.constant 0 : index
    %51 = vector.load %arg10[%c0_30, %c0_31] : memref<8x128xf32, #tpu.memory_space<vmem>>, vector<8x128xf32>
    %52 = arith.index_cast %50 : i32 to index
    %c0_32 = arith.constant 0 : index
    %53 = vector.load %arg9[%52, %c0_32] : memref<64x512xf32, #tpu.memory_space<vmem>>, vector<8x512xf32>
    %c0_33 = arith.constant 0 : index
    %c0_34 = arith.constant 0 : index
    %54 = vector.load %arg3[%c0_33, %c0_34] : memref<128x512xf32, #tpu.memory_space<vmem>>, vector<128x512xf32>
    %cst_35 = arith.constant dense<0.000000e+00> : vector<8x512xf32>
    %55 = tpu.matmul %51, %54, %cst_35 {dimension_numbers = #tpu.dot_dimension_numbers<[1], [0], [0], [1], [0, 0, 1, 1], [], []>} : vector<8x128xf32>, vector<128x512xf32>, vector<8x512xf32> -> vector<8x512xf32>
    %56 = arith.addf %53, %55 : vector<8x512xf32>
    %57 = vector.extract_strided_slice %56 {offsets = [0, 0], sizes = [8, 128], strides = [1, 1]} : vector<8x512xf32> to vector<8x128xf32>
    %58 = arith.negf %57 : vector<8x128xf32>
    %59 = math.exp %58 : vector<8x128xf32>
    %cst_36 = arith.constant 1.000000e+00 : f32
    %60 = vector.broadcast %cst_36 : f32 to vector<8x128xf32>
    %61 = arith.addf %60, %59 : vector<8x128xf32>
    %62 = arith.divf %60, %61 : vector<8x128xf32>
    %63 = vector.extract_strided_slice %56 {offsets = [0, 128], sizes = [8, 128], strides = [1, 1]} : vector<8x512xf32> to vector<8x128xf32>
    %64 = arith.negf %63 : vector<8x128xf32>
    %65 = math.exp %64 : vector<8x128xf32>
    %cst_37 = arith.constant 1.000000e+00 : f32
    %66 = vector.broadcast %cst_37 : f32 to vector<8x128xf32>
    %67 = arith.addf %66, %65 : vector<8x128xf32>
    %68 = arith.divf %66, %67 : vector<8x128xf32>
    %69 = vector.extract_strided_slice %56 {offsets = [0, 256], sizes = [8, 128], strides = [1, 1]} : vector<8x512xf32> to vector<8x128xf32>
    %70 = math.tanh %69 : vector<8x128xf32>
    %71 = vector.extract_strided_slice %56 {offsets = [0, 384], sizes = [8, 128], strides = [1, 1]} : vector<8x512xf32> to vector<8x128xf32>
    %72 = arith.negf %71 : vector<8x128xf32>
    %73 = math.exp %72 : vector<8x128xf32>
    %cst_38 = arith.constant 1.000000e+00 : f32
    %74 = vector.broadcast %cst_38 : f32 to vector<8x128xf32>
    %75 = arith.addf %74, %73 : vector<8x128xf32>
    %76 = arith.divf %74, %75 : vector<8x128xf32>
    %c0_39 = arith.constant 0 : index
    %c0_40 = arith.constant 0 : index
    %77 = vector.load %arg11[%c0_39, %c0_40] : memref<8x128xf32, #tpu.memory_space<vmem>>, vector<8x128xf32>
    %78 = arith.mulf %68, %77 : vector<8x128xf32>
    %79 = arith.mulf %62, %70 : vector<8x128xf32>
    %80 = arith.addf %78, %79 : vector<8x128xf32>
    %81 = math.tanh %80 : vector<8x128xf32>
    %82 = arith.mulf %76, %81 : vector<8x128xf32>
    %c0_41 = arith.constant 0 : index
    %c0_42 = arith.constant 0 : index
    %83 = vector.load %arg11[%c0_41, %c0_42] : memref<8x128xf32, #tpu.memory_space<vmem>>, vector<8x128xf32>
    tpu.vector_store %arg11[%c0_41, %c0_42], %80 {strides = array<i32>} : memref<8x128xf32, #tpu.memory_space<vmem>>, vector<8x128xf32>,
    %c0_43 = arith.constant 0 : index
    %c0_44 = arith.constant 0 : index
    %84 = vector.load %arg10[%c0_43, %c0_44] : memref<8x128xf32, #tpu.memory_space<vmem>>, vector<8x128xf32>
    tpu.vector_store %arg10[%c0_43, %c0_44], %82 {strides = array<i32>} : memref<8x128xf32, #tpu.memory_space<vmem>>, vector<8x128xf32>,
    %85 = arith.index_cast %50 : i32 to index
    %c0_45 = arith.constant 0 : index
    %86 = vector.load %arg7[%85, %c0_45] : memref<64x128xf32, #tpu.memory_space<vmem>>, vector<8x128xf32>
    tpu.vector_store %arg7[%85, %c0_45], %82 {strides = array<i32>} : memref<64x128xf32, #tpu.memory_space<vmem>>, vector<8x128xf32>,
    %c2_i32 = arith.constant 2 : i32
    %c8_i32_46 = arith.constant 8 : i32
    %87 = arith.muli %c2_i32, %c8_i32_46 : i32
    %88 = tpu.assume_multiple %87, 8 : i32
    %c0_47 = arith.constant 0 : index
    %c0_48 = arith.constant 0 : index
    %89 = vector.load %arg10[%c0_47, %c0_48] : memref<8x128xf32, #tpu.memory_space<vmem>>, vector<8x128xf32>
    %90 = arith.index_cast %88 : i32 to index
    %c0_49 = arith.constant 0 : index
    %91 = vector.load %arg9[%90, %c0_49] : memref<64x512xf32, #tpu.memory_space<vmem>>, vector<8x512xf32>
    %c0_50 = arith.constant 0 : index
    %c0_51 = arith.constant 0 : index
    %92 = vector.load %arg3[%c0_50, %c0_51] : memref<128x512xf32, #tpu.memory_space<vmem>>, vector<128x512xf32>
    %cst_52 = arith.constant dense<0.000000e+00> : vector<8x512xf32>
    %93 = tpu.matmul %89, %92, %cst_52 {dimension_numbers = #tpu.dot_dimension_numbers<[1], [0], [0], [1], [0, 0, 1, 1], [], []>} : vector<8x128xf32>, vector<128x512xf32>, vector<8x512xf32> -> vector<8x512xf32>
    %94 = arith.addf %91, %93 : vector<8x512xf32>
    %95 = vector.extract_strided_slice %94 {offsets = [0, 0], sizes = [8, 128], strides = [1, 1]} : vector<8x512xf32> to vector<8x128xf32>
    %96 = arith.negf %95 : vector<8x128xf32>
    %97 = math.exp %96 : vector<8x128xf32>
    %cst_53 = arith.constant 1.000000e+00 : f32
    %98 = vector.broadcast %cst_53 : f32 to vector<8x128xf32>
    %99 = arith.addf %98, %97 : vector<8x128xf32>
    %100 = arith.divf %98, %99 : vector<8x128xf32>
    %101 = vector.extract_strided_slice %94 {offsets = [0, 128], sizes = [8, 128], strides = [1, 1]} : vector<8x512xf32> to vector<8x128xf32>
    %102 = arith.negf %101 : vector<8x128xf32>
    %103 = math.exp %102 : vector<8x128xf32>
    %cst_54 = arith.constant 1.000000e+00 : f32
    %104 = vector.broadcast %cst_54 : f32 to vector<8x128xf32>
    %105 = arith.addf %104, %103 : vector<8x128xf32>
    %106 = arith.divf %104, %105 : vector<8x128xf32>
    %107 = vector.extract_strided_slice %94 {offsets = [0, 256], sizes = [8, 128], strides = [1, 1]} : vector<8x512xf32> to vector<8x128xf32>
    %108 = math.tanh %107 : vector<8x128xf32>
    %109 = vector.extract_strided_slice %94 {offsets = [0, 384], sizes = [8, 128], strides = [1, 1]} : vector<8x512xf32> to vector<8x128xf32>
    %110 = arith.negf %109 : vector<8x128xf32>
    %111 = math.exp %110 : vector<8x128xf32>
    %cst_55 = arith.constant 1.000000e+00 : f32
    %112 = vector.broadcast %cst_55 : f32 to vector<8x128xf32>
    %113 = arith.addf %112, %111 : vector<8x128xf32>
    %114 = arith.divf %112, %113 : vector<8x128xf32>
    %c0_56 = arith.constant 0 : index
    %c0_57 = arith.constant 0 : index
    %115 = vector.load %arg11[%c0_56, %c0_57] : memref<8x128xf32, #tpu.memory_space<vmem>>, vector<8x128xf32>
    %116 = arith.mulf %106, %115 : vector<8x128xf32>
    %117 = arith.mulf %100, %108 : vector<8x128xf32>
    %118 = arith.addf %116, %117 : vector<8x128xf32>
    %119 = math.tanh %118 : vector<8x128xf32>
    %120 = arith.mulf %114, %119 : vector<8x128xf32>
    %c0_58 = arith.constant 0 : index
    %c0_59 = arith.constant 0 : index
    %121 = vector.load %arg11[%c0_58, %c0_59] : memref<8x128xf32, #tpu.memory_space<vmem>>, vector<8x128xf32>
    tpu.vector_store %arg11[%c0_58, %c0_59], %118 {strides = array<i32>} : memref<8x128xf32, #tpu.memory_space<vmem>>, vector<8x128xf32>,
    %c0_60 = arith.constant 0 : index
    %c0_61 = arith.constant 0 : index
    %122 = vector.load %arg10[%c0_60, %c0_61] : memref<8x128xf32, #tpu.memory_space<vmem>>, vector<8x128xf32>
    tpu.vector_store %arg10[%c0_60, %c0_61], %120 {strides = array<i32>} : memref<8x128xf32, #tpu.memory_space<vmem>>, vector<8x128xf32>,
    %123 = arith.index_cast %88 : i32 to index
    %c0_62 = arith.constant 0 : index
    %124 = vector.load %arg7[%123, %c0_62] : memref<64x128xf32, #tpu.memory_space<vmem>>, vector<8x128xf32>
    tpu.vector_store %arg7[%123, %c0_62], %120 {strides = array<i32>} : memref<64x128xf32, #tpu.memory_space<vmem>>, vector<8x128xf32>,
    %c3_i32 = arith.constant 3 : i32
    %c8_i32_63 = arith.constant 8 : i32
    %125 = arith.muli %c3_i32, %c8_i32_63 : i32
    %126 = tpu.assume_multiple %125, 8 : i32
    %c0_64 = arith.constant 0 : index
    %c0_65 = arith.constant 0 : index
    %127 = vector.load %arg10[%c0_64, %c0_65] : memref<8x128xf32, #tpu.memory_space<vmem>>, vector<8x128xf32>
    %128 = arith.index_cast %126 : i32 to index
    %c0_66 = arith.constant 0 : index
    %129 = vector.load %arg9[%128, %c0_66] : memref<64x512xf32, #tpu.memory_space<vmem>>, vector<8x512xf32>
    %c0_67 = arith.constant 0 : index
    %c0_68 = arith.constant 0 : index
    %130 = vector.load %arg3[%c0_67, %c0_68] : memref<128x512xf32, #tpu.memory_space<vmem>>, vector<128x512xf32>
    %cst_69 = arith.constant dense<0.000000e+00> : vector<8x512xf32>
    %131 = tpu.matmul %127, %130, %cst_69 {dimension_numbers = #tpu.dot_dimension_numbers<[1], [0], [0], [1], [0, 0, 1, 1], [], []>} : vector<8x128xf32>, vector<128x512xf32>, vector<8x512xf32> -> vector<8x512xf32>
    %132 = arith.addf %129, %131 : vector<8x512xf32>
    %133 = vector.extract_strided_slice %132 {offsets = [0, 0], sizes = [8, 128], strides = [1, 1]} : vector<8x512xf32> to vector<8x128xf32>
    %134 = arith.negf %133 : vector<8x128xf32>
    %135 = math.exp %134 : vector<8x128xf32>
    %cst_70 = arith.constant 1.000000e+00 : f32
    %136 = vector.broadcast %cst_70 : f32 to vector<8x128xf32>
    %137 = arith.addf %136, %135 : vector<8x128xf32>
    %138 = arith.divf %136, %137 : vector<8x128xf32>
    %139 = vector.extract_strided_slice %132 {offsets = [0, 128], sizes = [8, 128], strides = [1, 1]} : vector<8x512xf32> to vector<8x128xf32>
    %140 = arith.negf %139 : vector<8x128xf32>
    %141 = math.exp %140 : vector<8x128xf32>
    %cst_71 = arith.constant 1.000000e+00 : f32
    %142 = vector.broadcast %cst_71 : f32 to vector<8x128xf32>
    %143 = arith.addf %142, %141 : vector<8x128xf32>
    %144 = arith.divf %142, %143 : vector<8x128xf32>
    %145 = vector.extract_strided_slice %132 {offsets = [0, 256], sizes = [8, 128], strides = [1, 1]} : vector<8x512xf32> to vector<8x128xf32>
    %146 = math.tanh %145 : vector<8x128xf32>
    %147 = vector.extract_strided_slice %132 {offsets = [0, 384], sizes = [8, 128], strides = [1, 1]} : vector<8x512xf32> to vector<8x128xf32>
    %148 = arith.negf %147 : vector<8x128xf32>
    %149 = math.exp %148 : vector<8x128xf32>
    %cst_72 = arith.constant 1.000000e+00 : f32
    %150 = vector.broadcast %cst_72 : f32 to vector<8x128xf32>
    %151 = arith.addf %150, %149 : vector<8x128xf32>
    %152 = arith.divf %150, %151 : vector<8x128xf32>
    %c0_73 = arith.constant 0 : index
    %c0_74 = arith.constant 0 : index
    %153 = vector.load %arg11[%c0_73, %c0_74] : memref<8x128xf32, #tpu.memory_space<vmem>>, vector<8x128xf32>
    %154 = arith.mulf %144, %153 : vector<8x128xf32>
    %155 = arith.mulf %138, %146 : vector<8x128xf32>
    %156 = arith.addf %154, %155 : vector<8x128xf32>
    %157 = math.tanh %156 : vector<8x128xf32>
    %158 = arith.mulf %152, %157 : vector<8x128xf32>
    %c0_75 = arith.constant 0 : index
    %c0_76 = arith.constant 0 : index
    %159 = vector.load %arg11[%c0_75, %c0_76] : memref<8x128xf32, #tpu.memory_space<vmem>>, vector<8x128xf32>
    tpu.vector_store %arg11[%c0_75, %c0_76], %156 {strides = array<i32>} : memref<8x128xf32, #tpu.memory_space<vmem>>, vector<8x128xf32>,
    %c0_77 = arith.constant 0 : index
    %c0_78 = arith.constant 0 : index
    %160 = vector.load %arg10[%c0_77, %c0_78] : memref<8x128xf32, #tpu.memory_space<vmem>>, vector<8x128xf32>
    tpu.vector_store %arg10[%c0_77, %c0_78], %158 {strides = array<i32>} : memref<8x128xf32, #tpu.memory_space<vmem>>, vector<8x128xf32>,
    %161 = arith.index_cast %126 : i32 to index
    %c0_79 = arith.constant 0 : index
    %162 = vector.load %arg7[%161, %c0_79] : memref<64x128xf32, #tpu.memory_space<vmem>>, vector<8x128xf32>
    tpu.vector_store %arg7[%161, %c0_79], %158 {strides = array<i32>} : memref<64x128xf32, #tpu.memory_space<vmem>>, vector<8x128xf32>,
    %c4_i32 = arith.constant 4 : i32
    %c8_i32_80 = arith.constant 8 : i32
    %163 = arith.muli %c4_i32, %c8_i32_80 : i32
    %164 = tpu.assume_multiple %163, 8 : i32
    %c0_81 = arith.constant 0 : index
    %c0_82 = arith.constant 0 : index
    %165 = vector.load %arg10[%c0_81, %c0_82] : memref<8x128xf32, #tpu.memory_space<vmem>>, vector<8x128xf32>
    %166 = arith.index_cast %164 : i32 to index
    %c0_83 = arith.constant 0 : index
    %167 = vector.load %arg9[%166, %c0_83] : memref<64x512xf32, #tpu.memory_space<vmem>>, vector<8x512xf32>
    %c0_84 = arith.constant 0 : index
    %c0_85 = arith.constant 0 : index
    %168 = vector.load %arg3[%c0_84, %c0_85] : memref<128x512xf32, #tpu.memory_space<vmem>>, vector<128x512xf32>
    %cst_86 = arith.constant dense<0.000000e+00> : vector<8x512xf32>
    %169 = tpu.matmul %165, %168, %cst_86 {dimension_numbers = #tpu.dot_dimension_numbers<[1], [0], [0], [1], [0, 0, 1, 1], [], []>} : vector<8x128xf32>, vector<128x512xf32>, vector<8x512xf32> -> vector<8x512xf32>
    %170 = arith.addf %167, %169 : vector<8x512xf32>
    %171 = vector.extract_strided_slice %170 {offsets = [0, 0], sizes = [8, 128], strides = [1, 1]} : vector<8x512xf32> to vector<8x128xf32>
    %172 = arith.negf %171 : vector<8x128xf32>
    %173 = math.exp %172 : vector<8x128xf32>
    %cst_87 = arith.constant 1.000000e+00 : f32
    %174 = vector.broadcast %cst_87 : f32 to vector<8x128xf32>
    %175 = arith.addf %174, %173 : vector<8x128xf32>
    %176 = arith.divf %174, %175 : vector<8x128xf32>
    %177 = vector.extract_strided_slice %170 {offsets = [0, 128], sizes = [8, 128], strides = [1, 1]} : vector<8x512xf32> to vector<8x128xf32>
    %178 = arith.negf %177 : vector<8x128xf32>
    %179 = math.exp %178 : vector<8x128xf32>
    %cst_88 = arith.constant 1.000000e+00 : f32
    %180 = vector.broadcast %cst_88 : f32 to vector<8x128xf32>
    %181 = arith.addf %180, %179 : vector<8x128xf32>
    %182 = arith.divf %180, %181 : vector<8x128xf32>
    %183 = vector.extract_strided_slice %170 {offsets = [0, 256], sizes = [8, 128], strides = [1, 1]} : vector<8x512xf32> to vector<8x128xf32>
    %184 = math.tanh %183 : vector<8x128xf32>
    %185 = vector.extract_strided_slice %170 {offsets = [0, 384], sizes = [8, 128], strides = [1, 1]} : vector<8x512xf32> to vector<8x128xf32>
    %186 = arith.negf %185 : vector<8x128xf32>
    %187 = math.exp %186 : vector<8x128xf32>
    %cst_89 = arith.constant 1.000000e+00 : f32
    %188 = vector.broadcast %cst_89 : f32 to vector<8x128xf32>
    %189 = arith.addf %188, %187 : vector<8x128xf32>
    %190 = arith.divf %188, %189 : vector<8x128xf32>
    %c0_90 = arith.constant 0 : index
    %c0_91 = arith.constant 0 : index
    %191 = vector.load %arg11[%c0_90, %c0_91] : memref<8x128xf32, #tpu.memory_space<vmem>>, vector<8x128xf32>
    %192 = arith.mulf %182, %191 : vector<8x128xf32>
    %193 = arith.mulf %176, %184 : vector<8x128xf32>
    %194 = arith.addf %192, %193 : vector<8x128xf32>
    %195 = math.tanh %194 : vector<8x128xf32>
    %196 = arith.mulf %190, %195 : vector<8x128xf32>
    %c0_92 = arith.constant 0 : index
    %c0_93 = arith.constant 0 : index
    %197 = vector.load %arg11[%c0_92, %c0_93] : memref<8x128xf32, #tpu.memory_space<vmem>>, vector<8x128xf32>
    tpu.vector_store %arg11[%c0_92, %c0_93], %194 {strides = array<i32>} : memref<8x128xf32, #tpu.memory_space<vmem>>, vector<8x128xf32>,
    %c0_94 = arith.constant 0 : index
    %c0_95 = arith.constant 0 : index
    %198 = vector.load %arg10[%c0_94, %c0_95] : memref<8x128xf32, #tpu.memory_space<vmem>>, vector<8x128xf32>
    tpu.vector_store %arg10[%c0_94, %c0_95], %196 {strides = array<i32>} : memref<8x128xf32, #tpu.memory_space<vmem>>, vector<8x128xf32>,
    %199 = arith.index_cast %164 : i32 to index
    %c0_96 = arith.constant 0 : index
    %200 = vector.load %arg7[%199, %c0_96] : memref<64x128xf32, #tpu.memory_space<vmem>>, vector<8x128xf32>
    tpu.vector_store %arg7[%199, %c0_96], %196 {strides = array<i32>} : memref<64x128xf32, #tpu.memory_space<vmem>>, vector<8x128xf32>,
    %c5_i32 = arith.constant 5 : i32
    %c8_i32_97 = arith.constant 8 : i32
    %201 = arith.muli %c5_i32, %c8_i32_97 : i32
    %202 = tpu.assume_multiple %201, 8 : i32
    %c0_98 = arith.constant 0 : index
    %c0_99 = arith.constant 0 : index
    %203 = vector.load %arg10[%c0_98, %c0_99] : memref<8x128xf32, #tpu.memory_space<vmem>>, vector<8x128xf32>
    %204 = arith.index_cast %202 : i32 to index
    %c0_100 = arith.constant 0 : index
    %205 = vector.load %arg9[%204, %c0_100] : memref<64x512xf32, #tpu.memory_space<vmem>>, vector<8x512xf32>
    %c0_101 = arith.constant 0 : index
    %c0_102 = arith.constant 0 : index
    %206 = vector.load %arg3[%c0_101, %c0_102] : memref<128x512xf32, #tpu.memory_space<vmem>>, vector<128x512xf32>
    %cst_103 = arith.constant dense<0.000000e+00> : vector<8x512xf32>
    %207 = tpu.matmul %203, %206, %cst_103 {dimension_numbers = #tpu.dot_dimension_numbers<[1], [0], [0], [1], [0, 0, 1, 1], [], []>} : vector<8x128xf32>, vector<128x512xf32>, vector<8x512xf32> -> vector<8x512xf32>
    %208 = arith.addf %205, %207 : vector<8x512xf32>
    %209 = vector.extract_strided_slice %208 {offsets = [0, 0], sizes = [8, 128], strides = [1, 1]} : vector<8x512xf32> to vector<8x128xf32>
    %210 = arith.negf %209 : vector<8x128xf32>
    %211 = math.exp %210 : vector<8x128xf32>
    %cst_104 = arith.constant 1.000000e+00 : f32
    %212 = vector.broadcast %cst_104 : f32 to vector<8x128xf32>
    %213 = arith.addf %212, %211 : vector<8x128xf32>
    %214 = arith.divf %212, %213 : vector<8x128xf32>
    %215 = vector.extract_strided_slice %208 {offsets = [0, 128], sizes = [8, 128], strides = [1, 1]} : vector<8x512xf32> to vector<8x128xf32>
    %216 = arith.negf %215 : vector<8x128xf32>
    %217 = math.exp %216 : vector<8x128xf32>
    %cst_105 = arith.constant 1.000000e+00 : f32
    %218 = vector.broadcast %cst_105 : f32 to vector<8x128xf32>
    %219 = arith.addf %218, %217 : vector<8x128xf32>
    %220 = arith.divf %218, %219 : vector<8x128xf32>
    %221 = vector.extract_strided_slice %208 {offsets = [0, 256], sizes = [8, 128], strides = [1, 1]} : vector<8x512xf32> to vector<8x128xf32>
    %222 = math.tanh %221 : vector<8x128xf32>
    %223 = vector.extract_strided_slice %208 {offsets = [0, 384], sizes = [8, 128], strides = [1, 1]} : vector<8x512xf32> to vector<8x128xf32>
    %224 = arith.negf %223 : vector<8x128xf32>
    %225 = math.exp %224 : vector<8x128xf32>
    %cst_106 = arith.constant 1.000000e+00 : f32
    %226 = vector.broadcast %cst_106 : f32 to vector<8x128xf32>
    %227 = arith.addf %226, %225 : vector<8x128xf32>
    %228 = arith.divf %226, %227 : vector<8x128xf32>
    %c0_107 = arith.constant 0 : index
    %c0_108 = arith.constant 0 : index
    %229 = vector.load %arg11[%c0_107, %c0_108] : memref<8x128xf32, #tpu.memory_space<vmem>>, vector<8x128xf32>
    %230 = arith.mulf %220, %229 : vector<8x128xf32>
    %231 = arith.mulf %214, %222 : vector<8x128xf32>
    %232 = arith.addf %230, %231 : vector<8x128xf32>
    %233 = math.tanh %232 : vector<8x128xf32>
    %234 = arith.mulf %228, %233 : vector<8x128xf32>
    %c0_109 = arith.constant 0 : index
    %c0_110 = arith.constant 0 : index
    %235 = vector.load %arg11[%c0_109, %c0_110] : memref<8x128xf32, #tpu.memory_space<vmem>>, vector<8x128xf32>
    tpu.vector_store %arg11[%c0_109, %c0_110], %232 {strides = array<i32>} : memref<8x128xf32, #tpu.memory_space<vmem>>, vector<8x128xf32>,
    %c0_111 = arith.constant 0 : index
    %c0_112 = arith.constant 0 : index
    %236 = vector.load %arg10[%c0_111, %c0_112] : memref<8x128xf32, #tpu.memory_space<vmem>>, vector<8x128xf32>
    tpu.vector_store %arg10[%c0_111, %c0_112], %234 {strides = array<i32>} : memref<8x128xf32, #tpu.memory_space<vmem>>, vector<8x128xf32>,
    %237 = arith.index_cast %202 : i32 to index
    %c0_113 = arith.constant 0 : index
    %238 = vector.load %arg7[%237, %c0_113] : memref<64x128xf32, #tpu.memory_space<vmem>>, vector<8x128xf32>
    tpu.vector_store %arg7[%237, %c0_113], %234 {strides = array<i32>} : memref<64x128xf32, #tpu.memory_space<vmem>>, vector<8x128xf32>,
    %c6_i32 = arith.constant 6 : i32
    %c8_i32_114 = arith.constant 8 : i32
    %239 = arith.muli %c6_i32, %c8_i32_114 : i32
    %240 = tpu.assume_multiple %239, 8 : i32
    %c0_115 = arith.constant 0 : index
    %c0_116 = arith.constant 0 : index
    %241 = vector.load %arg10[%c0_115, %c0_116] : memref<8x128xf32, #tpu.memory_space<vmem>>, vector<8x128xf32>
    %242 = arith.index_cast %240 : i32 to index
    %c0_117 = arith.constant 0 : index
    %243 = vector.load %arg9[%242, %c0_117] : memref<64x512xf32, #tpu.memory_space<vmem>>, vector<8x512xf32>
    %c0_118 = arith.constant 0 : index
    %c0_119 = arith.constant 0 : index
    %244 = vector.load %arg3[%c0_118, %c0_119] : memref<128x512xf32, #tpu.memory_space<vmem>>, vector<128x512xf32>
    %cst_120 = arith.constant dense<0.000000e+00> : vector<8x512xf32>
    %245 = tpu.matmul %241, %244, %cst_120 {dimension_numbers = #tpu.dot_dimension_numbers<[1], [0], [0], [1], [0, 0, 1, 1], [], []>} : vector<8x128xf32>, vector<128x512xf32>, vector<8x512xf32> -> vector<8x512xf32>
    %246 = arith.addf %243, %245 : vector<8x512xf32>
    %247 = vector.extract_strided_slice %246 {offsets = [0, 0], sizes = [8, 128], strides = [1, 1]} : vector<8x512xf32> to vector<8x128xf32>
    %248 = arith.negf %247 : vector<8x128xf32>
    %249 = math.exp %248 : vector<8x128xf32>
    %cst_121 = arith.constant 1.000000e+00 : f32
    %250 = vector.broadcast %cst_121 : f32 to vector<8x128xf32>
    %251 = arith.addf %250, %249 : vector<8x128xf32>
    %252 = arith.divf %250, %251 : vector<8x128xf32>
    %253 = vector.extract_strided_slice %246 {offsets = [0, 128], sizes = [8, 128], strides = [1, 1]} : vector<8x512xf32> to vector<8x128xf32>
    %254 = arith.negf %253 : vector<8x128xf32>
    %255 = math.exp %254 : vector<8x128xf32>
    %cst_122 = arith.constant 1.000000e+00 : f32
    %256 = vector.broadcast %cst_122 : f32 to vector<8x128xf32>
    %257 = arith.addf %256, %255 : vector<8x128xf32>
    %258 = arith.divf %256, %257 : vector<8x128xf32>
    %259 = vector.extract_strided_slice %246 {offsets = [0, 256], sizes = [8, 128], strides = [1, 1]} : vector<8x512xf32> to vector<8x128xf32>
    %260 = math.tanh %259 : vector<8x128xf32>
    %261 = vector.extract_strided_slice %246 {offsets = [0, 384], sizes = [8, 128], strides = [1, 1]} : vector<8x512xf32> to vector<8x128xf32>
    %262 = arith.negf %261 : vector<8x128xf32>
    %263 = math.exp %262 : vector<8x128xf32>
    %cst_123 = arith.constant 1.000000e+00 : f32
    %264 = vector.broadcast %cst_123 : f32 to vector<8x128xf32>
    %265 = arith.addf %264, %263 : vector<8x128xf32>
    %266 = arith.divf %264, %265 : vector<8x128xf32>
    %c0_124 = arith.constant 0 : index
    %c0_125 = arith.constant 0 : index
    %267 = vector.load %arg11[%c0_124, %c0_125] : memref<8x128xf32, #tpu.memory_space<vmem>>, vector<8x128xf32>
    %268 = arith.mulf %258, %267 : vector<8x128xf32>
    %269 = arith.mulf %252, %260 : vector<8x128xf32>
    %270 = arith.addf %268, %269 : vector<8x128xf32>
    %271 = math.tanh %270 : vector<8x128xf32>
    %272 = arith.mulf %266, %271 : vector<8x128xf32>
    %c0_126 = arith.constant 0 : index
    %c0_127 = arith.constant 0 : index
    %273 = vector.load %arg11[%c0_126, %c0_127] : memref<8x128xf32, #tpu.memory_space<vmem>>, vector<8x128xf32>
    tpu.vector_store %arg11[%c0_126, %c0_127], %270 {strides = array<i32>} : memref<8x128xf32, #tpu.memory_space<vmem>>, vector<8x128xf32>,
    %c0_128 = arith.constant 0 : index
    %c0_129 = arith.constant 0 : index
    %274 = vector.load %arg10[%c0_128, %c0_129] : memref<8x128xf32, #tpu.memory_space<vmem>>, vector<8x128xf32>
    tpu.vector_store %arg10[%c0_128, %c0_129], %272 {strides = array<i32>} : memref<8x128xf32, #tpu.memory_space<vmem>>, vector<8x128xf32>,
    %275 = arith.index_cast %240 : i32 to index
    %c0_130 = arith.constant 0 : index
    %276 = vector.load %arg7[%275, %c0_130] : memref<64x128xf32, #tpu.memory_space<vmem>>, vector<8x128xf32>
    tpu.vector_store %arg7[%275, %c0_130], %272 {strides = array<i32>} : memref<64x128xf32, #tpu.memory_space<vmem>>, vector<8x128xf32>,
    %c7_i32 = arith.constant 7 : i32
    %c8_i32_131 = arith.constant 8 : i32
    %277 = arith.muli %c7_i32, %c8_i32_131 : i32
    %278 = tpu.assume_multiple %277, 8 : i32
    %c0_132 = arith.constant 0 : index
    %c0_133 = arith.constant 0 : index
    %279 = vector.load %arg10[%c0_132, %c0_133] : memref<8x128xf32, #tpu.memory_space<vmem>>, vector<8x128xf32>
    %280 = arith.index_cast %278 : i32 to index
    %c0_134 = arith.constant 0 : index
    %281 = vector.load %arg9[%280, %c0_134] : memref<64x512xf32, #tpu.memory_space<vmem>>, vector<8x512xf32>
    %c0_135 = arith.constant 0 : index
    %c0_136 = arith.constant 0 : index
    %282 = vector.load %arg3[%c0_135, %c0_136] : memref<128x512xf32, #tpu.memory_space<vmem>>, vector<128x512xf32>
    %cst_137 = arith.constant dense<0.000000e+00> : vector<8x512xf32>
    %283 = tpu.matmul %279, %282, %cst_137 {dimension_numbers = #tpu.dot_dimension_numbers<[1], [0], [0], [1], [0, 0, 1, 1], [], []>} : vector<8x128xf32>, vector<128x512xf32>, vector<8x512xf32> -> vector<8x512xf32>
    %284 = arith.addf %281, %283 : vector<8x512xf32>
    %285 = vector.extract_strided_slice %284 {offsets = [0, 0], sizes = [8, 128], strides = [1, 1]} : vector<8x512xf32> to vector<8x128xf32>
    %286 = arith.negf %285 : vector<8x128xf32>
    %287 = math.exp %286 : vector<8x128xf32>
    %cst_138 = arith.constant 1.000000e+00 : f32
    %288 = vector.broadcast %cst_138 : f32 to vector<8x128xf32>
    %289 = arith.addf %288, %287 : vector<8x128xf32>
    %290 = arith.divf %288, %289 : vector<8x128xf32>
    %291 = vector.extract_strided_slice %284 {offsets = [0, 128], sizes = [8, 128], strides = [1, 1]} : vector<8x512xf32> to vector<8x128xf32>
    %292 = arith.negf %291 : vector<8x128xf32>
    %293 = math.exp %292 : vector<8x128xf32>
    %cst_139 = arith.constant 1.000000e+00 : f32
    %294 = vector.broadcast %cst_139 : f32 to vector<8x128xf32>
    %295 = arith.addf %294, %293 : vector<8x128xf32>
    %296 = arith.divf %294, %295 : vector<8x128xf32>
    %297 = vector.extract_strided_slice %284 {offsets = [0, 256], sizes = [8, 128], strides = [1, 1]} : vector<8x512xf32> to vector<8x128xf32>
    %298 = math.tanh %297 : vector<8x128xf32>
    %299 = vector.extract_strided_slice %284 {offsets = [0, 384], sizes = [8, 128], strides = [1, 1]} : vector<8x512xf32> to vector<8x128xf32>
    %300 = arith.negf %299 : vector<8x128xf32>
    %301 = math.exp %300 : vector<8x128xf32>
    %cst_140 = arith.constant 1.000000e+00 : f32
    %302 = vector.broadcast %cst_140 : f32 to vector<8x128xf32>
    %303 = arith.addf %302, %301 : vector<8x128xf32>
    %304 = arith.divf %302, %303 : vector<8x128xf32>
    %c0_141 = arith.constant 0 : index
    %c0_142 = arith.constant 0 : index
    %305 = vector.load %arg11[%c0_141, %c0_142] : memref<8x128xf32, #tpu.memory_space<vmem>>, vector<8x128xf32>
    %306 = arith.mulf %296, %305 : vector<8x128xf32>
    %307 = arith.mulf %290, %298 : vector<8x128xf32>
    %308 = arith.addf %306, %307 : vector<8x128xf32>
    %309 = math.tanh %308 : vector<8x128xf32>
    %310 = arith.mulf %304, %309 : vector<8x128xf32>
    %c0_143 = arith.constant 0 : index
    %c0_144 = arith.constant 0 : index
    %311 = vector.load %arg11[%c0_143, %c0_144] : memref<8x128xf32, #tpu.memory_space<vmem>>, vector<8x128xf32>
    tpu.vector_store %arg11[%c0_143, %c0_144], %308 {strides = array<i32>} : memref<8x128xf32, #tpu.memory_space<vmem>>, vector<8x128xf32>,
    %c0_145 = arith.constant 0 : index
    %c0_146 = arith.constant 0 : index
    %312 = vector.load %arg10[%c0_145, %c0_146] : memref<8x128xf32, #tpu.memory_space<vmem>>, vector<8x128xf32>
    tpu.vector_store %arg10[%c0_145, %c0_146], %310 {strides = array<i32>} : memref<8x128xf32, #tpu.memory_space<vmem>>, vector<8x128xf32>,
    %313 = arith.index_cast %278 : i32 to index
    %c0_147 = arith.constant 0 : index
    %314 = vector.load %arg7[%313, %c0_147] : memref<64x128xf32, #tpu.memory_space<vmem>>, vector<8x128xf32>
    tpu.vector_store %arg7[%313, %c0_147], %310 {strides = array<i32>} : memref<64x128xf32, #tpu.memory_space<vmem>>, vector<8x128xf32>,
    %c8_i32_148 = arith.constant 8 : i32
    %c0_149 = arith.constant 0 : index
    %c0_150 = arith.constant 0 : index
    %315 = vector.load %arg7[%c0_149, %c0_150] : memref<64x128xf32, #tpu.memory_space<vmem>>, vector<64x128xf32>
    %c0_151 = arith.constant 0 : index
    %c0_152 = arith.constant 0 : index
    %316 = vector.load %arg5[%c0_151, %c0_152] : memref<128x128xf32, #tpu.memory_space<vmem>>, vector<128x128xf32>
    %cst_153 = arith.constant dense<0.000000e+00> : vector<64x128xf32>
    %317 = tpu.matmul %315, %316, %cst_153 {dimension_numbers = #tpu.dot_dimension_numbers<[1], [0], [0], [1], [0, 0, 1, 1], [], []>} : vector<64x128xf32>, vector<128x128xf32>, vector<64x128xf32> -> vector<64x128xf32>
    %c0_154 = arith.constant 0 : index
    %c0_155 = arith.constant 0 : index
    %318 = vector.load %arg6[%c0_154, %c0_155] : memref<1x128xf32, #tpu.memory_space<vmem>>, vector<1x128xf32>
    %319 = vector.broadcast %318 : vector<1x128xf32> to vector<64x128xf32>
    %320 = arith.addf %317, %319 : vector<64x128xf32>
    %c0_156 = arith.constant 0 : index
    %c0_157 = arith.constant 0 : index
    %321 = vector.load %arg8[%c0_156, %c0_157] : memref<64x128xf32, #tpu.memory_space<vmem>>, vector<64x128xf32>
    tpu.vector_store %arg8[%c0_156, %c0_157], %320 {strides = array<i32>} : memref<64x128xf32, #tpu.memory_space<vmem>>, vector<64x128xf32>,
    return
  }
  func.func @transform_0(%arg0: i32) -> (i32, i32) {
    %c0_i32 = arith.constant 0 : i32
    %c0_i32_0 = arith.constant 0 : i32
    %c0_i32_1 = arith.constant 0 : i32
    return %c0_i32, %c0_i32_0 : i32, i32
  }
  func.func @transform_1(%arg0: i32) -> (i32, i32) {
    %c0_i32 = arith.constant 0 : i32
    %c0_i32_0 = arith.constant 0 : i32
    %c0_i32_1 = arith.constant 0 : i32
    return %c0_i32, %c0_i32_0 : i32, i32
  }
  func.func @transform_2(%arg0: i32) -> (i32, i32) {
    %c0_i32 = arith.constant 0 : i32
    %c0_i32_0 = arith.constant 0 : i32
    %c0_i32_1 = arith.constant 0 : i32
    return %c0_i32, %c0_i32_0 : i32, i32
  }
  func.func @transform_3(%arg0: i32) -> (i32, i32) {
    %c0_i32 = arith.constant 0 : i32
    %c0_i32_0 = arith.constant 0 : i32
    %c0_i32_1 = arith.constant 0 : i32
    return %c0_i32, %c0_i32_0 : i32, i32
  }
  func.func @transform_4(%arg0: i32) -> (i32, i32) {
    %c0_i32 = arith.constant 0 : i32
    %c0_i32_0 = arith.constant 0 : i32
    %c0_i32_1 = arith.constant 0 : i32
    return %c0_i32, %c0_i32_0 : i32, i32
  }
  func.func @transform_5(%arg0: i32) -> (i32, i32) {
    %c0_i32 = arith.constant 0 : i32
    %c0_i32_0 = arith.constant 0 : i32
    %c0_i32_1 = arith.constant 0 : i32
    return %c0_i32, %c0_i32_0 : i32, i32
  }
  func.func @transform_6(%arg0: i32) -> (i32, i32) {
    %c0_i32 = arith.constant 0 : i32
    %c0_i32_0 = arith.constant 0 : i32
    %c0_i32_1 = arith.constant 0 : i32
    return %c0_i32, %c0_i32_0 : i32, i32
  }
  func.func @transform_7(%arg0: i32) -> (i32, i32) {
    %c0_i32 = arith.constant 0 : i32
    %c0_i32_0 = arith.constant 0 : i32
    %c0_i32_1 = arith.constant 0 : i32
    return %c0_i32, %c0_i32_0 : i32, i32
  }
}

</mosaic_0001>

<bundles_post_ra>
// kernel: tpu_custom_call.1
= control target key start
LH: loop header
LB: loop body
LE: loop exit
PB: predicated region body
PF: predicated region fallthrough
CT: control target
= control target key end

     0   :  { %13 = vsyncpa [#allocation6], 0  ;;  %s3835_s0 = inlined_call_operand.vmem [shape: f32[64,16], index: 0, kind: input, shape index: {}]   ;;  %s3836_s1 = inlined_call_operand.vmem [shape: f32[16,512], index: 1, kind: input, shape index: {}]   ;;  %s3837_s2 = inlined_call_operand.hbm [shape: f32[128,512], index: 2, kind: input, shape index: {}]   ;;  %s3838_s3 = inlined_call_operand.vmem [shape: f32[1,512], index: 3, kind: input, shape index: {}]   ;;  %s3839_s4 = inlined_call_operand.hbm [shape: f32[128,128], index: 4, kind: input, shape index: {}]   ;;  %s3840_s5 = inlined_call_operand.vmem [shape: f32[1,128], index: 5, kind: input, shape index: {}]   ;;  %s3841_s6 = inlined_call_operand.hbm [shape: f32[64,128], index: 6, kind: output, shape index: {0}]   ;;  %s3842_s7 = inlined_call_operand.hbm [shape: f32[64,128], index: 7, kind: output, shape index: {1}]  }
   0x1   :  { %14 = vsyncpa [#allocation9], 0 }
   0x2   :  { %15 = vsyncpa [#allocation7], 0 }
   0x3   :  { %16 = vsyncpa [#allocation12], 0  ;;  %s25_s26 = sshll.u32 %s3837_s2, 4  ;;  %s2523_s27 = smov [#allocation5]   ;;  %s26_s26 = int_to_ptr.hbm [resolvable:$true] %s25_s26 }
   0x4   :  { %s27_s28 = sshll.u32 %s2523_s27, 4  ;;  %s40_s8 = sshll.u32 %s3839_s4, 4  ;;  %s28_s28 = int_to_ptr.vmem [resolvable:$true] %s27_s28  ;;  %s41_s8 = int_to_ptr.hbm [resolvable:$true] %s40_s8 }
   0x5   :  { %s2524_s9 = smov 512   ;;  %s2525_s10 = smov 32  }
   0x6   :  { %33 = dma.hbm_to_vmem [thread:$0]  %s26_s26, 8192, %s28_s28, [#allocation6], %s2524_s9, %s2524_s9, %s2525_s10  }
   0x7   :  { %s2526_s11 = smov [#allocation8]   ;;  %s2527_s13 = smov 128  }
   0x8   :  { %s42_s12 = sshll.u32 %s2526_s11, 4  ;;  %s2528_s14 = smov 8   ;;  %s43_s12 = int_to_ptr.vmem [resolvable:$true] %s42_s12 }
   0x9   :  { %48 = dma.hbm_to_vmem [thread:$0]  %s41_s8, 2048, %s43_s12, [#allocation9], %s2527_s13, %s2527_s13, %s2528_s14  }
   0xa   :  { %2515 = dma.done.wait [#allocation6], 8192  }
   0xb   :  { %2516 = vsyncadd [#allocation6], 4294959104 }
   0xc   :  { %2517 = dma.done.wait [#allocation9], 2048  }
   0xd   :  { %2518 = vsyncadd [#allocation9], 4294965248  ;;  %v71_v0 = vld [vmem:[%s3836_s1 + $0x20] sm:$0xff]  ;;  %v73_v1 = vld [vmem:[%s3836_s1 + $0x30] sm:$0xff]  ;;  %vm85_vm0 = vcmask 130048   ;;  %s2182_s26 = sshll.u32 %s3841_s6, 4  ;;  %s2183_s26 = int_to_ptr.hbm [resolvable:$true] %s2182_s26 }
   0xe   :  { %v67_v2 = vld [vmem:[%s3836_s1] sm:$0xff]  ;;  %2277 = vmatpush.msra.mxu1 %v71_v0  ;;  %2278 = vmatpush.msra.mxu3 %v71_v0  ;;  %v69_v3 = vld [vmem:[%s3836_s1 + $0x10] sm:$0xff]  ;;  %v2601_v5 = vld [vmem:[%s3835_s0 + $0x28] sm:$0xff]  ;;  %s2531_s27 = smov [#allocation11]   ;;  %s2195_s6 = sshll.u32 %s3842_s7, 4  ;;  %s2196_s6 = int_to_ptr.hbm [resolvable:$true] %s2195_s6 }
   0xf   :  { %v2596_v4 = vld [vmem:[%s3835_s0 + $0x20] sm:$0xff]  ;;  %206 = vmatpush.msra.mxu2 %v73_v1  ;;  %124 = vmatpush.msra.mxu0 %v71_v0  ;;  %v74_v7 = vld [vmem:[%s3836_s1 + $0x38] sm:$0xff]  ;;  %v72_v8 = vld [vmem:[%s3836_s1 + $0x28] sm:$0xff]  ;;  %s2193_s28 = sshll.u32 %s2531_s27, 4  ;;  %s2194_s28 = int_to_ptr.vmem [resolvable:$true] %s2193_s28 }
  0x10   :  { %v2606_v6 = vld [vmem:[%s3835_s0] sm:$0xff]  ;;  %2279 = vmatpush.msra.mxu1 %v67_v2  ;;  %2280 = vmatpush.msra.mxu3 %v67_v2  ;;  %v68_v10 = vld [vmem:[%s3836_s1 + $0x8] sm:$0xff]  ;;  %v70_v11 = vld [vmem:[%s3836_s1 + $0x18] sm:$0xff] }
  0x11   :  { %207 = vmatpush.msra.mxu2 %v69_v3  ;;  %2225 = vmatmul.msk.f32.vlgmr.msra.gmra.mxu1 %vm85_vm0, %v2596_v4  ;;  %v2616_v9 = vld [vmem:[#allocation5 + $0x1e0] sm:$0xff]  ;;  %v2630_v13 = vld [vmem:[#allocation5 + $0x1e8] sm:$0xff]  ;;  %v2637_v16 = vld [vmem:[#allocation5 + $0x1f8] sm:$0xff] }
  0x12   :  { %2226 = vmatmul.msk.f32.vlgmr.msra.gmra.mxu3 %vm85_vm0, %v2601_v5  ;;  %2237 = vmatmul.msk.f32.vlgmr.msra.gmra.mxu2 %vm85_vm0, %v2606_v6  ;;  %v2628_v12 = vld [vmem:[#allocation5 + $0x1c0] sm:$0xff]  ;;  %v2635_v15 = vld [vmem:[#allocation5 + $0x1c8] sm:$0xff]  ;;  %v2644_v17 = vld [vmem:[%s3835_s0 + $0x30] sm:$0xff] }
  0x13   :  { %247 = vmatpush.msrb.mxu3 %v74_v7  ;;  %165 = vmatpush.msrb.mxu1 %v72_v8  ;;  %v2633_v14 = vld [vmem:[#allocation5 + $0x1a0] sm:$0xff]  ;;  %v2649_v18 = vld [vmem:[%s3835_s0 + $0x8] sm:$0xff]  ;;  %v2652_v19 = vld [vmem:[#allocation5 + $0x1d8] sm:$0xff] }
  0x14   :  { %380 = vmatpush.msrb.mxu2 %v2616_v9  ;;  %125 = vmatpush.msra.mxu0 %v67_v2  ;;  %v2657_v20 = vld [vmem:[#allocation5 + $0x180] sm:$0xff]  ;;  %v2660_v21 = vld [vmem:[#allocation5 + $0x1a8] sm:$0xff]  ;;  %v2665_v22 = vld [vmem:[#allocation5 + $0x1b8] sm:$0xff] }
  0x15   :  { %166 = vmatpush.msrb.mxu1 %v68_v10  ;;  %248 = vmatpush.msrb.mxu3 %v70_v11  ;;  %v2671_v23 = vld [vmem:[#allocation5 + $0x160] sm:$0xff]  ;;  %v2673_v24 = vld [vmem:[#allocation5 + $0x188] sm:$0xff]  ;;  %v2677_v25 = vld [vmem:[#allocation5 + $0x198] sm:$0xff] }
  0x16   :  { %381 = vmatpush.msrb.mxu2 %v2628_v12  ;;  %2221 = vmatmul.msk.f32.vlgmr.msra.gmra.mxu0 %vm85_vm0, %v2606_v6  ;;  %v356_v26 = vld [vmem:[#allocation5 + $0x140] sm:$0xff]  ;;  %v2680_v27 = vld [vmem:[#allocation5 + $0x168] sm:$0xff]  ;;  %v2685_v28 = vld [vmem:[#allocation5 + $0x178] sm:$0xff] }
  0x17   :  { %400 = vmatpush.msra.mxu1 %v2630_v13  ;;  %440 = vmatpush.msra.mxu3 %v2637_v16  ;;  %v352_v29 = vld [vmem:[#allocation5 + $0x120] sm:$0xff]  ;;  %v2692_v30 = vld [vmem:[%s3835_s0 + $0x38] sm:$0xff]  ;;  %v2697_v31 = vld [vmem:[%s3835_s0 + $0x10] sm:$0xff] }
  0x18   :  { %382 = vmatpush.msrb.mxu2 %v2633_v14  ;;  %603 = vmatpush.msrb.mxu0 %v2616_v9  ;;  %v348_v32 = vld [vmem:[#allocation5 + $0x100] sm:$0xff]  ;;  %v2700_v33 = vld [vmem:[#allocation5 + $0x148] sm:$0xff]  ;;  %v2706_v34 = vld [vmem:[#allocation5 + $0x158] sm:$0xff] }
  0x19   :  { %401 = vmatpush.msra.mxu1 %v2635_v15  ;;  %441 = vmatpush.msra.mxu3 %v2652_v19  ;;  %v2712_v35 = vld [vmem:[#allocation5 + $0xe0] sm:$0xff]  ;;  %v2714_v36 = vld [vmem:[#allocation5 + $0x128] sm:$0xff]  ;;  %v2717_v37 = vld [vmem:[#allocation5 + $0x138] sm:$0xff] }
  0x1a   :  { %2229 = vmatmul.msk.f32.vlgmr.msrb.gmra.mxu1 %vm85_vm0, %v2606_v6  ;;  %2227 = vmatmul.msk.f32.gmra.mxu3 %vm85_vm0, %v2644_v17  ;;  %v2719_v38 = vld [vmem:[#allocation5 + $0xc0] sm:$0xff]  ;;  %v2722_v39 = vld [vmem:[#allocation5 + $0x108] sm:$0xff]  ;;  %v2727_v40 = vld [vmem:[#allocation5 + $0x118] sm:$0xff] }
  0x1b   :  { %2238 = vmatmul.msk.f32.gmra.mxu2 %vm85_vm0, %v2649_v18  ;;  %402 = vmatpush.msra.mxu1 %v2660_v21  ;;  %v2729_v41 = vld [vmem:[#allocation5 + $0xa0] sm:$0xff]  ;;  %v2737_v42 = vld [vmem:[%s3835_s0 + $0x18] sm:$0xff]  ;;  %v2743_v44 = vld [vmem:[#allocation5 + $0xe8] sm:$0xff] }
  0x1c   :  { %383 = vmatpush.msrb.mxu2 %v2657_v20  ;;  %442 = vmatpush.msra.mxu3 %v2665_v22  ;;  %v2741_v43 = vld [vmem:[#allocation5 + $0x80] sm:$0xff]  ;;  %v2756_v46 = vld [vmem:[#allocation5 + $0xc8] sm:$0xff]  ;;  %v2758_v47 = vld [vmem:[#allocation5 + $0xf8] sm:$0xff] }
  0x1d   :  { %403 = vmatpush.msra.mxu1 %v2673_v24  ;;  %604 = vmatpush.msrb.mxu0 %v2628_v12  ;;  %v2754_v45 = vld [vmem:[#allocation5 + $0x60] sm:$0xff]  ;;  %v2762_v48 = vld [vmem:[#allocation5 + $0xd8] sm:$0xff]  ;;  %v2767_v50 = vld [vmem:[#allocation5 + $0xa8] sm:$0xff] }
  0x1e   :  { %384 = vmatpush.msrb.mxu2 %v2671_v23  ;;  %443 = vmatpush.msra.mxu3 %v2677_v25  ;;  %v2764_v49 = vld [vmem:[#allocation5 + $0x40] sm:$0xff]  ;;  %v2778_v53 = vld [vmem:[#allocation5 + $0x88] sm:$0xff]  ;;  %v2783_v54 = vld [vmem:[#allocation5 + $0x1f0] sm:$0xff] }
  0x1f   :  { %404 = vmatpush.msra.mxu1 %v2680_v27  ;;  %605 = vmatpush.msrb.mxu0 %v2633_v14  ;;  %v2771_v51 = vld [vmem:[#allocation5 + $0x20] sm:$0xff]  ;;  %v2789_v55 = vld [vmem:[#allocation5 + $0xb8] sm:$0xff]  ;;  %v2791_v56 = vld [vmem:[#allocation5 + $0x68] sm:$0xff] }
  0x20   :  { %385 = vmatpush.msrb.mxu2 %v356_v26  ;;  %444 = vmatpush.msra.mxu3 %v2685_v28  ;;  %v2776_v52 = vld [vmem:[#allocation5] sm:$0xff]  ;;  %v2794_v57 = vld [vmem:[#allocation5 + $0x1d0] sm:$0xff]  ;;  %v2797_v58 = vld [vmem:[#allocation5 + $0x98] sm:$0xff] }
  0x21   :  { %405 = vmatpush.msra.mxu1 %v2700_v33  ;;  %606 = vmatpush.msrb.mxu0 %v2657_v20  ;;  %v2801_v59 = vld [vmem:[#allocation5 + $0x48] sm:$0xff]  ;;  %v2803_v60 = vld [vmem:[#allocation5 + $0x1b0] sm:$0xff]  ;;  %v2828_v1 = vld [vmem:[#allocation5 + $0x78] sm:$0xff] }
  0x22   :  { %2230 = vmatmul.msk.f32.gmra.mxu1 %vm85_vm0, %v2649_v18  ;;  %386 = vmatpush.msrb.mxu2 %v352_v29  ;;  %v2813_v61 = vld [vmem:[#allocation5 + $0x190] sm:$0xff]  ;;  %v2815_v62 = vld [vmem:[#allocation5 + $0x28] sm:$0xff]  ;;  %v2832_v2 = vld [vmem:[#allocation5 + $0x58] sm:$0xff] }
  0x23   :  { %2228 = vmatmul.msk.f32.gmra.mxu3 %vm85_vm0, %v2692_v30  ;;  %2239 = vmatmul.msk.f32.gmra.mxu2 %vm85_vm0, %v2697_v31  ;;  %v2824_v63 = vld [vmem:[#allocation5 + $0x170] sm:$0xff]  ;;  %v2826_v0 = vld [vmem:[#allocation5 + $0x8] sm:$0xff]  ;;  %v2860_v10 = vld [vmem:[#allocation5 + $0x38] sm:$0xff] }
  0x24   :  { %387 = vmatpush.msrb.mxu2 %v348_v32  ;;  %445 = vmatpush.msra.mxu3 %v2706_v34  ;;  %v2834_v3 = vld [vmem:[#allocation5 + $0x150] sm:$0xff]  ;;  %v2862_v11 = vld [vmem:[#allocation5 + $0x18] sm:$0xff] }
  0x25   :  { %406 = vmatpush.msra.mxu1 %v2714_v36  ;;  %2222 = vmatmul.msk.f32.gmra.mxu0 %vm85_vm0, %v2649_v18  ;;  %v2846_v7 = vld [vmem:[#allocation5 + $0x110] sm:$0xff] }
  0x26   :  { %388 = vmatpush.msrb.mxu2 %v2712_v35  ;;  %446 = vmatpush.msra.mxu3 %v2717_v37  ;;  %v2858_v8 = vld [vmem:[#allocation5 + $0xf0] sm:$0xff] }
  0x27   :  { %407 = vmatpush.msra.mxu1 %v2722_v39  ;;  %607 = vmatpush.msrb.mxu0 %v2671_v23 }
  0x28   :  { %389 = vmatpush.msrb.mxu2 %v2719_v38  ;;  %447 = vmatpush.msra.mxu3 %v2727_v40 }
  0x29   :  { %408 = vmatpush.msra.mxu1 %v2743_v44  ;;  %608 = vmatpush.msrb.mxu0 %v356_v26  ;;  %v2872_v26 = vld [vmem:[#allocation5 + $0xb0] sm:$0xff] }
  0x2a   :  { %2231 = vmatmul.msk.f32.gmra.mxu1 %vm85_vm0, %v2697_v31  ;;  %390 = vmatpush.msrb.mxu2 %v2729_v41 }
  0x2b   :  { %2240 = vmatmul.msk.f32.gmra.mxu2 %vm85_vm0, %v2737_v42  ;;  %2245 = vmatmul.msk.f32.vlgmr.msrb.gmra.mxu3 %vm85_vm0, %v2606_v6  ;;  %v2840_v6 = vld [vmem:[#allocation5 + $0x130] sm:$0xff] }
  0x2c   :  { %391 = vmatpush.msrb.mxu2 %v2741_v43  ;;  %448 = vmatpush.msra.mxu3 %v2758_v47 }
  0x2d   :  { %409 = vmatpush.msra.mxu1 %v2756_v46  ;;  %609 = vmatpush.msrb.mxu0 %v352_v29  ;;  %v2878_v29 = vld [vmem:[#allocation5 + $0x90] sm:$0xff] }
  0x2e   :  { %392 = vmatpush.msrb.mxu2 %v2754_v45  ;;  %449 = vmatpush.msra.mxu3 %v2762_v48 }
  0x2f   :  { %410 = vmatpush.msra.mxu1 %v2767_v50  ;;  %610 = vmatpush.msrb.mxu0 %v348_v32  ;;  %v2893_v32 = vld [vmem:[#allocation5 + $0x50] sm:$0xff] }
  0x30   :  { %393 = vmatpush.msrb.mxu2 %v2764_v49  ;;  %450 = vmatpush.msra.mxu3 %v2789_v55 }
  0x31   :  { %411 = vmatpush.msra.mxu1 %v2778_v53  ;;  %2223 = vmatmul.msk.f32.gmra.mxu0 %vm85_vm0, %v2697_v31 }
  0x32   :  { %2232 = vmatmul.msk.f32.gmra.mxu1 %vm85_vm0, %v2737_v42  ;;  %394 = vmatpush.msrb.mxu2 %v2771_v51 }
  0x33   :  { %2241 = vmatmul.msk.f32.gmra.mxu2 %vm85_vm0, %v2596_v4  ;;  %2246 = vmatmul.msk.f32.gmra.mxu3 %vm85_vm0, %v2649_v18  ;;  %v2866_v18 = vld [vmem:[#allocation5 + $0xd0] sm:$0xff] }
  0x34   :  { %395 = vmatpush.msrb.mxu2 %v2776_v52  ;;  %412 = vmatpush.msra.mxu1 %v2791_v56 }
  0x35   :  { %451 = vmatpush.msra.mxu3 %v2797_v58  ;;  %611 = vmatpush.msrb.mxu0 %v2712_v35  ;;  %v2899_v35 = vld [vmem:[#allocation5 + $0x30] sm:$0xff] }
  0x36   :  { %420 = vmatpush.msra.mxu2 %v2783_v54  ;;  %413 = vmatpush.msra.mxu1 %v2801_v59 }
  0x37   :  { %612 = vmatpush.msrb.mxu0 %v2719_v38  ;;  %452 = vmatpush.msra.mxu3 %v2828_v1  ;;  %v2529_v38 = vmov 0.0  }
  0x38   :  { %421 = vmatpush.msra.mxu2 %v2794_v57  ;;  %414 = vmatpush.msra.mxu1 %v2815_v62 }
  0x39   :  { %613 = vmatpush.msrb.mxu0 %v2729_v41  ;;  %453 = vmatpush.msra.mxu3 %v2832_v2 }
  0x3a   :  { %422 = vmatpush.msra.mxu2 %v2803_v60  ;;  %2233 = vmatmul.msk.f32.gmra.mxu1 %vm85_vm0, %v2596_v4 }
  0x3b   :  { %2242 = vmatmul.msk.f32.gmra.mxu2 %vm85_vm0, %v2601_v5  ;;  %2247 = vmatmul.msk.f32.gmra.mxu3 %vm85_vm0, %v2697_v31  ;;  %v2889_v31 = vld [vmem:[#allocation5 + $0x70] sm:$0xff] }
  0x3c   :  { %423 = vmatpush.msra.mxu2 %v2813_v61  ;;  %415 = vmatpush.msra.mxu1 %v2826_v0 }
  0x3d   :  { %614 = vmatpush.msrb.mxu0 %v2741_v43  ;;  %454 = vmatpush.msra.mxu3 %v2860_v10 }
  0x3e   :  { %424 = vmatpush.msra.mxu2 %v2824_v63  ;;  %623 = vmatpush.msrb.mxu1 %v2630_v13 }
  0x3f   :  { %2224 = vmatmul.msk.f32.gmra.mxu0 %vm85_vm0, %v2737_v42  ;;  %455 = vmatpush.msra.mxu3 %v2862_v11 }
  0x40   :  { %425 = vmatpush.msra.mxu2 %v2834_v3  ;;  %624 = vmatpush.msrb.mxu1 %v2635_v15 }
  0x41   :  { %615 = vmatpush.msrb.mxu0 %v2754_v45  ;;  %663 = vmatpush.msrb.mxu3 %v2637_v16 }
  0x42   :  { %2234 = vmatmul.msk.f32.gmra.mxu1 %vm85_vm0, %v2601_v5  ;;  %426 = vmatpush.msra.mxu2 %v2840_v6 }
  0x43   :  { %2243 = vmatmul.msk.f32.gmra.mxu2 %vm85_vm0, %v2644_v17  ;;  %2248 = vmatmul.msk.f32.gmra.mxu3 %vm85_vm0, %v2737_v42 }
  0x44   :  { %427 = vmatpush.msra.mxu2 %v2846_v7  ;;  %625 = vmatpush.msrb.mxu1 %v2660_v21 }
  0x45   :  { %616 = vmatpush.msrb.mxu0 %v2764_v49  ;;  %664 = vmatpush.msrb.mxu3 %v2652_v19 }
  0x46   :  { %428 = vmatpush.msra.mxu2 %v2858_v8  ;;  %626 = vmatpush.msrb.mxu1 %v2673_v24 }
  0x47   :  { %665 = vmatpush.msrb.mxu3 %v2665_v22  ;;  %617 = vmatpush.msrb.mxu0 %v2771_v51 }
  0x48   :  { %429 = vmatpush.msra.mxu2 %v2866_v18  ;;  %627 = vmatpush.msrb.mxu1 %v2680_v27 }
  0x49   :  { %666 = vmatpush.msrb.mxu3 %v2677_v25  ;;  %618 = vmatpush.msrb.mxu0 %v2776_v52 }
  0x4a   :  { %2235 = vmatmul.msk.f32.gmra.mxu1 %vm85_vm0, %v2644_v17  ;;  %430 = vmatpush.msra.mxu2 %v2872_v26 }
  0x4b   :  { %2244 = vmatmul.msk.f32.gmra.mxu2 %vm85_vm0, %v2692_v30  ;;  %2249 = vmatmul.msk.f32.gmra.mxu3 %vm85_vm0, %v2596_v4  ;;  %v2905_v4 = vld [vmem:[#allocation5 + $0x10] sm:$0xff] }
  0x4c   :  { %431 = vmatpush.msra.mxu2 %v2878_v29  ;;  %628 = vmatpush.msrb.mxu1 %v2700_v33 }
  0x4d   :  { %667 = vmatpush.msrb.mxu3 %v2685_v28  ;;  %827 = vmatpush.msra.mxu0 %v2616_v9 }
  0x4e   :  { %432 = vmatpush.msra.mxu2 %v2889_v31  ;;  %629 = vmatpush.msrb.mxu1 %v2714_v36 }
  0x4f   :  { %668 = vmatpush.msrb.mxu3 %v2706_v34  ;;  %828 = vmatpush.msra.mxu0 %v2628_v12 }
  0x50   :  { %433 = vmatpush.msra.mxu2 %v2893_v32  ;;  %630 = vmatpush.msrb.mxu1 %v2722_v39 }
  0x51   :  { %669 = vmatpush.msrb.mxu3 %v2717_v37  ;;  %829 = vmatpush.msra.mxu0 %v2633_v14  ;;  %v75_v14 = vld [vmem:[%s3838_s3] sm:$0xf] }
  0x52   :  { %2236 = vmatmul.msk.f32.gmra.mxu1 %vm85_vm0, %v2692_v30  ;;  %434 = vmatpush.msra.mxu2 %v2899_v35 }
  0x53   :  { %2250 = vmatmul.msk.f32.gmra.mxu3 %vm85_vm0, %v2601_v5  ;;  %396 = vmatmul.f32.vlgmr.msrb.gmra.mxu2 %v2529_v38 }
  0x54   :  { %435 = vmatpush.msra.mxu2 %v2905_v4  ;;  %631 = vmatpush.msrb.mxu1 %v2743_v44 }
  0x55   :  { %670 = vmatpush.msrb.mxu3 %v2727_v40  ;;  %830 = vmatpush.msra.mxu0 %v2657_v20 }
  0x56   :  { %643 = vmatpush.msrb.mxu2 %v2783_v54  ;;  %632 = vmatpush.msrb.mxu1 %v2756_v46 }
  0x57   :  { %671 = vmatpush.msrb.mxu3 %v2758_v47  ;;  %831 = vmatpush.msra.mxu0 %v2671_v23 }
  0x58   :  { %644 = vmatpush.msrb.mxu2 %v2794_v57  ;;  %633 = vmatpush.msrb.mxu1 %v2767_v50 }
  0x59   :  { %672 = vmatpush.msrb.mxu3 %v2762_v48 }
  0x5a   :  { %645 = vmatpush.msrb.mxu2 %v2803_v60  ;;  %416 = vmatmul.f32.vlgmr.msra.gmra.mxu1 %v2529_v38 }
  0x5b   :  { %2251 = vmatmul.msk.f32.gmra.mxu3 %vm85_vm0, %v2644_v17  ;;  %436 = vmatmul.f32.vlgmr.msra.gmra.mxu2 %v2529_v38 }
  0x5c   :  { %646 = vmatpush.msrb.mxu2 %v2813_v61  ;;  %634 = vmatpush.msrb.mxu1 %v2778_v53 }
  0x5d   :  { %673 = vmatpush.msrb.mxu3 %v2789_v55 }
  0x5e   :  { %647 = vmatpush.msrb.mxu2 %v2824_v63  ;;  %635 = vmatpush.msrb.mxu1 %v2791_v56 }
  0x5f   :  { %674 = vmatpush.msrb.mxu3 %v2797_v58 }
  0x60   :  { %648 = vmatpush.msrb.mxu2 %v2834_v3  ;;  %636 = vmatpush.msrb.mxu1 %v2801_v59 }
  0x61   :  { %675 = vmatpush.msrb.mxu3 %v2828_v1 }
  0x62   :  { %649 = vmatpush.msrb.mxu2 %v2840_v6  ;;  %637 = vmatpush.msrb.mxu1 %v2815_v62 }
  0x63   :  { %2252 = vmatmul.msk.f32.gmra.mxu3 %vm85_vm0, %v2692_v30 }
  0x64   :  { %650 = vmatpush.msrb.mxu2 %v2846_v7  ;;  %676 = vmatpush.msrb.mxu3 %v2832_v2 }
  0x65   :  { %638 = vmatpush.msrb.mxu1 %v2826_v0 }
  0x66   :  { %651 = vmatpush.msrb.mxu2 %v2858_v8  ;;  %677 = vmatpush.msrb.mxu3 %v2860_v10 }
  0x67   :  { %847 = vmatpush.msra.mxu1 %v2630_v13 }
  0x68   :  { %652 = vmatpush.msrb.mxu2 %v2866_v18  ;;  %678 = vmatpush.msrb.mxu3 %v2862_v11 }
  0x69   :  { %848 = vmatpush.msra.mxu1 %v2635_v15  ;;  %v3015_v15 = vperm.slane %v75_v14, 2 }
  0x6a   :  { %653 = vmatpush.msrb.mxu2 %v2872_v26 }
  0x6b   :  { %456 = vmatmul.f32.vlgmr.msra.gmra.mxu3 %v2529_v38  ;;  %849 = vmatpush.msra.mxu1 %v2660_v21 }
  0x6c   :  { %654 = vmatpush.msrb.mxu2 %v2878_v29  ;;  %887 = vmatpush.msra.mxu3 %v2637_v16  ;;  %v78_v16 = vperm.slane %v75_v14, 1 }
  0x6d   :  { %850 = vmatpush.msra.mxu1 %v2673_v24 }
  0x6e   :  { %655 = vmatpush.msrb.mxu2 %v2889_v31  ;;  %888 = vmatpush.msra.mxu3 %v2652_v19 }
  0x6f   :  { %851 = vmatpush.msra.mxu1 %v2680_v27 }
  0x70   :  { %656 = vmatpush.msrb.mxu2 %v2893_v32  ;;  %889 = vmatpush.msra.mxu3 %v2665_v22 }
  0x71   :  { %852 = vmatpush.msra.mxu1 %v2700_v33 }
  0x72   :  { %657 = vmatpush.msrb.mxu2 %v2899_v35  ;;  %890 = vmatpush.msra.mxu3 %v2677_v25 }
  0x73   :  { %853 = vmatpush.msra.mxu1 %v2714_v36 }
  0x74   :  { %658 = vmatpush.msrb.mxu2 %v2905_v4  ;;  %891 = vmatpush.msra.mxu3 %v2685_v28 }
  0x75   :  { %854 = vmatpush.msra.mxu1 %v2722_v39  ;;  %v80_v39 = vperm.slane %v75_v14, 3 }
  0x76   :  { %867 = vmatpush.msra.mxu2 %v2783_v54  ;;  %892 = vmatpush.msra.mxu3 %v2706_v34 }
  0x77   :  { %855 = vmatpush.msra.mxu1 %v2743_v44 }
  0x78   :  { %868 = vmatpush.msra.mxu2 %v2794_v57  ;;  %893 = vmatpush.msra.mxu3 %v2717_v37 }
  0x79   :  { %856 = vmatpush.msra.mxu1 %v2756_v46 }
  0x7a   :  { %869 = vmatpush.msra.mxu2 %v2803_v60  ;;  %894 = vmatpush.msra.mxu3 %v2727_v40 }
  0x7b   :  { %857 = vmatpush.msra.mxu1 %v2767_v50 }
  0x7c   :  { %870 = vmatpush.msra.mxu2 %v2813_v61  ;;  %895 = vmatpush.msra.mxu3 %v2758_v47 }
  0x7d   :  { %858 = vmatpush.msra.mxu1 %v2778_v53 }
  0x7e   :  { %871 = vmatpush.msra.mxu2 %v2824_v63  ;;  %896 = vmatpush.msra.mxu3 %v2762_v48 }
  0x7f   :  { %859 = vmatpush.msra.mxu1 %v2791_v56 }
  0x80   :  { %872 = vmatpush.msra.mxu2 %v2834_v3  ;;  %897 = vmatpush.msra.mxu3 %v2789_v55 }
  0x81   :  { %860 = vmatpush.msra.mxu1 %v2801_v59 }
  0x82   :  { %873 = vmatpush.msra.mxu2 %v2840_v6  ;;  %898 = vmatpush.msra.mxu3 %v2797_v58 }
  0x83   :  { %861 = vmatpush.msra.mxu1 %v2815_v62 }
  0x84   :  { %874 = vmatpush.msra.mxu2 %v2846_v7  ;;  %899 = vmatpush.msra.mxu3 %v2828_v1  ;;  %v3064_v1 = vperm.slane %v75_v14, 0 }
  0x85   :  { %862 = vmatpush.msra.mxu1 %v2826_v0 }
  0x86   :  { %875 = vmatpush.msra.mxu2 %v2858_v8  ;;  %900 = vmatpush.msra.mxu3 %v2832_v2  ;;  %3892 = vst [vmem:[#allocation33_spill] sm:$0xff] %v3064_v1 }
  0x88   :  { %876 = vmatpush.msra.mxu2 %v2866_v18  ;;  %901 = vmatpush.msra.mxu3 %v2860_v10 }
  0x8a   :  { %877 = vmatpush.msra.mxu2 %v2872_v26  ;;  %902 = vmatpush.msra.mxu3 %v2862_v11 }
  0x8c   :  { %878 = vmatpush.msra.mxu2 %v2878_v29 }
  0x8e   :  { %879 = vmatpush.msra.mxu2 %v2889_v31  ;;  %v3003_v5 = vpop.f32.mrf.mxu1 }
  0x8f   :  { %3876 = vst [vmem:[#allocation17_spill] sm:$0xff] %v3003_v5 }
  0x90   :  { %880 = vmatpush.msra.mxu2 %v2893_v32 }
  0x92   :  { %881 = vmatpush.msra.mxu2 %v2899_v35 }
  0x93   :  { %v127_v0 = vpop.f32.mrf.mxu0 }
  0x94   :  { %882 = vmatpush.msra.mxu2 %v2905_v4  ;;  %v128_v2 = vadd.f32 %v127_v0, %v3064_v1 }
  0x95   :  { %v3008_v9 = vpop.f32.mrf.mxu3  ;;  %v3010_v12 = vpop.f32.mrf.mxu2 }
  0x96   :  { %3877 = vst [vmem:[#allocation18_spill] sm:$0xff] %v3008_v9 }
  0x97   :  { %v168_v13 = vpop.f32.mrf.mxu1 }
  0x98   :  { %v169_v3 = vadd.f32 %v168_v13, %v78_v16 }
  0x9d   :  { %v3017_v17 = vpop.f32.mrf.mxu3 }
  0x9e   :  { %3878 = vst [vmem:[#allocation19_spill] sm:$0xff] %v3017_v17  ;;  %v212_v19 = vpop.f32.mrf.mxu2 }
  0x9f   :  { %v3020_v20 = vadd.f32 %v212_v19, %v3015_v15  ;;  %v171_v21 = vpop.f32.mrf.mxu1 }
  0xa0   :  { %v3022_v22 = vadd.f32 %v171_v21, %v78_v16 }
  0xa6   :  { %v3024_v23 = vpop.f32.mrf.mxu3  ;;  %v215_v24 = vpop.f32.mrf.mxu2 }
  0xa7   :  { %3879 = vst [vmem:[#allocation20_spill] sm:$0xff] %v3024_v23  ;;  %v3027_v25 = vadd.f32 %v215_v24, %v3015_v15  ;;  %v174_v27 = vpop.f32.mrf.mxu1  ;;  %v3221_v23 = vld [vmem:[#allocation5 + $0xf0] sm:$0xff] }
  0xa8   :  { %v3029_v28 = vadd.f32 %v174_v27, %v78_v16 }
  0xae   :  { %v218_v30 = vpop.f32.mrf.mxu2  ;;  %v250_v33 = vpop.f32.mrf.mxu3 }
  0xaf   :  { %v3032_v34 = vadd.f32 %v218_v30, %v3015_v15  ;;  %v177_v36 = vpop.f32.mrf.mxu1  ;;  %v251_v30 = vadd.f32 %v250_v33, %v80_v39 }
  0xb0   :  { %v3034_v37 = vadd.f32 %v177_v36, %v78_v16 }
  0xb1   :  { %3880 = vst [vmem:[#allocation21_spill] sm:$0xff] %v3032_v34 }
  0xb2   :  { %3881 = vst [vmem:[#allocation22_spill] sm:$0xff] %v3034_v37 }
  0xb6   :  { %v221_v40 = vpop.f32.mrf.mxu2  ;;  %v253_v41 = vpop.f32.mrf.mxu3 }
  0xb7   :  { %v3037_v42 = vadd.f32 %v221_v40, %v3015_v15  ;;  %v3039_v43 = vadd.f32 %v253_v41, %v80_v39  ;;  %v180_v44 = vpop.f32.mrf.mxu1 }
  0xb8   :  { %v3041_v45 = vadd.f32 %v180_v44, %v78_v16 }
  0xb9   :  { %3882 = vst [vmem:[#allocation23_spill] sm:$0xff] %v3037_v42 }
  0xba   :  { %3883 = vst [vmem:[#allocation24_spill] sm:$0xff] %v3041_v45  ;;  %v3246_v45 = vld [vmem:[#allocation5 + $0xb8] sm:$0xff] }
  0xbe   :  { %v224_v46 = vpop.f32.mrf.mxu2  ;;  %v256_v47 = vpop.f32.mrf.mxu3 }
  0xbf   :  { %v3044_v48 = vadd.f32 %v224_v46, %v3015_v15  ;;  %v3046_v49 = vadd.f32 %v256_v47, %v80_v39  ;;  %v183_v50 = vpop.f32.mrf.mxu1 }
  0xc0   :  { %v3048_v51 = vadd.f32 %v183_v50, %v78_v16 }
  0xc1   :  { %3884 = vst [vmem:[#allocation25_spill] sm:$0xff] %v3044_v48  ;;  %v3231_v48 = vld [vmem:[#allocation5 + $0xc8] sm:$0xff] }
  0xc2   :  { %3885 = vst [vmem:[#allocation26_spill] sm:$0xff] %v3048_v51  ;;  %v3235_v51 = vld [vmem:[#allocation5 + $0xd8] sm:$0xff] }
  0xc6   :  { %v227_v52 = vpop.f32.mrf.mxu2  ;;  %v259_v53 = vpop.f32.mrf.mxu3 }
  0xc7   :  { %v3051_v54 = vadd.f32 %v227_v52, %v3015_v15  ;;  %v3053_v55 = vadd.f32 %v259_v53, %v80_v39  ;;  %v186_v56 = vpop.f32.mrf.mxu1  ;;  %v210_v53 = vadd.f32 %v3010_v12, %v3015_v15 }
  0xc8   :  { %v3055_v57 = vadd.f32 %v186_v56, %v78_v16 }
  0xc9   :  { %3886 = vst [vmem:[#allocation27_spill] sm:$0xff] %v3051_v54  ;;  %v3223_v54 = vld [vmem:[#allocation5 + $0xf8] sm:$0xff] }
  0xca   :  { %3887 = vst [vmem:[#allocation28_spill] sm:$0xff] %v3053_v55  ;;  %v3268_v55 = vld [vmem:[#allocation5 + $0x48] sm:$0xff] }
  0xcb   :  { %3888 = vst [vmem:[#allocation29_spill] sm:$0xff] %v3055_v57 }
  0xcc   :  { %3916 = vst [vmem:[#allocation55_spill] sm:$0xff] %v3268_v55 }
  0xce   :  { %v230_v58 = vpop.f32.mrf.mxu2  ;;  %v262_v59 = vpop.f32.mrf.mxu3 }
  0xcf   :  { %v3058_v60 = vadd.f32 %v230_v58, %v3015_v15  ;;  %v3060_v61 = vadd.f32 %v262_v59, %v80_v39  ;;  %v189_v62 = vpop.f32.mrf.mxu1 }
  0xd0   :  { %v3062_v63 = vadd.f32 %v189_v62, %v78_v16 }
  0xd1   :  { %3889 = vst [vmem:[#allocation30_spill] sm:$0xff] %v3058_v60  ;;  %v3211_v60 = vld [vmem:[#allocation5 + $0x110] sm:$0xff] }
  0xd2   :  { %3890 = vst [vmem:[#allocation31_spill] sm:$0xff] %v3060_v61  ;;  %v3244_v61 = vld [vmem:[#allocation5 + $0xb0] sm:$0xff] }
  0xd3   :  { %3891 = vst [vmem:[#allocation32_spill] sm:$0xff] %v3062_v63  ;;  %v3219_v63 = vld [vmem:[#allocation5 + $0xe8] sm:$0xff] }
  0xd6   :  { %v265_v6 = vpop.f32.mrf.mxu3  ;;  %v397_v7 = vpop.f32.mrf.mxu2 }
  0xd7   :  { %v3067_v8 = vadd.f32 %v265_v6, %v80_v39  ;;  %v460_v10 = vadd.f32 %v397_v7, %v128_v2  ;;  %v417_v11 = vpop.f32.mrf.mxu1 }
  0xd8   :  { %v461_v18 = vadd.f32 %v417_v11, %v169_v3 }
  0xd9   :  { %3893 = vst [vmem:[#allocation34_spill] sm:$0xff] %v3067_v8  ;;  %v2253_v26 = vmul.f32 -1.442695, %v460_v10  ;;  %v3233_v8 = vld [vmem:[#allocation5 + $0xd0] sm:$0xff] }
  0xda   :  { %v2254_v29 = vmul.f32 -1.442695, %v461_v18 }
  0xdb   :  { %2291 = vpow2.f32 %v2253_v26 }
  0xdc   :  { %2293 = vpow2.f32 %v2254_v29 }
  0xde   :  { %v268_v31 = vpop.f32.mrf.mxu3  ;;  %v437_v50 = vpop.f32.mrf.mxu2 }
  0xdf   :  { %v3069_v32 = vadd.f32 %v268_v31, %v80_v39  ;;  %v462_v59 = vadd.f32 %v437_v50, %v210_v53  ;;  %v3088_v50 = vld [vmem:[#allocation5 + $0x140] sm:$0xff] }
  0xe0   :  { %832 = vmatpush.msra.mxu0 %v3088_v50  ;;  %v3094_v53 = vld [vmem:[#allocation5 + $0x100] sm:$0xff] }
  0xe1   :  { %3894 = vst [vmem:[#allocation35_spill] sm:$0xff] %v3069_v32  ;;  %v2292_v35 = vpop.eup %2291 }
  0xe2   :  { %v2294_v4 = vpop.eup %2293  ;;  %v467_v38 = vadd.f32 1.0, %v2292_v35 }
  0xe3   :  { %v486_v14 = vadd.f32 1.0, %v2294_v4 }
  0xe4   :  { %2295 = vrcp.f32 %v467_v38  ;;  %vm473_vm1 = vweird.f32 %v467_v38  ;;  %v479_v62 = vand.u32 2147483648, %v467_v38  ;;  %v477_v0 = vand.u32 2147483647, %v467_v38 }
  0xe5   :  { %2297 = vrcp.f32 %v486_v14  ;;  %v498_v58 = vand.u32 2147483648, %v486_v14  ;;  %vm492_vm4 = vweird.f32 %v486_v14  ;;  %v496_v2 = vand.u32 2147483647, %v486_v14 }
  0xe6   :  { %v271_v13 = vpop.f32.mrf.mxu3  ;;  %v480_v15 = vor.u32 1.1754944e-38, %v479_v62  ;;  %vm478_vm7 = vcmp.eq.f32.partialorder %v477_v0, 8.507059e+37 }
  0xe7   :  { %v3071_v16 = vadd.f32 %v271_v13, %v80_v39  ;;  %v499_v12 = vor.u32 1.1754944e-38, %v498_v58  ;;  %vm497_vm8 = vcmp.eq.f32.partialorder %v496_v2, 8.507059e+37  ;;  %v3105_v2 = vld [vmem:[#allocation5 + $0xa0] sm:$0xff] }
  0xe9   :  { %3895 = vst [vmem:[#allocation36_spill] sm:$0xff] %v3071_v16  ;;  %v3213_v16 = vld [vmem:[#allocation5 + $0x118] sm:$0xff] }
  0xea   :  { %v2296_v19 = vpop.eup %2295 }
  0xeb   :  { %v2298_v21 = vpop.eup %2297  ;;  %v469_v24 = vmul.f32 %v2296_v19, %v467_v38  ;;  %vm474_vm2 = vweird.f32 %v2296_v19 }
  0xec   :  { %v488_v27 = vmul.f32 %v2298_v21, %v486_v14  ;;  %vm493_vm3 = vweird.f32 %v2298_v21  ;;  %vm3075_vm5 = vmor %vm473_vm1, %vm474_vm2 }
  0xed   :  { %v470_v36 = vsub.f32 1.0, %v469_v24  ;;  %vm494_vm6 = vmor %vm492_vm4, %vm493_vm3 }
  0xee   :  { %v489_v40 = vsub.f32 1.0, %v488_v27  ;;  %v457_v41 = vpop.f32.mrf.mxu3 }
  0xef   :  { %v463_v44 = vadd.f32 %v457_v41, %v251_v30  ;;  %v471_v52 = vmul.f32 %v2296_v19, %v470_v36 }
  0xf0   :  { %v490_v46 = vmul.f32 %v2298_v21, %v489_v40 }
  0xf1   :  { %v2255_v47 = vmul.f32 -1.442695, %v463_v44  ;;  %v472_v33 = vadd.f32 %v2296_v19, %v471_v52  ;;  %v130_v44 = vpop.f32.mrf.mxu0  ;;  %v3091_v52 = vld [vmem:[#allocation5 + $0x120] sm:$0xff] }
  0xf2   :  { %v491_v56 = vadd.f32 %v2298_v21, %v490_v46  ;;  %833 = vmatpush.msra.mxu0 %v3091_v52  ;;  %v131_v58 = vadd.f32 %v130_v44, %v3064_v1 }
  0xf3   :  { %2299 = vpow2.f32 %v2255_v47  ;;  %v476_v7 = vsel %vm3075_vm5, %v2296_v19, %v472_v33  ;;  %v3101_v33 = vld [vmem:[#allocation5 + $0xc0] sm:$0xff] }
  0xf4   :  { %v495_v3 = vsel %vm494_vm6, %v2298_v21, %v491_v56  ;;  %2301 = vtanh.f32 %v462_v59  ;;  %v481_v18 = vsel %vm478_vm7, %v480_v15, %v476_v7  ;;  %834 = vmatpush.msra.mxu0 %v3094_v53  ;;  %v3097_v56 = vld [vmem:[#allocation5 + $0xe0] sm:$0xff] }
  0xf5   :  { %v500_v11 = vsel %vm497_vm8, %v499_v12, %v495_v3  ;;  %v3108_v12 = vld [vmem:[#allocation5 + $0x80] sm:$0xff] }
  0xf6   :  { %v523_v26 = vmul.f32 0.0, %v500_v11  ;;  %835 = vmatpush.msra.mxu0 %v3097_v56  ;;  %v3110_v15 = vld [vmem:[#allocation5 + $0x60] sm:$0xff] }
  0xf7   :  { %3899 = vst [vmem:[#allocation38_spill] sm:$0xff] %v3110_v15  ;;  %v3113_v7 = vld [vmem:[#allocation5 + $0x40] sm:$0xff] }
  0xf8   :  { %836 = vmatpush.msra.mxu0 %v3101_v33  ;;  %3900 = vst [vmem:[#allocation39_spill] sm:$0xff] %v3113_v7  ;;  %v3117_v11 = vld [vmem:[#allocation5 + $0x20] sm:$0xff] }
  0xf9   :  { %v2300_v6 = vpop.eup %2299  ;;  %v3084_v46 = vpop.f32.mrf.mxu0 }
  0xfa   :  { %v506_v10 = vadd.f32 1.0, %v2300_v6  ;;  %v2302_v29 = vpop.eup %2301  ;;  %837 = vmatpush.msra.mxu0 %v3105_v2  ;;  %v134_v32 = vadd.f32 %v3084_v46, %v3064_v1  ;;  %v3242_v46 = vld [vmem:[#allocation5 + $0xa8] sm:$0xff] }
  0xfb   :  { %v524_v31 = vmul.f32 %v2302_v29, %v481_v18 }
  0xfc   :  { %2303 = vrcp.f32 %v506_v10  ;;  %v518_v13 = vand.u32 2147483648, %v506_v10  ;;  %v516_v19 = vand.u32 2147483647, %v506_v10  ;;  %vm512_vm10 = vweird.f32 %v506_v10  ;;  %838 = vmatpush.msra.mxu0 %v3108_v12 }
  0xfd   :  { %v3081_v4 = vadd.f32 %v524_v31, %v523_v26  ;;  %v3120_v26 = vld [vmem:[#allocation5] sm:$0xff] }
  0xfe   :  { %v519_v27 = vor.u32 1.1754944e-38, %v518_v13  ;;  %vm517_vm12 = vcmp.eq.f32.partialorder %v516_v19, 8.507059e+37  ;;  %839 = vmatpush.msra.mxu0 %v3110_v15 }
  0xff   :  { %2305 = vtanh.f32 %v3081_v4 }
 0x100   :  { %840 = vmatpush.msra.mxu0 %v3113_v7 }
 0x101   :  { %v3086_v47 = vpop.f32.mrf.mxu0 }
 0x102   :  { %v2304_v35 = vpop.eup %2303  ;;  %3898 = vst [vmem:[#allocation37_spill] sm:$0xff] %v3086_v47  ;;  %841 = vmatpush.msra.mxu0 %v3117_v11  ;;  %v3274_v47 = vld [vmem:[#allocation5 + $0x58] sm:$0xff] }
 0x103   :  { %v508_v38 = vmul.f32 %v2304_v35, %v506_v10  ;;  %vm513_vm9 = vweird.f32 %v2304_v35 }
 0x104   :  { %vm514_vm11 = vmor %vm512_vm10, %vm513_vm9  ;;  %842 = vmatpush.msra.mxu0 %v3120_v26 }
 0x105   :  { %v509_v14 = vsub.f32 1.0, %v508_v38  ;;  %v2306_v36 = vpop.eup %2305 }
 0x107   :  { %v510_v21 = vmul.f32 %v2304_v35, %v509_v14 }
 0x109   :  { %v511_v24 = vadd.f32 %v2304_v35, %v510_v21 }
 0x10b   :  { %v515_v30 = vsel %vm514_vm11, %v2304_v35, %v511_v24 }
 0x10c   :  { %v520_v40 = vsel %vm517_vm12, %v519_v27, %v515_v30 }
 0x10d   :  { %v527_v41 = vmul.f32 %v2306_v36, %v520_v40 }
 0x10f   :  { %530 = vst [vmem:[#allocation10] sm:$0xff] %v527_v41  ;;  %619 = vmatmul.f32.vlgmr.msrb.gmra.mxu0 %v527_v41  ;;  %639 = vmatmul.f32.vlgmr.msrb.gmra.mxu1 %v527_v41 }
 0x110   :  { %659 = vmatmul.f32.vlgmr.msrb.gmra.mxu2 %v527_v41  ;;  %679 = vmatmul.f32.vlgmr.msrb.gmra.mxu3 %v527_v41 }
 0x18c   :  { %v620_v59 = vpop.f32.mrf.mxu0  ;;  %v640_v62 = vpop.f32.mrf.mxu1 }
 0x18d   :  { %v683_v39 = vadd.f32 %v620_v59, %v131_v58  ;;  %v684_v0 = vadd.f32 %v640_v62, %v3022_v22 }
 0x18f   :  { %v2256_v3 = vmul.f32 -1.442695, %v683_v39  ;;  %v2257_v6 = vmul.f32 -1.442695, %v684_v0 }
 0x191   :  { %2307 = vpow2.f32 %v2256_v3 }
 0x192   :  { %2309 = vpow2.f32 %v2257_v6 }
 0x193   :  { %v680_v10 = vpop.f32.mrf.mxu3  ;;  %v660_v14 = vpop.f32.mrf.mxu2 }
 0x194   :  { %v686_v22 = vadd.f32 %v680_v10, %v3039_v43  ;;  %v685_v19 = vadd.f32 %v660_v14, %v3020_v20 }
 0x196   :  { %v2258_v18 = vmul.f32 -1.442695, %v686_v22 }
 0x197   :  { %v2308_v29 = vpop.eup %2307 }
 0x198   :  { %v2310_v31 = vpop.eup %2309  ;;  %v690_v35 = vadd.f32 1.0, %v2308_v29  ;;  %2311 = vpow2.f32 %v2258_v18 }
 0x199   :  { %v709_v38 = vadd.f32 1.0, %v2310_v31 }
 0x19a   :  { %2313 = vrcp.f32 %v690_v35  ;;  %v702_v41 = vand.u32 2147483648, %v690_v35  ;;  %v700_v59 = vand.u32 2147483647, %v690_v35  ;;  %vm696_vm15 = vweird.f32 %v690_v35 }
 0x19b   :  { %2315 = vrcp.f32 %v709_v38  ;;  %v721_v44 = vand.u32 2147483648, %v709_v38  ;;  %v719_v39 = vand.u32 2147483647, %v709_v38  ;;  %vm715_vm0 = vweird.f32 %v709_v38 }
 0x19c   :  { %v703_v20 = vor.u32 1.1754944e-38, %v702_v41  ;;  %vm701_vm3 = vcmp.eq.f32.partialorder %v700_v59, 8.507059e+37 }
 0x19d   :  { %v722_v22 = vor.u32 1.1754944e-38, %v721_v44  ;;  %vm720_vm4 = vcmp.eq.f32.partialorder %v719_v39, 8.507059e+37  ;;  %v3133_v39 = vld [vmem:[#allocation5 + $0x1f0] sm:$0xff] }
 0x19e   :  { %v2312_v43 = vpop.eup %2311  ;;  %3902 = vst [vmem:[#allocation41_spill] sm:$0xff] %v3133_v39  ;;  %1091 = vmatpush.msrb.mxu2 %v3133_v39 }
 0x19f   :  { %v729_v13 = vadd.f32 1.0, %v2312_v43 }
 0x1a0   :  { %v2314_v21 = vpop.eup %2313 }
 0x1a1   :  { %v2316_v24 = vpop.eup %2315  ;;  %v692_v27 = vmul.f32 %v2314_v21, %v690_v35  ;;  %2317 = vrcp.f32 %v729_v13  ;;  %vm697_vm13 = vweird.f32 %v2314_v21  ;;  %vm735_vm6 = vweird.f32 %v729_v13 }
 0x1a2   :  { %v711_v30 = vmul.f32 %v2316_v24, %v709_v38  ;;  %2319 = vtanh.f32 %v685_v19  ;;  %vm716_vm14 = vweird.f32 %v2316_v24  ;;  %vm698_vm1 = vmor %vm696_vm15, %vm697_vm13 }
 0x1a3   :  { %v693_v36 = vsub.f32 1.0, %v692_v27  ;;  %vm717_vm2 = vmor %vm715_vm0, %vm716_vm14 }
 0x1a4   :  { %v712_v40 = vsub.f32 1.0, %v711_v30 }
 0x1a5   :  { %v694_v58 = vmul.f32 %v2314_v21, %v693_v36 }
 0x1a6   :  { %v713_v62 = vmul.f32 %v2316_v24, %v712_v40  ;;  %v741_v40 = vand.u32 2147483648, %v729_v13 }
 0x1a7   :  { %v2318_v0 = vpop.eup %2317  ;;  %v695_v3 = vadd.f32 %v2314_v21, %v694_v58 }
 0x1a8   :  { %v714_v6 = vadd.f32 %v2316_v24, %v713_v62  ;;  %v731_v10 = vmul.f32 %v2318_v0, %v729_v13  ;;  %v2320_v29 = vpop.eup %2319  ;;  %vm736_vm5 = vweird.f32 %v2318_v0  ;;  %v742_v44 = vor.u32 1.1754944e-38, %v741_v40  ;;  %v3131_v62 = vld [vmem:[#allocation5 + $0x1e8] sm:$0xff] }
 0x1a9   :  { %v699_v18 = vsel %vm698_vm1, %v2314_v21, %v695_v3  ;;  %v739_v21 = vand.u32 2147483647, %v729_v13  ;;  %vm737_vm7 = vmor %vm735_vm6, %vm736_vm5  ;;  %3901 = vst [vmem:[#allocation40_spill] sm:$0xff] %v3131_v62  ;;  %1071 = vmatpush.msrb.mxu1 %v3131_v62  ;;  %v3137_v13 = vld [vmem:[#allocation5 + $0x1f8] sm:$0xff]  ;;  %v3143_v3 = vld [vmem:[#allocation5 + $0x1c8] sm:$0xff] }
 0x1aa   :  { %v704_v31 = vsel %vm701_vm3, %v703_v20, %v699_v18  ;;  %v718_v14 = vsel %vm717_vm2, %v2316_v24, %v714_v6  ;;  %v732_v43 = vsub.f32 1.0, %v731_v10  ;;  %1111 = vmatpush.msrb.mxu3 %v3137_v13  ;;  %3904 = vst [vmem:[#allocation43_spill] sm:$0xff] %v3143_v3  ;;  %v3145_v20 = vld [vmem:[#allocation5 + $0x1d0] sm:$0xff]  ;;  %v3149_v6 = vld [vmem:[#allocation5 + $0x1d8] sm:$0xff]  ;;  %v3153_v10 = vld [vmem:[#allocation5 + $0x1a0] sm:$0xff] }
 0x1ab   :  { %v723_v19 = vsel %vm720_vm4, %v722_v22, %v718_v14  ;;  %v747_v27 = vmul.f32 %v2320_v29, %v704_v31  ;;  %vm740_vm8 = vcmp.eq.f32.partialorder %v739_v21, 8.507059e+37  ;;  %1072 = vmatpush.msrb.mxu1 %v3143_v3  ;;  %1092 = vmatpush.msrb.mxu2 %v3145_v20  ;;  %v3155_v22 = vld [vmem:[#allocation5 + $0x1a8] sm:$0xff]  ;;  %v3157_v18 = vld [vmem:[#allocation5 + $0x1b0] sm:$0xff]  ;;  %v3161_v29 = vld [vmem:[#allocation5 + $0x1b8] sm:$0xff] }
 0x1ac   :  { %v746_v30 = vmul.f32 %v723_v19, %v3081_v4  ;;  %v733_v36 = vmul.f32 %v2318_v0, %v732_v43  ;;  %v3129_v4 = vld [vmem:[#allocation5 + $0x1e0] sm:$0xff]  ;;  %1112 = vmatpush.msrb.mxu3 %v3149_v6  ;;  %3905 = vst [vmem:[#allocation44_spill] sm:$0xff] %v3161_v29  ;;  %v3167_v14 = vld [vmem:[#allocation5 + $0x188] sm:$0xff]  ;;  %v3169_v43 = vld [vmem:[#allocation5 + $0x190] sm:$0xff] }
 0x1ad   :  { %1051 = vmatpush.msrb.mxu0 %v3129_v4  ;;  %1073 = vmatpush.msrb.mxu1 %v3155_v22  ;;  %v3165_v31 = vld [vmem:[#allocation5 + $0x180] sm:$0xff]  ;;  %3907 = vst [vmem:[#allocation46_spill] sm:$0xff] %v3167_v14  ;;  %v3173_v19 = vld [vmem:[#allocation5 + $0x198] sm:$0xff]  ;;  %v3189_v40 = vld [vmem:[#allocation5 + $0x148] sm:$0xff] }
 0x1ae   :  { %v3126_v35 = vadd.f32 %v747_v27, %v746_v30  ;;  %v734_v38 = vadd.f32 %v2318_v0, %v733_v36  ;;  %1093 = vmatpush.msrb.mxu2 %v3157_v18  ;;  %1113 = vmatpush.msrb.mxu3 %v3161_v29  ;;  %3906 = vst [vmem:[#allocation45_spill] sm:$0xff] %v3165_v31  ;;  %v3177_v27 = vld [vmem:[#allocation5 + $0x160] sm:$0xff]  ;;  %v3179_v30 = vld [vmem:[#allocation5 + $0x168] sm:$0xff]  ;;  %v3181_v36 = vld [vmem:[#allocation5 + $0x170] sm:$0xff] }
 0x1af   :  { %3908 = vst [vmem:[#allocation47_spill] sm:$0xff] %v3169_v43  ;;  %1074 = vmatpush.msrb.mxu1 %v3167_v14  ;;  %v3191_v21 = vld [vmem:[#allocation5 + $0x150] sm:$0xff] }
 0x1b0   :  { %2321 = vtanh.f32 %v3126_v35  ;;  %v738_v41 = vsel %vm737_vm7, %v2318_v0, %v734_v38  ;;  %v3141_v0 = vld [vmem:[#allocation5 + $0x1c0] sm:$0xff]  ;;  %1094 = vmatpush.msrb.mxu2 %v3169_v43  ;;  %1114 = vmatpush.msrb.mxu3 %v3173_v19  ;;  %v3185_v38 = vld [vmem:[#allocation5 + $0x178] sm:$0xff] }
 0x1b1   :  { %v743_v58 = vsel %vm740_vm8, %v742_v44, %v738_v41  ;;  %3903 = vst [vmem:[#allocation42_spill] sm:$0xff] %v3141_v0  ;;  %1052 = vmatpush.msrb.mxu0 %v3141_v0  ;;  %1075 = vmatpush.msrb.mxu1 %v3179_v30  ;;  %v3193_v41 = vld [vmem:[#allocation5 + $0x158] sm:$0xff]  ;;  %v3199_v44 = vld [vmem:[#allocation5 + $0x128] sm:$0xff] }
 0x1b2   :  { %3909 = vst [vmem:[#allocation48_spill] sm:$0xff] %v3185_v38  ;;  %1095 = vmatpush.msrb.mxu2 %v3181_v36  ;;  %1115 = vmatpush.msrb.mxu3 %v3185_v38 }
 0x1b3   :  { %1053 = vmatpush.msrb.mxu0 %v3153_v10  ;;  %1076 = vmatpush.msrb.mxu1 %v3189_v40 }
 0x1b4   :  { %1096 = vmatpush.msrb.mxu2 %v3191_v21  ;;  %1116 = vmatpush.msrb.mxu3 %v3193_v41 }
 0x1b5   :  { %1054 = vmatpush.msrb.mxu0 %v3165_v31  ;;  %1077 = vmatpush.msrb.mxu1 %v3199_v44 }
 0x1b6   :  { %v2322_v24 = vpop.eup %2321 }
 0x1b7   :  { %v750_v59 = vmul.f32 %v2322_v24, %v743_v58  ;;  %1055 = vmatpush.msrb.mxu0 %v3177_v27  ;;  %v3201_v24 = vld [vmem:[#allocation5 + $0x130] sm:$0xff]  ;;  %v3203_v58 = vld [vmem:[#allocation5 + $0x138] sm:$0xff] }
 0x1b8   :  { %3910 = vst [vmem:[#allocation49_spill] sm:$0xff] %v3201_v24  ;;  %1097 = vmatpush.msrb.mxu2 %v3201_v24  ;;  %1117 = vmatpush.msrb.mxu3 %v3203_v58 }
 0x1b9   :  { %754 = vst [vmem:[#allocation10 + $0x8] sm:$0xff] %v750_v59  ;;  %843 = vmatmul.f32.vlgmr.msra.gmra.mxu0 %v750_v59  ;;  %863 = vmatmul.f32.vlgmr.msra.gmra.mxu1 %v750_v59 }
 0x1ba   :  { %883 = vmatmul.f32.vlgmr.msra.gmra.mxu2 %v750_v59  ;;  %903 = vmatmul.f32.vlgmr.msra.gmra.mxu3 %v750_v59  ;;  %3911 = vst [vmem:[#allocation50_spill] sm:$0xff] %v3203_v58  ;;  %v3209_v59 = vld [vmem:[#allocation5 + $0x108] sm:$0xff] }
 0x1bb   :  { %1056 = vmatpush.msrb.mxu0 %v3088_v50  ;;  %1078 = vmatpush.msrb.mxu1 %v3209_v59 }
 0x1bc   :  { %1098 = vmatpush.msrb.mxu2 %v3211_v60  ;;  %1118 = vmatpush.msrb.mxu3 %v3213_v16 }
 0x1bd   :  { %1057 = vmatpush.msrb.mxu0 %v3091_v52  ;;  %1079 = vmatpush.msrb.mxu1 %v3219_v63 }
 0x1be   :  { %1099 = vmatpush.msrb.mxu2 %v3221_v23  ;;  %1119 = vmatpush.msrb.mxu3 %v3223_v54 }
 0x1bf   :  { %1058 = vmatpush.msrb.mxu0 %v3094_v53  ;;  %1080 = vmatpush.msrb.mxu1 %v3231_v48 }
 0x1c0   :  { %1100 = vmatpush.msrb.mxu2 %v3233_v8  ;;  %1120 = vmatpush.msrb.mxu3 %v3235_v51 }
 0x1c1   :  { %1059 = vmatpush.msrb.mxu0 %v3097_v56  ;;  %1081 = vmatpush.msrb.mxu1 %v3242_v46 }
 0x1c2   :  { %1101 = vmatpush.msrb.mxu2 %v3244_v61  ;;  %1121 = vmatpush.msrb.mxu3 %v3246_v45 }
 0x1c3   :  { %1060 = vmatpush.msrb.mxu0 %v3101_v33 }
 0x1c5   :  { %1061 = vmatpush.msrb.mxu0 %v3105_v2 }
 0x1c7   :  { %1062 = vmatpush.msrb.mxu0 %v3108_v12 }
 0x1c9   :  { %1063 = vmatpush.msrb.mxu0 %v3110_v15  ;;  %v3285_v15 = vld [vmem:[#allocation5 + $0x38] sm:$0xff] }
 0x1cb   :  { %1064 = vmatpush.msrb.mxu0 %v3113_v7  ;;  %v3295_v7 = vld [vmem:[#allocation5 + $0x18] sm:$0xff] }
 0x1cd   :  { %1065 = vmatpush.msrb.mxu0 %v3117_v11 }
 0x1cf   :  { %1066 = vmatpush.msrb.mxu0 %v3120_v26 }
 0x1d1   :  { %1275 = vmatpush.msra.mxu0 %v3129_v4 }
 0x1d3   :  { %1276 = vmatpush.msra.mxu0 %v3141_v0 }
 0x1d5   :  { %1277 = vmatpush.msra.mxu0 %v3153_v10 }
 0x1d7   :  { %1278 = vmatpush.msra.mxu0 %v3165_v31 }
 0x1d9   :  { %1279 = vmatpush.msra.mxu0 %v3177_v27 }
 0x1db   :  { %1280 = vmatpush.msra.mxu0 %v3088_v50 }
 0x1dd   :  { %1281 = vmatpush.msra.mxu0 %v3091_v52 }
 0x1df   :  { %1282 = vmatpush.msra.mxu0 %v3094_v53 }
 0x1e1   :  { %1283 = vmatpush.msra.mxu0 %v3097_v56 }
 0x1e3   :  { %1284 = vmatpush.msra.mxu0 %v3101_v33 }
 0x1e5   :  { %1285 = vmatpush.msra.mxu0 %v3105_v2 }
 0x1e7   :  { %1286 = vmatpush.msra.mxu0 %v3108_v12  ;;  %v3922_v12 = vld [vmem:[#allocation39_spill] sm:$0xff] }
 0x236   :  { %v844_v57 = vpop.f32.mrf.mxu0  ;;  %v864_v17 = vpop.f32.mrf.mxu1 }
 0x237   :  { %v907_v9 = vadd.f32 %v844_v57, %v134_v32  ;;  %v908_v42 = vadd.f32 %v864_v17, %v3029_v28  ;;  %v3252_v17 = vld [vmem:[#allocation5 + $0x88] sm:$0xff]  ;;  %v3254_v28 = vld [vmem:[#allocation5 + $0x90] sm:$0xff]  ;;  %v3256_v57 = vld [vmem:[#allocation5 + $0x98] sm:$0xff] }
 0x238   :  { %3912 = vst [vmem:[#allocation51_spill] sm:$0xff] %v3256_v57  ;;  %1082 = vmatpush.msrb.mxu1 %v3252_v17  ;;  %v3264_v32 = vld [vmem:[#allocation5 + $0x78] sm:$0xff]  ;;  %1102 = vmatpush.msrb.mxu2 %v3254_v28 }
 0x239   :  { %v2259_v5 = vmul.f32 -1.442695, %v907_v9  ;;  %v2260_v34 = vmul.f32 -1.442695, %v908_v42  ;;  %v3260_v9 = vld [vmem:[#allocation5 + $0x68] sm:$0xff]  ;;  %v3262_v42 = vld [vmem:[#allocation5 + $0x70] sm:$0xff]  ;;  %1122 = vmatpush.msrb.mxu3 %v3256_v57 }
 0x23a   :  { %3913 = vst [vmem:[#allocation52_spill] sm:$0xff] %v3260_v9  ;;  %1083 = vmatpush.msrb.mxu1 %v3260_v9  ;;  %1103 = vmatpush.msrb.mxu2 %v3262_v42  ;;  %v3283_v57 = vld [vmem:[#allocation5 + $0x30] sm:$0xff] }
 0x23b   :  { %2323 = vpow2.f32 %v2259_v5  ;;  %3914 = vst [vmem:[#allocation53_spill] sm:$0xff] %v3262_v42  ;;  %v3272_v5 = vld [vmem:[#allocation5 + $0x50] sm:$0xff]  ;;  %1123 = vmatpush.msrb.mxu3 %v3264_v32 }
 0x23c   :  { %3915 = vst [vmem:[#allocation54_spill] sm:$0xff] %v3264_v32  ;;  %2325 = vpow2.f32 %v2260_v34  ;;  %v3279_v34 = vld [vmem:[#allocation5 + $0x28] sm:$0xff]  ;;  %1084 = vmatpush.msrb.mxu1 %v3268_v55  ;;  %1104 = vmatpush.msrb.mxu2 %v3272_v5  ;;  %v3293_v32 = vld [vmem:[#allocation5 + $0x10] sm:$0xff] }
 0x23d   :  { %v904_v37 = vpop.f32.mrf.mxu3  ;;  %1124 = vmatpush.msrb.mxu3 %v3274_v47 }
 0x23e   :  { %v910_v1 = vadd.f32 %v904_v37, %v3046_v49  ;;  %v3289_v37 = vld [vmem:[#allocation5 + $0x8] sm:$0xff]  ;;  %1085 = vmatpush.msrb.mxu1 %v3279_v34  ;;  %1105 = vmatpush.msrb.mxu2 %v3283_v57 }
 0x23f   :  { %1125 = vmatpush.msrb.mxu3 %v3285_v15  ;;  %v3917_v2 = vld [vmem:[#allocation51_spill] sm:$0xff] }
 0x240   :  { %v2261_v9 = vmul.f32 -1.442695, %v910_v1  ;;  %1086 = vmatpush.msrb.mxu1 %v3289_v37  ;;  %1106 = vmatpush.msrb.mxu2 %v3293_v32 }
 0x241   :  { %v2324_v49 = vpop.eup %2323  ;;  %1126 = vmatpush.msrb.mxu3 %v3295_v7 }
 0x242   :  { %v2326_v55 = vpop.eup %2325  ;;  %v3297_v42 = vadd.f32 1.0, %v2324_v49  ;;  %2327 = vpow2.f32 %v2261_v9  ;;  %1295 = vmatpush.msra.mxu1 %v3131_v62  ;;  %1315 = vmatpush.msra.mxu2 %v3133_v39 }
 0x243   :  { %v3301_v1 = vadd.f32 1.0, %v2326_v55  ;;  %1335 = vmatpush.msra.mxu3 %v3137_v13  ;;  %v884_v55 = vpop.f32.mrf.mxu2 }
 0x244   :  { %2329 = vrcp.f32 %v3297_v42  ;;  %1296 = vmatpush.msra.mxu1 %v3143_v3  ;;  %1316 = vmatpush.msra.mxu2 %v3145_v20  ;;  %v909_v39 = vadd.f32 %v884_v55, %v3027_v25  ;;  %vm920_vm11 = vweird.f32 %v3297_v42 }
 0x245   :  { %2331 = vrcp.f32 %v3301_v1  ;;  %1336 = vmatpush.msra.mxu3 %v3149_v6  ;;  %vm939_vm12 = vweird.f32 %v3301_v1 }
 0x246   :  { %1297 = vmatpush.msra.mxu1 %v3155_v22  ;;  %1317 = vmatpush.msra.mxu2 %v3157_v18 }
 0x247   :  { %1337 = vmatpush.msra.mxu3 %v3161_v29  ;;  %v926_v29 = vand.u32 2147483648, %v3297_v42 }
 0x248   :  { %v2328_v9 = vpop.eup %2327  ;;  %1298 = vmatpush.msra.mxu1 %v3167_v14  ;;  %1318 = vmatpush.msra.mxu2 %v3169_v43  ;;  %v945_v14 = vand.u32 2147483648, %v3301_v1  ;;  %v924_v43 = vand.u32 2147483647, %v3297_v42 }
 0x249   :  { %v3317_v49 = vadd.f32 1.0, %v2328_v9  ;;  %1338 = vmatpush.msra.mxu3 %v3173_v19  ;;  %v927_v50 = vor.u32 1.1754944e-38, %v926_v29 }
 0x24a   :  { %v2330_v62 = vpop.eup %2329  ;;  %1299 = vmatpush.msra.mxu1 %v3179_v30  ;;  %1319 = vmatpush.msra.mxu2 %v3181_v36  ;;  %vm925_vm15 = vcmp.eq.f32.partialorder %v924_v43, 8.507059e+37  ;;  %v3918_v43 = vld [vmem:[#allocation38_spill] sm:$0xff] }
 0x24b   :  { %v2332_v0 = vpop.eup %2331  ;;  %v916_v3 = vmul.f32 %v2330_v62, %v3297_v42  ;;  %2333 = vrcp.f32 %v3317_v49  ;;  %1339 = vmatpush.msra.mxu3 %v3185_v38  ;;  %vm921_vm9 = vweird.f32 %v2330_v62  ;;  %v965_v33 = vand.u32 2147483648, %v3317_v49  ;;  %1287 = vmatpush.msra.mxu0 %v3918_v43 }
 0x24c   :  { %v935_v9 = vmul.f32 %v2332_v0, %v3301_v1  ;;  %2335 = vtanh.f32 %v909_v39  ;;  %1300 = vmatpush.msra.mxu1 %v3189_v40  ;;  %vm940_vm10 = vweird.f32 %v2332_v0  ;;  %1320 = vmatpush.msra.mxu2 %v3191_v21  ;;  %vm922_vm13 = vmor %vm920_vm11, %vm921_vm9  ;;  %vm959_vm2 = vweird.f32 %v3317_v49 }
 0x24d   :  { %v917_v25 = vsub.f32 1.0, %v916_v3  ;;  %1340 = vmatpush.msra.mxu3 %v3193_v41  ;;  %vm941_vm14 = vmor %vm939_vm12, %vm940_vm10  ;;  %1288 = vmatpush.msra.mxu0 %v3922_v12 }
 0x24e   :  { %v936_v55 = vsub.f32 1.0, %v935_v9  ;;  %v943_v9 = vand.u32 2147483647, %v3301_v1  ;;  %1301 = vmatpush.msra.mxu1 %v3199_v44  ;;  %1321 = vmatpush.msra.mxu2 %v3201_v24 }
 0x24f   :  { %v918_v31 = vmul.f32 %v2330_v62, %v917_v25  ;;  %1341 = vmatpush.msra.mxu3 %v3203_v58  ;;  %1289 = vmatpush.msra.mxu0 %v3117_v11  ;;  %v3924_v11 = vld [vmem:[#allocation40_spill] sm:$0xff] }
 0x250   :  { %v937_v3 = vmul.f32 %v2332_v0, %v936_v55  ;;  %1302 = vmatpush.msra.mxu1 %v3209_v59  ;;  %vm944_vm0 = vcmp.eq.f32.partialorder %v943_v9, 8.507059e+37  ;;  %1322 = vmatpush.msra.mxu2 %v3211_v60  ;;  %v3921_v9 = vld [vmem:[#allocation54_spill] sm:$0xff] }
 0x251   :  { %v3343_v39 = vpop.eup %2333  ;;  %v919_v38 = vadd.f32 %v2330_v62, %v918_v31  ;;  %v946_v31 = vor.u32 1.1754944e-38, %v945_v14  ;;  %1342 = vmatpush.msra.mxu3 %v3213_v16  ;;  %1290 = vmatpush.msra.mxu0 %v3120_v26  ;;  %v3928_v26 = vld [vmem:[#allocation44_spill] sm:$0xff] }
 0x252   :  { %v938_v25 = vadd.f32 %v2332_v0, %v937_v3  ;;  %v955_v55 = vmul.f32 %v3343_v39, %v3317_v49  ;;  %v2336_v52 = vpop.eup %2335  ;;  %1303 = vmatpush.msra.mxu1 %v3219_v63  ;;  %1323 = vmatpush.msra.mxu2 %v3221_v23  ;;  %vm960_vm1 = vweird.f32 %v3343_v39 }
 0x253   :  { %v923_v42 = vsel %vm922_vm13, %v2330_v62, %v919_v38  ;;  %1343 = vmatpush.msra.mxu3 %v3223_v54  ;;  %vm961_vm3 = vmor %vm959_vm2, %vm960_vm1  ;;  %v3919_v38 = vld [vmem:[#allocation52_spill] sm:$0xff] }
 0x254   :  { %v928_v1 = vsel %vm925_vm15, %v927_v50, %v923_v42  ;;  %v942_v29 = vsel %vm941_vm14, %v2332_v0, %v938_v25  ;;  %v956_v3 = vsub.f32 1.0, %v955_v55  ;;  %1304 = vmatpush.msra.mxu1 %v3231_v48  ;;  %1324 = vmatpush.msra.mxu2 %v3233_v8  ;;  %v3925_v55 = vld [vmem:[#allocation41_spill] sm:$0xff]  ;;  %v3927_v42 = vld [vmem:[#allocation43_spill] sm:$0xff] }
 0x255   :  { %v947_v24 = vsel %vm944_vm0, %v946_v31, %v942_v29  ;;  %v971_v58 = vmul.f32 %v2336_v52, %v928_v1  ;;  %1344 = vmatpush.msra.mxu3 %v3235_v51  ;;  %v3926_v31 = vld [vmem:[#allocation42_spill] sm:$0xff] }
 0x256   :  { %v970_v62 = vmul.f32 %v947_v24, %v3126_v35  ;;  %v957_v53 = vmul.f32 %v3343_v39, %v956_v3  ;;  %1305 = vmatpush.msra.mxu1 %v3242_v46  ;;  %1325 = vmatpush.msra.mxu2 %v3244_v61  ;;  %v963_v35 = vand.u32 2147483647, %v3317_v49  ;;  %v966_v24 = vor.u32 1.1754944e-38, %v965_v33  ;;  %v3923_v49 = vld [vmem:[#allocation55_spill] sm:$0xff]  ;;  %v3930_v52 = vld [vmem:[#allocation46_spill] sm:$0xff] }
 0x257   :  { %1345 = vmatpush.msra.mxu3 %v3246_v45 }
 0x258   :  { %v3367_v0 = vadd.f32 %v971_v58, %v970_v62  ;;  %v958_v56 = vadd.f32 %v3343_v39, %v957_v53  ;;  %1306 = vmatpush.msra.mxu1 %v3252_v17  ;;  %1326 = vmatpush.msra.mxu2 %v3254_v28  ;;  %v3920_v58 = vld [vmem:[#allocation53_spill] sm:$0xff]  ;;  %vm964_vm4 = vcmp.eq.f32.partialorder %v963_v35, 8.507059e+37 }
 0x259   :  { %1346 = vmatpush.msra.mxu3 %v3917_v2 }
 0x25a   :  { %2337 = vtanh.f32 %v3367_v0  ;;  %v962_v14 = vsel %vm961_vm3, %v3343_v39, %v958_v56  ;;  %1307 = vmatpush.msra.mxu1 %v3919_v38  ;;  %1327 = vmatpush.msra.mxu2 %v3920_v58 }
 0x25b   :  { %1347 = vmatpush.msra.mxu3 %v3921_v9  ;;  %v967_v25 = vsel %vm964_vm4, %v966_v24, %v962_v14 }
 0x25c   :  { %1308 = vmatpush.msra.mxu1 %v3923_v49  ;;  %1328 = vmatpush.msra.mxu2 %v3272_v5 }
 0x25d   :  { %1348 = vmatpush.msra.mxu3 %v3274_v47 }
 0x25e   :  { %1309 = vmatpush.msra.mxu1 %v3279_v34  ;;  %1329 = vmatpush.msra.mxu2 %v3283_v57 }
 0x25f   :  { %1349 = vmatpush.msra.mxu3 %v3285_v15 }
 0x260   :  { %v2338_v50 = vpop.eup %2337  ;;  %1310 = vmatpush.msra.mxu1 %v3289_v37  ;;  %1330 = vmatpush.msra.mxu2 %v3293_v32 }
 0x261   :  { %v974_v39 = vmul.f32 %v2338_v50, %v967_v25  ;;  %1350 = vmatpush.msra.mxu3 %v3295_v7 }
 0x263   :  { %978 = vst [vmem:[#allocation10 + $0x10] sm:$0xff] %v974_v39  ;;  %1067 = vmatmul.f32.vlgmr.msrb.gmra.mxu0 %v974_v39  ;;  %1087 = vmatmul.f32.vlgmr.msrb.gmra.mxu1 %v974_v39 }
 0x264   :  { %1107 = vmatmul.f32.vlgmr.msrb.gmra.mxu2 %v974_v39  ;;  %1127 = vmatmul.f32.vlgmr.msrb.gmra.mxu3 %v974_v39 }
 0x265   :  { %1499 = vmatpush.msrb.mxu0 %v3129_v4  ;;  %1519 = vmatpush.msrb.mxu1 %v3924_v11  ;;  %v3929_v4 = vld [vmem:[#allocation45_spill] sm:$0xff] }
 0x266   :  { %1539 = vmatpush.msrb.mxu2 %v3925_v55  ;;  %1559 = vmatpush.msrb.mxu3 %v3137_v13  ;;  %v3931_v13 = vld [vmem:[#allocation47_spill] sm:$0xff] }
 0x267   :  { %1500 = vmatpush.msrb.mxu0 %v3926_v31  ;;  %1520 = vmatpush.msrb.mxu1 %v3927_v42 }
 0x268   :  { %1540 = vmatpush.msrb.mxu2 %v3145_v20  ;;  %1560 = vmatpush.msrb.mxu3 %v3149_v6  ;;  %v3932_v20 = vld [vmem:[#allocation48_spill] sm:$0xff]  ;;  %v3933_v6 = vld [vmem:[#allocation49_spill] sm:$0xff] }
 0x269   :  { %1501 = vmatpush.msrb.mxu0 %v3153_v10  ;;  %1521 = vmatpush.msrb.mxu1 %v3155_v22  ;;  %v3934_v10 = vld [vmem:[#allocation50_spill] sm:$0xff] }
 0x26a   :  { %1541 = vmatpush.msrb.mxu2 %v3157_v18  ;;  %1561 = vmatpush.msrb.mxu3 %v3928_v26 }
 0x26b   :  { %1502 = vmatpush.msrb.mxu0 %v3929_v4  ;;  %1522 = vmatpush.msrb.mxu1 %v3930_v52 }
 0x26c   :  { %1542 = vmatpush.msrb.mxu2 %v3931_v13  ;;  %1562 = vmatpush.msrb.mxu3 %v3173_v19  ;;  %v3467_v13 = vld [vmem:[#allocation5 + $0x120] sm:$0xff] }
 0x26d   :  { %1503 = vmatpush.msrb.mxu0 %v3177_v27  ;;  %1523 = vmatpush.msrb.mxu1 %v3179_v30 }
 0x26e   :  { %1543 = vmatpush.msrb.mxu2 %v3181_v36  ;;  %1563 = vmatpush.msrb.mxu3 %v3932_v20  ;;  %v3470_v20 = vld [vmem:[#allocation5 + $0x100] sm:$0xff] }
 0x26f   :  { %1524 = vmatpush.msrb.mxu1 %v3189_v40 }
 0x270   :  { %1544 = vmatpush.msrb.mxu2 %v3191_v21  ;;  %1564 = vmatpush.msrb.mxu3 %v3193_v41 }
 0x271   :  { %1525 = vmatpush.msrb.mxu1 %v3199_v44  ;;  %v3939_v44 = vld [vmem:[#allocation21_spill] sm:$0xff] }
 0x272   :  { %1545 = vmatpush.msrb.mxu2 %v3933_v6  ;;  %1565 = vmatpush.msrb.mxu3 %v3934_v10  ;;  %v3473_v6 = vld [vmem:[#allocation5 + $0xe0] sm:$0xff] }
 0x273   :  { %1526 = vmatpush.msrb.mxu1 %v3209_v59  ;;  %v3940_v10 = vld [vmem:[#allocation17_spill] sm:$0xff] }
 0x274   :  { %1546 = vmatpush.msrb.mxu2 %v3211_v60  ;;  %1566 = vmatpush.msrb.mxu3 %v3213_v16 }
 0x275   :  { %1527 = vmatpush.msrb.mxu1 %v3219_v63 }
 0x276   :  { %1547 = vmatpush.msrb.mxu2 %v3221_v23  ;;  %1567 = vmatpush.msrb.mxu3 %v3223_v54  ;;  %v3935_v23 = vld [vmem:[#allocation33_spill] sm:$0xff] }
 0x277   :  { %1528 = vmatpush.msrb.mxu1 %v3231_v48 }
 0x278   :  { %1548 = vmatpush.msrb.mxu2 %v3233_v8  ;;  %1568 = vmatpush.msrb.mxu3 %v3235_v51 }
 0x279   :  { %1529 = vmatpush.msrb.mxu1 %v3242_v46 }
 0x27a   :  { %1549 = vmatpush.msrb.mxu2 %v3244_v61  ;;  %1569 = vmatpush.msrb.mxu3 %v3246_v45  ;;  %v3936_v45 = vld [vmem:[#allocation37_spill] sm:$0xff]  ;;  %v3937_v61 = vld [vmem:[#allocation22_spill] sm:$0xff] }
 0x27b   :  { %1530 = vmatpush.msrb.mxu1 %v3252_v17  ;;  %v137_v48 = vadd.f32 %v3936_v45, %v3935_v23  ;;  %v140_v45 = vadd.f32 %v3940_v10, %v3935_v23 }
 0x27c   :  { %1550 = vmatpush.msrb.mxu2 %v3254_v28  ;;  %1570 = vmatpush.msrb.mxu3 %v3917_v2 }
 0x27d   :  { %1531 = vmatpush.msrb.mxu1 %v3919_v38 }
 0x27e   :  { %1551 = vmatpush.msrb.mxu2 %v3920_v58  ;;  %1571 = vmatpush.msrb.mxu3 %v3921_v9 }
 0x27f   :  { %1532 = vmatpush.msrb.mxu1 %v3923_v49 }
 0x280   :  { %1552 = vmatpush.msrb.mxu2 %v3272_v5  ;;  %1572 = vmatpush.msrb.mxu3 %v3274_v47 }
 0x281   :  { %1533 = vmatpush.msrb.mxu1 %v3279_v34 }
 0x282   :  { %1553 = vmatpush.msrb.mxu2 %v3283_v57  ;;  %1573 = vmatpush.msrb.mxu3 %v3285_v15  ;;  %v3938_v15 = vld [vmem:[#allocation28_spill] sm:$0xff] }
 0x283   :  { %1534 = vmatpush.msrb.mxu1 %v3289_v37 }
 0x284   :  { %1554 = vmatpush.msrb.mxu2 %v3293_v32  ;;  %1574 = vmatpush.msrb.mxu3 %v3295_v7 }
 0x2e0   :  { %v1068_v51 = vpop.f32.mrf.mxu0  ;;  %v1088_v54 = vpop.f32.mrf.mxu1 }
 0x2e1   :  { %v1131_v60 = vadd.f32 %v1068_v51, %v137_v48  ;;  %v1132_v63 = vadd.f32 %v1088_v54, %v3937_v61  ;;  %v3478_v54 = vld [vmem:[#allocation5 + $0xc0] sm:$0xff]  ;;  %v3941_v61 = vld [vmem:[#allocation24_spill] sm:$0xff] }
 0x2e3   :  { %v2262_v8 = vmul.f32 -1.442695, %v1131_v60  ;;  %v2263_v16 = vmul.f32 -1.442695, %v1132_v63 }
 0x2e5   :  { %2339 = vpow2.f32 %v2262_v8  ;;  %v3482_v8 = vld [vmem:[#allocation5 + $0xa0] sm:$0xff] }
 0x2e6   :  { %2341 = vpow2.f32 %v2263_v16 }
 0x2e7   :  { %v1128_v47 = vpop.f32.mrf.mxu3  ;;  %v1108_v36 = vpop.f32.mrf.mxu2 }
 0x2e8   :  { %v1134_v22 = vadd.f32 %v1128_v47, %v3938_v15  ;;  %v1133_v59 = vadd.f32 %v1108_v36, %v3939_v44  ;;  %v3485_v15 = vld [vmem:[#allocation5 + $0x80] sm:$0xff] }
 0x2ea   :  { %v2264_v18 = vmul.f32 -1.442695, %v1134_v22  ;;  %v3487_v22 = vld [vmem:[#allocation5 + $0x60] sm:$0xff] }
 0x2eb   :  { %v2340_v19 = vpop.eup %2339  ;;  %3942 = vst [vmem:[#allocation51_spill] sm:$0xff] %v3487_v22 }
 0x2ec   :  { %v2342_v27 = vpop.eup %2341  ;;  %v1138_v30 = vadd.f32 1.0, %v2340_v19  ;;  %2343 = vpow2.f32 %v2264_v18  ;;  %v3490_v18 = vld [vmem:[#allocation5 + $0x40] sm:$0xff] }
 0x2ed   :  { %v1157_v7 = vadd.f32 1.0, %v2342_v27  ;;  %3943 = vst [vmem:[#allocation38_spill] sm:$0xff] %v3490_v18  ;;  %v3944_v27 = vld [vmem:[#allocation31_spill] sm:$0xff] }
 0x2ee   :  { %2345 = vrcp.f32 %v1138_v30  ;;  %v1150_v5 = vand.u32 2147483648, %v1138_v30  ;;  %v1148_v1 = vand.u32 2147483647, %v1138_v30  ;;  %vm1144_vm7 = vweird.f32 %v1138_v30 }
 0x2ef   :  { %2347 = vrcp.f32 %v1157_v7  ;;  %v1169_v34 = vand.u32 2147483648, %v1157_v7  ;;  %v1167_v3 = vand.u32 2147483647, %v1157_v7  ;;  %vm1163_vm8 = vweird.f32 %v1157_v7 }
 0x2f0   :  { %v1151_v56 = vor.u32 1.1754944e-38, %v1150_v5  ;;  %vm1149_vm11 = vcmp.eq.f32.partialorder %v1148_v1, 8.507059e+37 }
 0x2f1   :  { %v1170_v2 = vor.u32 1.1754944e-38, %v1169_v34  ;;  %vm1168_vm12 = vcmp.eq.f32.partialorder %v1167_v3, 8.507059e+37 }
 0x2f2   :  { %v2344_v40 = vpop.eup %2343 }
 0x2f3   :  { %v1177_v21 = vadd.f32 1.0, %v2344_v40  ;;  %v3497_v40 = vld [vmem:[#allocation5] sm:$0xff] }
 0x2f4   :  { %v2346_v41 = vpop.eup %2345 }
 0x2f5   :  { %v2348_v46 = vpop.eup %2347  ;;  %v1140_v17 = vmul.f32 %v2346_v41, %v1138_v30  ;;  %2349 = vrcp.f32 %v1177_v21  ;;  %vm1145_vm5 = vweird.f32 %v2346_v41  ;;  %v1189_v11 = vand.u32 2147483648, %v1177_v21 }
 0x2f6   :  { %v1159_v28 = vmul.f32 %v2348_v46, %v1157_v7  ;;  %2351 = vtanh.f32 %v1133_v59  ;;  %vm1164_vm6 = vweird.f32 %v2348_v46  ;;  %vm1146_vm9 = vmor %vm1144_vm7, %vm1145_vm5  ;;  %vm1183_vm14 = vweird.f32 %v1177_v21  ;;  %v3494_v7 = vld [vmem:[#allocation5 + $0x20] sm:$0xff] }
 0x2f7   :  { %v1141_v57 = vsub.f32 1.0, %v1140_v17  ;;  %vm1165_vm10 = vmor %vm1163_vm8, %vm1164_vm6  ;;  %v1187_v55 = vand.u32 2147483647, %v1177_v21  ;;  %v1190_v42 = vor.u32 1.1754944e-38, %v1189_v11 }
 0x2f8   :  { %v1160_v32 = vsub.f32 1.0, %v1159_v28 }
 0x2f9   :  { %v1142_v37 = vmul.f32 %v2346_v41, %v1141_v57  ;;  %vm1188_vm0 = vcmp.eq.f32.partialorder %v1187_v55, 8.507059e+37 }
 0x2fa   :  { %v1161_v29 = vmul.f32 %v2348_v46, %v1160_v32  ;;  %v3945_v32 = vld [vmem:[#allocation23_spill] sm:$0xff] }
 0x2fb   :  { %v2350_v62 = vpop.eup %2349  ;;  %v1143_v53 = vadd.f32 %v2346_v41, %v1142_v37 }
 0x2fc   :  { %v1162_v33 = vadd.f32 %v2348_v46, %v1161_v29  ;;  %v1179_v35 = vmul.f32 %v2350_v62, %v1177_v21  ;;  %v2352_v43 = vpop.eup %2351  ;;  %vm1184_vm13 = vweird.f32 %v2350_v62 }
 0x2fd   :  { %v1147_v14 = vsel %vm1146_vm9, %v2346_v41, %v1143_v53  ;;  %vm1185_vm15 = vmor %vm1183_vm14, %vm1184_vm13 }
 0x2fe   :  { %v1152_v38 = vsel %vm1149_vm11, %v1151_v56, %v1147_v14  ;;  %v1166_v24 = vsel %vm1165_vm10, %v2348_v46, %v1162_v33  ;;  %v1180_v58 = vsub.f32 1.0, %v1179_v35 }
 0x2ff   :  { %v1171_v9 = vsel %vm1168_vm12, %v1170_v2, %v1166_v24  ;;  %v1195_v12 = vmul.f32 %v2352_v43, %v1152_v38 }
 0x300   :  { %v1194_v49 = vmul.f32 %v1171_v9, %v3367_v0  ;;  %v1181_v50 = vmul.f32 %v2350_v62, %v1180_v58  ;;  %v3464_v0 = vld [vmem:[#allocation5 + $0x140] sm:$0xff] }
 0x301   :  { %1504 = vmatpush.msrb.mxu0 %v3464_v0 }
 0x302   :  { %v3461_v25 = vadd.f32 %v1195_v12, %v1194_v49  ;;  %v1182_v39 = vadd.f32 %v2350_v62, %v1181_v50 }
 0x303   :  { %1505 = vmatpush.msrb.mxu0 %v3467_v13 }
 0x304   :  { %2353 = vtanh.f32 %v3461_v25  ;;  %v1186_v31 = vsel %vm1185_vm15, %v2350_v62, %v1182_v39 }
 0x305   :  { %v1191_v4 = vsel %vm1188_vm0, %v1190_v42, %v1186_v31  ;;  %1506 = vmatpush.msrb.mxu0 %v3470_v20 }
 0x307   :  { %1507 = vmatpush.msrb.mxu0 %v3473_v6 }
 0x309   :  { %1508 = vmatpush.msrb.mxu0 %v3478_v54 }
 0x30a   :  { %v2354_v26 = vpop.eup %2353 }
 0x30b   :  { %v1198_v52 = vmul.f32 %v2354_v26, %v1191_v4  ;;  %1509 = vmatpush.msrb.mxu0 %v3482_v8 }
 0x30d   :  { %1202 = vst [vmem:[#allocation10 + $0x18] sm:$0xff] %v1198_v52  ;;  %1291 = vmatmul.f32.vlgmr.msra.gmra.mxu0 %v1198_v52  ;;  %1311 = vmatmul.f32.vlgmr.msra.gmra.mxu1 %v1198_v52 }
 0x30e   :  { %1331 = vmatmul.f32.vlgmr.msra.gmra.mxu2 %v1198_v52  ;;  %1351 = vmatmul.f32.vlgmr.msra.gmra.mxu3 %v1198_v52 }
 0x30f   :  { %1510 = vmatpush.msrb.mxu0 %v3485_v15 }
 0x311   :  { %1511 = vmatpush.msrb.mxu0 %v3487_v22 }
 0x313   :  { %1512 = vmatpush.msrb.mxu0 %v3490_v18 }
 0x315   :  { %1513 = vmatpush.msrb.mxu0 %v3494_v7 }
 0x317   :  { %1514 = vmatpush.msrb.mxu0 %v3497_v40 }
 0x38a   :  { %v1292_v48 = vpop.f32.mrf.mxu0  ;;  %v1312_v51 = vpop.f32.mrf.mxu1 }
 0x38b   :  { %v1355_v60 = vadd.f32 %v1292_v48, %v140_v45  ;;  %v1356_v63 = vadd.f32 %v1312_v51, %v3941_v61 }
 0x38d   :  { %v2265_v16 = vmul.f32 -1.442695, %v1355_v60  ;;  %v2266_v47 = vmul.f32 -1.442695, %v1356_v63 }
 0x38f   :  { %2355 = vpow2.f32 %v2265_v16  ;;  %v3515_v16 = vld [vmem:[#allocation5 + $0x1e8] sm:$0xff] }
 0x390   :  { %2357 = vpow2.f32 %v2266_v47  ;;  %v3517_v47 = vld [vmem:[#allocation5 + $0x1f0] sm:$0xff]  ;;  %1743 = vmatpush.msra.mxu1 %v3515_v16 }
 0x391   :  { %v1352_v19 = vpop.f32.mrf.mxu3  ;;  %v1332_v46 = vpop.f32.mrf.mxu2  ;;  %1763 = vmatpush.msra.mxu2 %v3517_v47 }
 0x392   :  { %v1358_v30 = vadd.f32 %v1352_v19, %v3944_v27  ;;  %v1357_v5 = vadd.f32 %v1332_v46, %v3945_v32  ;;  %v3521_v19 = vld [vmem:[#allocation5 + $0x1f8] sm:$0xff]  ;;  %v3525_v27 = vld [vmem:[#allocation5 + $0x1c0] sm:$0xff] }
 0x393   :  { %1783 = vmatpush.msra.mxu3 %v3521_v19  ;;  %v3545_v46 = vld [vmem:[#allocation5 + $0x1b8] sm:$0xff] }
 0x394   :  { %v2267_v36 = vmul.f32 -1.442695, %v1358_v30  ;;  %v3527_v30 = vld [vmem:[#allocation5 + $0x1c8] sm:$0xff]  ;;  %v3557_v32 = vld [vmem:[#allocation5 + $0x198] sm:$0xff] }
 0x395   :  { %v2356_v21 = vpop.eup %2355  ;;  %1744 = vmatpush.msra.mxu1 %v3527_v30 }
 0x396   :  { %v2358_v41 = vpop.eup %2357  ;;  %v1362_v44 = vadd.f32 1.0, %v2356_v21  ;;  %2359 = vpow2.f32 %v2267_v36  ;;  %v3529_v36 = vld [vmem:[#allocation5 + $0x1d0] sm:$0xff]  ;;  %v3533_v21 = vld [vmem:[#allocation5 + $0x1d8] sm:$0xff] }
 0x397   :  { %v1381_v59 = vadd.f32 1.0, %v2358_v41  ;;  %1764 = vmatpush.msra.mxu2 %v3529_v36  ;;  %1784 = vmatpush.msra.mxu3 %v3533_v21  ;;  %v3537_v41 = vld [vmem:[#allocation5 + $0x1a0] sm:$0xff] }
 0x398   :  { %2361 = vrcp.f32 %v1362_v44  ;;  %v1374_v62 = vand.u32 2147483648, %v1362_v44  ;;  %v1372_v33 = vand.u32 2147483647, %v1362_v44  ;;  %vm1368_vm3 = vweird.f32 %v1362_v44 }
 0x399   :  { %2363 = vrcp.f32 %v1381_v59  ;;  %v1393_v53 = vand.u32 2147483648, %v1381_v59  ;;  %v1391_v2 = vand.u32 2147483647, %v1381_v59  ;;  %vm1387_vm4 = vweird.f32 %v1381_v59  ;;  %1785 = vmatpush.msra.mxu3 %v3545_v46 }
 0x39a   :  { %v1375_v38 = vor.u32 1.1754944e-38, %v1374_v62  ;;  %vm1373_vm7 = vcmp.eq.f32.partialorder %v1372_v33, 8.507059e+37  ;;  %v3577_v62 = vld [vmem:[#allocation5 + $0x158] sm:$0xff] }
 0x39b   :  { %v1394_v9 = vor.u32 1.1754944e-38, %v1393_v53  ;;  %vm1392_vm8 = vcmp.eq.f32.partialorder %v1391_v2, 8.507059e+37  ;;  %1786 = vmatpush.msra.mxu3 %v3557_v32  ;;  %v3583_v53 = vld [vmem:[#allocation5 + $0x128] sm:$0xff]  ;;  %v3587_v33 = vld [vmem:[#allocation5 + $0x138] sm:$0xff]  ;;  %v3595_v2 = vld [vmem:[#allocation5 + $0x110] sm:$0xff] }
 0x39c   :  { %v2360_v17 = vpop.eup %2359 }
 0x39d   :  { %v1401_v28 = vadd.f32 1.0, %v2360_v17  ;;  %v3549_v17 = vld [vmem:[#allocation5 + $0x180] sm:$0xff] }
 0x39e   :  { %v2362_v57 = vpop.eup %2361 }
 0x39f   :  { %v2364_v34 = vpop.eup %2363  ;;  %v1364_v37 = vmul.f32 %v2362_v57, %v1362_v44  ;;  %2365 = vrcp.f32 %v1401_v28  ;;  %vm1369_vm1 = vweird.f32 %v2362_v57  ;;  %v1413_v10 = vand.u32 2147483648, %v1401_v28  ;;  %v3539_v44 = vld [vmem:[#allocation5 + $0x1a8] sm:$0xff] }
 0x3a0   :  { %v1383_v1 = vmul.f32 %v2364_v34, %v1381_v59  ;;  %2367 = vtanh.f32 %v1357_v5  ;;  %vm1388_vm2 = vweird.f32 %v2364_v34  ;;  %vm1370_vm5 = vmor %vm1368_vm3, %vm1369_vm1  ;;  %vm1407_vm10 = vweird.f32 %v1401_v28  ;;  %v3541_v59 = vld [vmem:[#allocation5 + $0x1b0] sm:$0xff]  ;;  %1745 = vmatpush.msra.mxu1 %v3539_v44  ;;  %v3561_v5 = vld [vmem:[#allocation5 + $0x160] sm:$0xff] }
 0x3a1   :  { %v1365_v29 = vsub.f32 1.0, %v1364_v37  ;;  %vm1389_vm6 = vmor %vm1387_vm4, %vm1388_vm2  ;;  %v1411_v45 = vand.u32 2147483647, %v1401_v28  ;;  %v1414_v51 = vor.u32 1.1754944e-38, %v1413_v10  ;;  %1765 = vmatpush.msra.mxu2 %v3541_v59  ;;  %v3565_v37 = vld [vmem:[#allocation5 + $0x170] sm:$0xff]  ;;  %v3630_v10 = vld [vmem:[#allocation5 + $0xb8] sm:$0xff] }
 0x3a2   :  { %v1384_v3 = vsub.f32 1.0, %v1383_v1  ;;  %v3569_v1 = vld [vmem:[#allocation5 + $0x178] sm:$0xff] }
 0x3a3   :  { %v1366_v56 = vmul.f32 %v2362_v57, %v1365_v29  ;;  %vm1412_vm12 = vcmp.eq.f32.partialorder %v1411_v45, 8.507059e+37  ;;  %1787 = vmatpush.msra.mxu3 %v3569_v1  ;;  %v3573_v29 = vld [vmem:[#allocation5 + $0x148] sm:$0xff] }
 0x3a4   :  { %v1385_v35 = vmul.f32 %v2364_v34, %v1384_v3  ;;  %v3575_v3 = vld [vmem:[#allocation5 + $0x150] sm:$0xff] }
 0x3a5   :  { %v2366_v14 = vpop.eup %2365  ;;  %v1367_v43 = vadd.f32 %v2362_v57, %v1366_v56  ;;  %1788 = vmatpush.msra.mxu3 %v3577_v62  ;;  %v3585_v56 = vld [vmem:[#allocation5 + $0x130] sm:$0xff] }
 0x3a6   :  { %v1386_v24 = vadd.f32 %v2364_v34, %v1385_v35  ;;  %v1403_v58 = vmul.f32 %v2366_v14, %v1401_v28  ;;  %v2368_v49 = vpop.eup %2367  ;;  %vm1408_vm9 = vweird.f32 %v2366_v14  ;;  %v3551_v28 = vld [vmem:[#allocation5 + $0x188] sm:$0xff] }
 0x3a7   :  { %v1371_v12 = vsel %vm1370_vm5, %v2362_v57, %v1367_v43  ;;  %vm1409_vm11 = vmor %vm1407_vm10, %vm1408_vm9  ;;  %v3553_v57 = vld [vmem:[#allocation5 + $0x190] sm:$0xff]  ;;  %1746 = vmatpush.msra.mxu1 %v3551_v28  ;;  %1789 = vmatpush.msra.mxu3 %v3587_v33  ;;  %v3593_v35 = vld [vmem:[#allocation5 + $0x108] sm:$0xff] }
 0x3a8   :  { %v1376_v50 = vsel %vm1373_vm7, %v1375_v38, %v1371_v12  ;;  %v1390_v39 = vsel %vm1389_vm6, %v2364_v34, %v1386_v24  ;;  %v1404_v11 = vsub.f32 1.0, %v1403_v58  ;;  %1766 = vmatpush.msra.mxu2 %v3553_v57  ;;  %v3563_v34 = vld [vmem:[#allocation5 + $0x168] sm:$0xff]  ;;  %v3605_v38 = vld [vmem:[#allocation5 + $0xf0] sm:$0xff]  ;;  %v3607_v24 = vld [vmem:[#allocation5 + $0xf8] sm:$0xff] }
 0x3a9   :  { %v1395_v55 = vsel %vm1392_vm8, %v1394_v9, %v1390_v39  ;;  %v1419_v31 = vmul.f32 %v2368_v49, %v1376_v50  ;;  %1747 = vmatpush.msra.mxu1 %v3563_v34  ;;  %v3603_v43 = vld [vmem:[#allocation5 + $0xe8] sm:$0xff]  ;;  %v3617_v39 = vld [vmem:[#allocation5 + $0xd0] sm:$0xff] }
 0x3aa   :  { %v1418_v42 = vmul.f32 %v1395_v55, %v3461_v25  ;;  %v1405_v26 = vmul.f32 %v2366_v14, %v1404_v11  ;;  %v3513_v25 = vld [vmem:[#allocation5 + $0x1e0] sm:$0xff]  ;;  %1767 = vmatpush.msra.mxu2 %v3565_v37  ;;  %v3947_v58 = vld [vmem:[#allocation18_spill] sm:$0xff]  ;;  %v3619_v11 = vld [vmem:[#allocation5 + $0xd8] sm:$0xff] }
 0x3ab   :  { %1723 = vmatpush.msra.mxu0 %v3513_v25  ;;  %1748 = vmatpush.msra.mxu1 %v3573_v29  ;;  %v143_v9 = vadd.f32 %v3947_v58, %v3935_v23  ;;  %v3615_v50 = vld [vmem:[#allocation5 + $0xc8] sm:$0xff]  ;;  %v3667_v23 = vld [vmem:[#allocation5 + $0x30] sm:$0xff] }
 0x3ac   :  { %v3503_v4 = vadd.f32 %v1419_v31, %v1418_v42  ;;  %v1406_v52 = vadd.f32 %v2366_v14, %v1405_v26  ;;  %1768 = vmatpush.msra.mxu2 %v3575_v3  ;;  %v3948_v31 = vld [vmem:[#allocation26_spill] sm:$0xff] }
 0x3ad   :  { %1724 = vmatpush.msra.mxu0 %v3525_v27  ;;  %1749 = vmatpush.msra.mxu1 %v3583_v53  ;;  %v3626_v26 = vld [vmem:[#allocation5 + $0xa8] sm:$0xff] }
 0x3ae   :  { %2369 = vtanh.f32 %v3503_v4  ;;  %v1410_v48 = vsel %vm1409_vm11, %v2366_v14, %v1406_v52  ;;  %1769 = vmatpush.msra.mxu2 %v3585_v56  ;;  %v3597_v14 = vld [vmem:[#allocation5 + $0x118] sm:$0xff]  ;;  %v3628_v52 = vld [vmem:[#allocation5 + $0xb0] sm:$0xff]  ;;  %v3644_v58 = vld [vmem:[#allocation5 + $0x68] sm:$0xff] }
 0x3af   :  { %v1415_v61 = vsel %vm1412_vm12, %v1414_v51, %v1410_v48  ;;  %1725 = vmatpush.msra.mxu0 %v3537_v41  ;;  %1750 = vmatpush.msra.mxu1 %v3593_v35  ;;  %v3636_v51 = vld [vmem:[#allocation5 + $0x88] sm:$0xff]  ;;  %3949 = vst [vmem:[#allocation53_spill] sm:$0xff] %v3644_v58 }
 0x3b0   :  { %1770 = vmatpush.msra.mxu2 %v3595_v2  ;;  %1790 = vmatpush.msra.mxu3 %v3597_v14 }
 0x3b1   :  { %1726 = vmatpush.msra.mxu0 %v3549_v17  ;;  %1751 = vmatpush.msra.mxu1 %v3603_v43 }
 0x3b2   :  { %1771 = vmatpush.msra.mxu2 %v3605_v38  ;;  %1791 = vmatpush.msra.mxu3 %v3607_v24 }
 0x3b3   :  { %1727 = vmatpush.msra.mxu0 %v3561_v5  ;;  %1752 = vmatpush.msra.mxu1 %v3615_v50 }
 0x3b4   :  { %v2370_v60 = vpop.eup %2369  ;;  %1772 = vmatpush.msra.mxu2 %v3617_v39  ;;  %1792 = vmatpush.msra.mxu3 %v3619_v11 }
 0x3b5   :  { %v3506_v63 = vmul.f32 %v2370_v60, %v1415_v61  ;;  %1728 = vmatpush.msra.mxu0 %v3464_v0  ;;  %1753 = vmatpush.msra.mxu1 %v3626_v26  ;;  %v3638_v60 = vld [vmem:[#allocation5 + $0x90] sm:$0xff]  ;;  %v3640_v61 = vld [vmem:[#allocation5 + $0x98] sm:$0xff] }
 0x3b6   :  { %1773 = vmatpush.msra.mxu2 %v3628_v52  ;;  %1793 = vmatpush.msra.mxu3 %v3630_v10 }
 0x3b7   :  { %3946 = vst [vmem:[#allocation52_spill] sm:$0xff] %v3506_v63  ;;  %1515 = vmatmul.f32.vlgmr.msrb.gmra.mxu0 %v3506_v63  ;;  %1535 = vmatmul.f32.vlgmr.msrb.gmra.mxu1 %v3506_v63 }
 0x3b8   :  { %1426 = vst [vmem:[#allocation10 + $0x20] sm:$0xff] %v3506_v63  ;;  %1555 = vmatmul.f32.vlgmr.msrb.gmra.mxu2 %v3506_v63  ;;  %1575 = vmatmul.f32.vlgmr.msrb.gmra.mxu3 %v3506_v63 }
 0x3b9   :  { %1729 = vmatpush.msra.mxu0 %v3467_v13  ;;  %1754 = vmatpush.msra.mxu1 %v3636_v51 }
 0x3ba   :  { %1774 = vmatpush.msra.mxu2 %v3638_v60  ;;  %1794 = vmatpush.msra.mxu3 %v3640_v61 }
 0x3bb   :  { %1730 = vmatpush.msra.mxu0 %v3470_v20  ;;  %1755 = vmatpush.msra.mxu1 %v3644_v58 }
 0x3bd   :  { %1731 = vmatpush.msra.mxu0 %v3473_v6 }
 0x3bf   :  { %1732 = vmatpush.msra.mxu0 %v3478_v54 }
 0x3c1   :  { %1733 = vmatpush.msra.mxu0 %v3482_v8 }
 0x3c3   :  { %1734 = vmatpush.msra.mxu0 %v3485_v15 }
 0x3c5   :  { %1735 = vmatpush.msra.mxu0 %v3487_v22  ;;  %v3669_v22 = vld [vmem:[#allocation5 + $0x38] sm:$0xff] }
 0x3c7   :  { %1736 = vmatpush.msra.mxu0 %v3490_v18  ;;  %v3679_v18 = vld [vmem:[#allocation5 + $0x18] sm:$0xff] }
 0x3c9   :  { %1737 = vmatpush.msra.mxu0 %v3494_v7 }
 0x3cb   :  { %1738 = vmatpush.msra.mxu0 %v3497_v40 }
 0x3cd   :  { %1947 = vmatpush.msrb.mxu0 %v3513_v25 }
 0x3cf   :  { %1948 = vmatpush.msrb.mxu0 %v3525_v27 }
 0x3d1   :  { %1949 = vmatpush.msrb.mxu0 %v3537_v41 }
 0x3d3   :  { %1950 = vmatpush.msrb.mxu0 %v3549_v17 }
 0x3d5   :  { %1951 = vmatpush.msrb.mxu0 %v3561_v5 }
 0x3d7   :  { %1952 = vmatpush.msrb.mxu0 %v3464_v0 }
 0x3d9   :  { %1953 = vmatpush.msrb.mxu0 %v3467_v13 }
 0x3db   :  { %1954 = vmatpush.msrb.mxu0 %v3470_v20 }
 0x3dd   :  { %1955 = vmatpush.msrb.mxu0 %v3473_v6 }
 0x3df   :  { %1956 = vmatpush.msrb.mxu0 %v3478_v54 }
 0x3e1   :  { %1957 = vmatpush.msrb.mxu0 %v3482_v8 }
 0x3e3   :  { %1958 = vmatpush.msrb.mxu0 %v3485_v15  ;;  %v3959_v15 = vld [vmem:[#allocation38_spill] sm:$0xff] }
 0x434   :  { %v1516_v12 = vpop.f32.mrf.mxu0  ;;  %v1536_v49 = vpop.f32.mrf.mxu1 }
 0x435   :  { %v1579_v55 = vadd.f32 %v1516_v12, %v143_v9  ;;  %v1580_v42 = vadd.f32 %v1536_v49, %v3948_v31  ;;  %v3646_v9 = vld [vmem:[#allocation5 + $0x70] sm:$0xff]  ;;  %v3648_v12 = vld [vmem:[#allocation5 + $0x78] sm:$0xff]  ;;  %v3652_v49 = vld [vmem:[#allocation5 + $0x48] sm:$0xff] }
 0x436   :  { %3950 = vst [vmem:[#allocation54_spill] sm:$0xff] %v3646_v9  ;;  %v3656_v31 = vld [vmem:[#allocation5 + $0x50] sm:$0xff]  ;;  %1775 = vmatpush.msra.mxu2 %v3646_v9  ;;  %1795 = vmatpush.msra.mxu3 %v3648_v12 }
 0x437   :  { %v2268_v45 = vmul.f32 -1.442695, %v1579_v55  ;;  %v2269_v48 = vmul.f32 -1.442695, %v1580_v42  ;;  %3951 = vst [vmem:[#allocation39_spill] sm:$0xff] %v3648_v12  ;;  %v3658_v42 = vld [vmem:[#allocation5 + $0x58] sm:$0xff]  ;;  %1756 = vmatpush.msra.mxu1 %v3652_v49 }
 0x438   :  { %3952 = vst [vmem:[#allocation55_spill] sm:$0xff] %v3652_v49  ;;  %1776 = vmatpush.msra.mxu2 %v3656_v31  ;;  %1796 = vmatpush.msra.mxu3 %v3658_v42  ;;  %v3677_v12 = vld [vmem:[#allocation5 + $0x10] sm:$0xff] }
 0x439   :  { %2371 = vpow2.f32 %v2268_v45  ;;  %v3953_v45 = vld [vmem:[#allocation34_spill] sm:$0xff] }
 0x43a   :  { %2373 = vpow2.f32 %v2269_v48  ;;  %v3663_v48 = vld [vmem:[#allocation5 + $0x28] sm:$0xff]  ;;  %1777 = vmatpush.msra.mxu2 %v3667_v23  ;;  %1797 = vmatpush.msra.mxu3 %v3669_v22 }
 0x43b   :  { %v1576_v55 = vpop.f32.mrf.mxu3  ;;  %1757 = vmatpush.msra.mxu1 %v3663_v48 }
 0x43c   :  { %v1582_v63 = vadd.f32 %v1576_v55, %v3953_v45  ;;  %v3673_v55 = vld [vmem:[#allocation5 + $0x8] sm:$0xff]  ;;  %1778 = vmatpush.msra.mxu2 %v3677_v12  ;;  %1798 = vmatpush.msra.mxu3 %v3679_v18 }
 0x43d   :  { %1758 = vmatpush.msra.mxu1 %v3673_v55 }
 0x43e   :  { %v2270_v58 = vmul.f32 -1.442695, %v1582_v63  ;;  %1987 = vmatpush.msrb.mxu2 %v3517_v47  ;;  %2007 = vmatpush.msrb.mxu3 %v3521_v19 }
 0x43f   :  { %v2372_v45 = vpop.eup %2371  ;;  %1967 = vmatpush.msrb.mxu1 %v3515_v16  ;;  %v3954_v16 = vld [vmem:[#allocation25_spill] sm:$0xff] }
 0x440   :  { %v2374_v49 = vpop.eup %2373  ;;  %v3681_v9 = vadd.f32 1.0, %v2372_v45  ;;  %2375 = vpow2.f32 %v2270_v58  ;;  %v1556_v58 = vpop.f32.mrf.mxu2  ;;  %1988 = vmatpush.msrb.mxu2 %v3529_v36  ;;  %2008 = vmatpush.msrb.mxu3 %v3533_v21 }
 0x441   :  { %v3685_v63 = vadd.f32 1.0, %v2374_v49  ;;  %1968 = vmatpush.msrb.mxu1 %v3527_v30  ;;  %v1581_v47 = vadd.f32 %v1556_v58, %v3954_v16  ;;  %v2115_v58 = vld [vmem:[#allocation8 + $0x40] sm:$0xff]  ;;  %v3964_v16 = vld [vmem:[#allocation35_spill] sm:$0xff] }
 0x442   :  { %2377 = vrcp.f32 %v3681_v9  ;;  %1989 = vmatpush.msrb.mxu2 %v3541_v59  ;;  %2009 = vmatpush.msrb.mxu3 %v3545_v46  ;;  %v1598_v41 = vand.u32 2147483648, %v3681_v9  ;;  %v1596_v46 = vand.u32 2147483647, %v3681_v9  ;;  %vm1592_vm15 = vweird.f32 %v3681_v9 }
 0x443   :  { %2379 = vrcp.f32 %v3685_v63  ;;  %1969 = vmatpush.msrb.mxu1 %v3539_v44  ;;  %v1617_v44 = vand.u32 2147483648, %v3685_v63  ;;  %vm1611_vm0 = vweird.f32 %v3685_v63 }
 0x444   :  { %1990 = vmatpush.msrb.mxu2 %v3553_v57  ;;  %2010 = vmatpush.msrb.mxu3 %v3557_v32  ;;  %v1599_v0 = vor.u32 1.1754944e-38, %v1598_v41  ;;  %vm1597_vm3 = vcmp.eq.f32.partialorder %v1596_v46, 8.507059e+37  ;;  %v2109_v46 = vld [vmem:[#allocation8 + $0x10] sm:$0xff] }
 0x445   :  { %1970 = vmatpush.msrb.mxu1 %v3551_v28  ;;  %v1615_v28 = vand.u32 2147483647, %v3685_v63 }
 0x446   :  { %v2376_v49 = vpop.eup %2375  ;;  %1991 = vmatpush.msrb.mxu2 %v3565_v37  ;;  %2011 = vmatpush.msrb.mxu3 %v3569_v1  ;;  %v1618_v37 = vor.u32 1.1754944e-38, %v1617_v44 }
 0x447   :  { %v3701_v45 = vadd.f32 1.0, %v2376_v49  ;;  %1971 = vmatpush.msrb.mxu1 %v3563_v34  ;;  %vm1616_vm4 = vcmp.eq.f32.partialorder %v1615_v28, 8.507059e+37  ;;  %v2114_v49 = vld [vmem:[#allocation8 + $0x38] sm:$0xff] }
 0x448   :  { %v2378_v25 = vpop.eup %2377  ;;  %1992 = vmatpush.msrb.mxu2 %v3575_v3  ;;  %2012 = vmatpush.msrb.mxu3 %v3577_v62 }
 0x449   :  { %v2380_v19 = vpop.eup %2379  ;;  %v1588_v27 = vmul.f32 %v2378_v25, %v3681_v9  ;;  %2381 = vrcp.f32 %v3701_v45  ;;  %vm1593_vm13 = vweird.f32 %v2378_v25  ;;  %1972 = vmatpush.msrb.mxu1 %v3573_v29  ;;  %v1637_v54 = vand.u32 2147483648, %v3701_v45 }
 0x44a   :  { %v1607_v30 = vmul.f32 %v2380_v19, %v3685_v63  ;;  %2383 = vtanh.f32 %v1581_v47  ;;  %vm1612_vm14 = vweird.f32 %v2380_v19  ;;  %vm1594_vm1 = vmor %vm1592_vm15, %vm1593_vm13  ;;  %1993 = vmatpush.msrb.mxu2 %v3585_v56  ;;  %2013 = vmatpush.msrb.mxu3 %v3587_v33  ;;  %vm1631_vm6 = vweird.f32 %v3701_v45 }
 0x44b   :  { %v1589_v36 = vsub.f32 1.0, %v1588_v27  ;;  %1973 = vmatpush.msrb.mxu1 %v3583_v53  ;;  %vm1613_vm2 = vmor %vm1611_vm0, %vm1612_vm14 }
 0x44c   :  { %v1608_v21 = vsub.f32 1.0, %v1607_v30  ;;  %1994 = vmatpush.msrb.mxu2 %v3595_v2  ;;  %2014 = vmatpush.msrb.mxu3 %v3597_v14  ;;  %v3955_v2 = vld [vmem:[#allocation51_spill] sm:$0xff]  ;;  %v3956_v14 = vld [vmem:[#allocation53_spill] sm:$0xff] }
 0x44d   :  { %v1590_v59 = vmul.f32 %v2378_v25, %v1589_v36  ;;  %1974 = vmatpush.msrb.mxu1 %v3593_v35  ;;  %1959 = vmatpush.msrb.mxu0 %v3955_v2  ;;  %v2111_v30 = vld [vmem:[#allocation8 + $0x20] sm:$0xff] }
 0x44e   :  { %v1609_v17 = vmul.f32 %v2380_v19, %v1608_v21  ;;  %1995 = vmatpush.msrb.mxu2 %v3605_v38  ;;  %2015 = vmatpush.msrb.mxu3 %v3607_v24  ;;  %v3957_v38 = vld [vmem:[#allocation54_spill] sm:$0xff]  ;;  %v3958_v24 = vld [vmem:[#allocation39_spill] sm:$0xff] }
 0x44f   :  { %v3727_v57 = vpop.eup %2381  ;;  %v1591_v32 = vadd.f32 %v2378_v25, %v1590_v59  ;;  %1975 = vmatpush.msrb.mxu1 %v3603_v43  ;;  %v1638_v43 = vor.u32 1.1754944e-38, %v1637_v54  ;;  %1960 = vmatpush.msrb.mxu0 %v3959_v15  ;;  %v2110_v59 = vld [vmem:[#allocation8 + $0x18] sm:$0xff] }
 0x450   :  { %v1610_v5 = vadd.f32 %v2380_v19, %v1609_v17  ;;  %v1627_v34 = vmul.f32 %v3727_v57, %v3701_v45  ;;  %v2384_v13 = vpop.eup %2383  ;;  %1996 = vmatpush.msrb.mxu2 %v3617_v39  ;;  %2016 = vmatpush.msrb.mxu3 %v3619_v11  ;;  %vm1632_vm5 = vweird.f32 %v3727_v57  ;;  %v2108_v17 = vld [vmem:[#allocation8 + $0x8] sm:$0xff] }
 0x451   :  { %v1595_v1 = vsel %vm1594_vm1, %v2378_v25, %v1591_v32  ;;  %1976 = vmatpush.msrb.mxu1 %v3615_v50  ;;  %vm1633_vm7 = vmor %vm1631_vm6, %vm1632_vm5  ;;  %v3960_v50 = vld [vmem:[#allocation55_spill] sm:$0xff]  ;;  %1961 = vmatpush.msrb.mxu0 %v3494_v7  ;;  %v2120_v7 = vld [vmem:[#allocation8 + $0x68] sm:$0xff] }
 0x452   :  { %v1600_v29 = vsel %vm1597_vm3, %v1599_v0, %v1595_v1  ;;  %v1614_v3 = vsel %vm1613_vm2, %v2380_v19, %v1610_v5  ;;  %v1628_v62 = vsub.f32 1.0, %v1627_v34  ;;  %1997 = vmatpush.msrb.mxu2 %v3628_v52  ;;  %2017 = vmatpush.msrb.mxu3 %v3630_v10  ;;  %v2119_v52 = vld [vmem:[#allocation8 + $0x60] sm:$0xff]  ;;  %v2118_v10 = vld [vmem:[#allocation8 + $0x58] sm:$0xff]  ;;  %v2112_v19 = vld [vmem:[#allocation8 + $0x28] sm:$0xff] }
 0x453   :  { %v1619_v53 = vsel %vm1616_vm4, %v1618_v37, %v1614_v3  ;;  %v1643_v56 = vmul.f32 %v2384_v13, %v1600_v29  ;;  %1977 = vmatpush.msrb.mxu1 %v3626_v26  ;;  %1962 = vmatpush.msrb.mxu0 %v3497_v40  ;;  %v2107_v32 = vld [vmem:[#allocation8] sm:$0xff]  ;;  %v3965_v34 = vld [vmem:[#allocation27_spill] sm:$0xff] }
 0x454   :  { %v1642_v33 = vmul.f32 %v1619_v53, %v3503_v4  ;;  %v1629_v20 = vmul.f32 %v3727_v57, %v1628_v62  ;;  %v1635_v4 = vand.u32 2147483647, %v3701_v45  ;;  %1998 = vmatpush.msrb.mxu2 %v3638_v60  ;;  %2018 = vmatpush.msrb.mxu3 %v3640_v61  ;;  %v3962_v60 = vld [vmem:[#allocation19_spill] sm:$0xff] }
 0x455   :  { %1978 = vmatpush.msrb.mxu1 %v3636_v51  ;;  %v3961_v51 = vld [vmem:[#allocation33_spill] sm:$0xff]  ;;  %v2113_v45 = vld [vmem:[#allocation8 + $0x30] sm:$0xff] }
 0x456   :  { %v3751_v35 = vadd.f32 %v1643_v56, %v1642_v33  ;;  %v1630_v6 = vadd.f32 %v3727_v57, %v1629_v20  ;;  %1999 = vmatpush.msrb.mxu2 %v3957_v38  ;;  %2019 = vmatpush.msrb.mxu3 %v3958_v24  ;;  %vm1636_vm8 = vcmp.eq.f32.partialorder %v1635_v4, 8.507059e+37  ;;  %v146_v61 = vadd.f32 %v3962_v60, %v3961_v51 }
 0x457   :  { %1979 = vmatpush.msrb.mxu1 %v3956_v14 }
 0x458   :  { %2385 = vtanh.f32 %v3751_v35  ;;  %v1634_v8 = vsel %vm1633_vm7, %v3727_v57, %v1630_v6  ;;  %2000 = vmatpush.msrb.mxu2 %v3656_v31  ;;  %2020 = vmatpush.msrb.mxu3 %v3658_v42  ;;  %v2117_v31 = vld [vmem:[#allocation8 + $0x50] sm:$0xff] }
 0x459   :  { %1980 = vmatpush.msrb.mxu1 %v3960_v50  ;;  %v1639_v11 = vsel %vm1636_vm8, %v1638_v43, %v1634_v8 }
 0x45a   :  { %2001 = vmatpush.msrb.mxu2 %v3667_v23  ;;  %2021 = vmatpush.msrb.mxu3 %v3669_v22  ;;  %v2122_v23 = vld [vmem:[#allocation8 + $0x78] sm:$0xff]  ;;  %v2121_v22 = vld [vmem:[#allocation8 + $0x70] sm:$0xff] }
 0x45b   :  { %1981 = vmatpush.msrb.mxu1 %v3663_v48 }
 0x45c   :  { %2002 = vmatpush.msrb.mxu2 %v3677_v12  ;;  %2022 = vmatpush.msrb.mxu3 %v3679_v18  ;;  %v3963_v12 = vld [vmem:[#allocation29_spill] sm:$0xff]  ;;  %v2116_v18 = vld [vmem:[#allocation8 + $0x48] sm:$0xff] }
 0x45d   :  { %1982 = vmatpush.msrb.mxu1 %v3673_v55 }
 0x45e   :  { %v2386_v39 = vpop.eup %2385 }
 0x45f   :  { %v3778_v26 = vmul.f32 %v2386_v39, %v1639_v11 }
 0x461   :  { %1650 = vst [vmem:[#allocation10 + $0x28] sm:$0xff] %v3778_v26  ;;  %1739 = vmatmul.f32.vlgmr.msra.gmra.mxu0 %v3778_v26  ;;  %1759 = vmatmul.f32.vlgmr.msra.gmra.mxu1 %v3778_v26 }
 0x462   :  { %1779 = vmatmul.f32.vlgmr.msra.gmra.mxu2 %v3778_v26  ;;  %1799 = vmatmul.f32.vlgmr.msra.gmra.mxu3 %v3778_v26 }
 0x463   :  { %2127 = vmatpush.msra.mxu0 %v2122_v23 }
 0x465   :  { %2128 = vmatpush.msra.mxu0 %v2121_v22 }
 0x467   :  { %2129 = vmatpush.msra.mxu0 %v2120_v7 }
 0x469   :  { %2130 = vmatpush.msra.mxu0 %v2119_v52 }
 0x46b   :  { %2131 = vmatpush.msra.mxu0 %v2118_v10 }
 0x46d   :  { %2132 = vmatpush.msra.mxu0 %v2117_v31 }
 0x46f   :  { %2133 = vmatpush.msra.mxu0 %v2116_v18  ;;  %v2100_v18 = vld [vmem:[#allocation10 + $0x8] sm:$0xff] }
 0x471   :  { %2134 = vmatpush.msra.mxu0 %v2115_v58  ;;  %v3966_v58 = vld [vmem:[#allocation52_spill] sm:$0xff] }
 0x473   :  { %2135 = vmatpush.msra.mxu0 %v2114_v49  ;;  %v3967_v49 = vld [vmem:[#allocation20_spill] sm:$0xff] }
 0x475   :  { %2136 = vmatpush.msra.mxu0 %v2113_v45  ;;  %v149_v45 = vadd.f32 %v3967_v49, %v3961_v51 }
 0x477   :  { %2137 = vmatpush.msra.mxu0 %v2112_v19  ;;  %v3968_v19 = vld [vmem:[#allocation32_spill] sm:$0xff] }
 0x479   :  { %2138 = vmatpush.msra.mxu0 %v2111_v30 }
 0x47b   :  { %2139 = vmatpush.msra.mxu0 %v2110_v59 }
 0x47d   :  { %2140 = vmatpush.msra.mxu0 %v2109_v46 }
 0x47f   :  { %2141 = vmatpush.msra.mxu0 %v2108_v17 }
 0x481   :  { %2142 = vmatpush.msra.mxu0 %v2107_v32 }
 0x4de   :  { %v1740_v40 = vpop.f32.mrf.mxu0  ;;  %v1760_v9 = vpop.f32.mrf.mxu1 }
 0x4df   :  { %v1803_v42 = vadd.f32 %v1740_v40, %v146_v61  ;;  %v1804_v48 = vadd.f32 %v1760_v9, %v3963_v12 }
 0x4e1   :  { %v2271_v55 = vmul.f32 -1.442695, %v1803_v42  ;;  %v2272_v63 = vmul.f32 -1.442695, %v1804_v48 }
 0x4e3   :  { %2387 = vpow2.f32 %v2271_v55  ;;  %v2101_v55 = vld [vmem:[#allocation10 + $0x10] sm:$0xff] }
 0x4e4   :  { %2389 = vpow2.f32 %v2272_v63  ;;  %v2102_v63 = vld [vmem:[#allocation10 + $0x18] sm:$0xff] }
 0x4e5   :  { %v1800_v25 = vpop.f32.mrf.mxu3  ;;  %v1780_v28 = vpop.f32.mrf.mxu2 }
 0x4e6   :  { %v1806_v47 = vadd.f32 %v1800_v25, %v3964_v16  ;;  %v1805_v37 = vadd.f32 %v1780_v28, %v3965_v34 }
 0x4e8   :  { %v2273_v27 = vmul.f32 -1.442695, %v1806_v47 }
 0x4e9   :  { %v2388_v36 = vpop.eup %2387 }
 0x4ea   :  { %v2390_v21 = vpop.eup %2389  ;;  %v1810_v41 = vadd.f32 1.0, %v2388_v36  ;;  %2391 = vpow2.f32 %v2273_v27 }
 0x4eb   :  { %v1829_v44 = vadd.f32 1.0, %v2390_v21  ;;  %v3810_v21 = vld [vmem:[%s3840_s5] ss:$0 sm:$0xff]  ;;  %s2530_s5 = smov [#allocation10]  }
 0x4ec   :  { %2393 = vrcp.f32 %v1810_v41  ;;  %v1822_v53 = vand.u32 2147483648, %v1810_v41  ;;  %v1820_v20 = vand.u32 2147483647, %v1810_v41  ;;  %vm1816_vm11 = vweird.f32 %v1810_v41  ;;  %s2180_s23 = sshll.u32 %s2530_s5, 4  ;;  %s2181_s23 = int_to_ptr.vmem [resolvable:$true] %s2180_s23 }
 0x4ed   :  { %2395 = vrcp.f32 %v1829_v44  ;;  %v1841_v56 = vand.u32 2147483648, %v1829_v44  ;;  %v1839_v54 = vand.u32 2147483647, %v1829_v44  ;;  %vm1835_vm12 = vweird.f32 %v1829_v44 }
 0x4ee   :  { %v1823_v2 = vor.u32 1.1754944e-38, %v1822_v53  ;;  %vm1821_vm15 = vcmp.eq.f32.partialorder %v1820_v20, 8.507059e+37 }
 0x4ef   :  { %v1842_v38 = vor.u32 1.1754944e-38, %v1841_v56  ;;  %vm1840_vm0 = vcmp.eq.f32.partialorder %v1839_v54, 8.507059e+37 }
 0x4f0   :  { %v2392_v57 = vpop.eup %2391 }
 0x4f1   :  { %v1849_v0 = vadd.f32 1.0, %v2392_v57 }
 0x4f2   :  { %v2394_v5 = vpop.eup %2393 }
 0x4f3   :  { %v2396_v1 = vpop.eup %2395  ;;  %v1812_v13 = vmul.f32 %v2394_v5, %v1810_v41  ;;  %2397 = vrcp.f32 %v1849_v0  ;;  %vm1817_vm9 = vweird.f32 %v2394_v5  ;;  %v1861_v61 = vand.u32 2147483648, %v1849_v0 }
 0x4f4   :  { %v1831_v29 = vmul.f32 %v2396_v1, %v1829_v44  ;;  %2399 = vtanh.f32 %v1805_v37  ;;  %vm1836_vm10 = vweird.f32 %v2396_v1  ;;  %vm1818_vm13 = vmor %vm1816_vm11, %vm1817_vm9  ;;  %vm1855_vm2 = vweird.f32 %v1849_v0 }
 0x4f5   :  { %v1813_v3 = vsub.f32 1.0, %v1812_v13  ;;  %vm1837_vm14 = vmor %vm1835_vm12, %vm1836_vm10  ;;  %v1859_v40 = vand.u32 2147483647, %v1849_v0  ;;  %v1862_v31 = vor.u32 1.1754944e-38, %v1861_v61 }
 0x4f6   :  { %v1832_v62 = vsub.f32 1.0, %v1831_v29  ;;  %v3970_v29 = vld [vmem:[#allocation30_spill] sm:$0xff] }
 0x4f7   :  { %v1814_v33 = vmul.f32 %v2394_v5, %v1813_v3  ;;  %vm1860_vm4 = vcmp.eq.f32.partialorder %v1859_v40, 8.507059e+37 }
 0x4f8   :  { %v1833_v6 = vmul.f32 %v2396_v1, %v1832_v62 }
 0x4f9   :  { %v2398_v4 = vpop.eup %2397  ;;  %v1815_v8 = vadd.f32 %v2394_v5, %v1814_v33 }
 0x4fa   :  { %v1834_v14 = vadd.f32 %v2396_v1, %v1833_v6  ;;  %v1851_v43 = vmul.f32 %v2398_v4, %v1849_v0  ;;  %v2400_v15 = vpop.eup %2399  ;;  %vm1856_vm1 = vweird.f32 %v2398_v4 }
 0x4fb   :  { %v1819_v24 = vsel %vm1818_vm13, %v2394_v5, %v1815_v8  ;;  %vm1857_vm3 = vmor %vm1855_vm2, %vm1856_vm1 }
 0x4fc   :  { %v1824_v50 = vsel %vm1821_vm15, %v1823_v2, %v1819_v24  ;;  %v1838_v39 = vsel %vm1837_vm14, %v2396_v1, %v1834_v14  ;;  %v1852_v11 = vsub.f32 1.0, %v1851_v43 }
 0x4fd   :  { %v1843_v23 = vsel %vm1840_vm0, %v1842_v38, %v1838_v39  ;;  %v1867_v22 = vmul.f32 %v2400_v15, %v1824_v50 }
 0x4fe   :  { %v1866_v7 = vmul.f32 %v1843_v23, %v3751_v35  ;;  %v1853_v52 = vmul.f32 %v2398_v4, %v1852_v11  ;;  %v2099_v35 = vld [vmem:[#allocation10] sm:$0xff] }
 0x500   :  { %v3799_v10 = vadd.f32 %v1867_v22, %v1866_v7  ;;  %v1854_v60 = vadd.f32 %v2398_v4, %v1853_v52 }
 0x502   :  { %2401 = vtanh.f32 %v3799_v10  ;;  %v1858_v9 = vsel %vm1857_vm3, %v2398_v4, %v1854_v60 }
 0x503   :  { %v1863_v12 = vsel %vm1860_vm4, %v1862_v31, %v1858_v9 }
 0x508   :  { %v2402_v42 = vpop.eup %2401 }
 0x509   :  { %v1870_v48 = vmul.f32 %v2402_v42, %v1863_v12 }
 0x50b   :  { %1874 = vst [vmem:[#allocation10 + $0x30] sm:$0xff] %v1870_v48  ;;  %1963 = vmatmul.f32.vlgmr.msrb.gmra.mxu0 %v1870_v48  ;;  %1983 = vmatmul.f32.vlgmr.msrb.gmra.mxu1 %v1870_v48 }
 0x50c   :  { %2003 = vmatmul.f32.vlgmr.msrb.gmra.mxu2 %v1870_v48  ;;  %2023 = vmatmul.f32.vlgmr.msrb.gmra.mxu3 %v1870_v48 }
 0x513   :  { %2143 = vmatmul.f32.vlgmr.msra.gmra.mxu0 %v2099_v35 }
 0x51b   :  { %2146 = vmatmul.f32.gmra.mxu0 %v2100_v18 }
 0x523   :  { %2149 = vmatmul.f32.gmra.mxu0 %v2101_v55 }
 0x52b   :  { %2152 = vmatmul.f32.gmra.mxu0 %v2102_v63 }
 0x533   :  { %2155 = vmatmul.f32.gmra.mxu0 %v3966_v58 }
 0x53b   :  { %2158 = vmatmul.f32.gmra.mxu0 %v3778_v26  ;;  %v3969_v26 = vld [vmem:[#allocation36_spill] sm:$0xff] }
 0x543   :  { %2161 = vmatmul.f32.gmra.mxu0 %v1870_v48 }
 0x588   :  { %v1964_v25 = vpop.f32.mrf.mxu0  ;;  %v1984_v16 = vpop.f32.mrf.mxu1 }
 0x589   :  { %v2027_v47 = vadd.f32 %v1964_v25, %v149_v45  ;;  %v2028_v27 = vadd.f32 %v1984_v16, %v3968_v19 }
 0x58b   :  { %v2274_v30 = vmul.f32 -1.442695, %v2027_v47  ;;  %v2275_v36 = vmul.f32 -1.442695, %v2028_v27 }
 0x58d   :  { %2403 = vpow2.f32 %v2274_v30 }
 0x58e   :  { %2405 = vpow2.f32 %v2275_v36 }
 0x58f   :  { %v2024_v41 = vpop.f32.mrf.mxu3  ;;  %v2004_v5 = vpop.f32.mrf.mxu2 }
 0x590   :  { %v2030_v44 = vadd.f32 %v2024_v41, %v3969_v26  ;;  %v2144_v59 = vpop.f32.mrf.mxu0  ;;  %v2029_v3 = vadd.f32 %v2004_v5, %v3970_v29 }
 0x591   :  { %v2145_v51 = vadd.f32 %v3810_v21, %v2144_v59 }
 0x592   :  { %v2276_v46 = vmul.f32 -1.442695, %v2030_v44 }
 0x593   :  { %v2404_v17 = vpop.eup %2403  ;;  %2168 = vst [vmem:[#allocation11] sm:$0xff] %v2145_v51 }
 0x594   :  { %v2406_v28 = vpop.eup %2405  ;;  %v2034_v57 = vadd.f32 1.0, %v2404_v17  ;;  %2407 = vpow2.f32 %v2276_v46 }
 0x595   :  { %v2053_v32 = vadd.f32 1.0, %v2406_v28 }
 0x596   :  { %2409 = vrcp.f32 %v2034_v57  ;;  %v2044_v6 = vand.u32 2147483647, %v2034_v57  ;;  %v2046_v54 = vand.u32 2147483648, %v2034_v57  ;;  %vm2040_vm7 = vweird.f32 %v2034_v57 }
 0x597   :  { %2411 = vrcp.f32 %v2053_v32  ;;  %v2065_v8 = vand.u32 2147483648, %v2053_v32  ;;  %v2063_v38 = vand.u32 2147483647, %v2053_v32  ;;  %vm2059_vm8 = vweird.f32 %v2053_v32 }
 0x598   :  { %v2147_v0 = vpop.f32.mrf.mxu0  ;;  %v2047_v50 = vor.u32 1.1754944e-38, %v2046_v54  ;;  %vm2045_vm11 = vcmp.eq.f32.partialorder %v2044_v6, 8.507059e+37 }
 0x599   :  { %v2148_v34 = vadd.f32 %v3810_v21, %v2147_v0  ;;  %v2066_v23 = vor.u32 1.1754944e-38, %v2065_v8  ;;  %vm2064_vm12 = vcmp.eq.f32.partialorder %v2063_v38, 8.507059e+37 }
 0x59a   :  { %v2408_v37 = vpop.eup %2407 }
 0x59b   :  { %v2073_v1 = vadd.f32 1.0, %v2408_v37  ;;  %2169 = vst [vmem:[#allocation11 + $0x8] sm:$0xff] %v2148_v34 }
 0x59c   :  { %v2410_v13 = vpop.eup %2409 }
 0x59d   :  { %v2412_v62 = vpop.eup %2411  ;;  %v2036_v53 = vmul.f32 %v2410_v13, %v2034_v57  ;;  %2413 = vrcp.f32 %v2073_v1  ;;  %vm2041_vm5 = vweird.f32 %v2410_v13  ;;  %v2085_v55 = vand.u32 2147483648, %v2073_v1 }
 0x59e   :  { %v2055_v56 = vmul.f32 %v2412_v62, %v2053_v32  ;;  %2415 = vtanh.f32 %v2029_v3  ;;  %vm2060_vm6 = vweird.f32 %v2412_v62  ;;  %vm2042_vm9 = vmor %vm2040_vm7, %vm2041_vm5  ;;  %vm2079_vm14 = vweird.f32 %v2073_v1 }
 0x59f   :  { %v2037_v33 = vsub.f32 1.0, %v2036_v53  ;;  %vm2061_vm10 = vmor %vm2059_vm8, %vm2060_vm6  ;;  %v2083_v63 = vand.u32 2147483647, %v2073_v1  ;;  %v2086_v49 = vor.u32 1.1754944e-38, %v2085_v55 }
 0x5a0   :  { %v2056_v20 = vsub.f32 1.0, %v2055_v56  ;;  %v2150_v4 = vpop.f32.mrf.mxu0 }
 0x5a1   :  { %v2038_v2 = vmul.f32 %v2410_v13, %v2037_v33  ;;  %v2151_v14 = vadd.f32 %v3810_v21, %v2150_v4  ;;  %vm2084_vm0 = vcmp.eq.f32.partialorder %v2083_v63, 8.507059e+37 }
 0x5a2   :  { %v2057_v43 = vmul.f32 %v2412_v62, %v2056_v20 }
 0x5a3   :  { %v2414_v24 = vpop.eup %2413  ;;  %v2039_v15 = vadd.f32 %v2410_v13, %v2038_v2  ;;  %2170 = vst [vmem:[#allocation11 + $0x10] sm:$0xff] %v2151_v14 }
 0x5a4   :  { %v2058_v39 = vadd.f32 %v2412_v62, %v2057_v43  ;;  %v2075_v11 = vmul.f32 %v2414_v24, %v2073_v1  ;;  %v2416_v7 = vpop.eup %2415  ;;  %vm2080_vm13 = vweird.f32 %v2414_v24 }
 0x5a5   :  { %v2043_v22 = vsel %vm2042_vm9, %v2410_v13, %v2039_v15  ;;  %vm2081_vm15 = vmor %vm2079_vm14, %vm2080_vm13 }
 0x5a6   :  { %v2048_v52 = vsel %vm2045_vm11, %v2047_v50, %v2043_v22  ;;  %v2062_v60 = vsel %vm2061_vm10, %v2412_v62, %v2058_v39  ;;  %v2076_v61 = vsub.f32 1.0, %v2075_v11 }
 0x5a7   :  { %v2067_v40 = vsel %vm2064_vm12, %v2066_v23, %v2062_v60  ;;  %v2091_v9 = vmul.f32 %v2416_v7, %v2048_v52 }
 0x5a8   :  { %v2090_v31 = vmul.f32 %v2067_v40, %v3799_v10  ;;  %v2077_v42 = vmul.f32 %v2414_v24, %v2076_v61  ;;  %v2153_v12 = vpop.f32.mrf.mxu0 }
 0x5a9   :  { %v2154_v48 = vadd.f32 %v3810_v21, %v2153_v12 }
 0x5aa   :  { %v2092_v35 = vadd.f32 %v2091_v9, %v2090_v31  ;;  %v2078_v18 = vadd.f32 %v2414_v24, %v2077_v42 }
 0x5ab   :  { %2171 = vst [vmem:[#allocation11 + $0x18] sm:$0xff] %v2154_v48 }
 0x5ac   :  { %2417 = vtanh.f32 %v2092_v35  ;;  %v2082_v58 = vsel %vm2081_vm15, %v2414_v24, %v2078_v18 }
 0x5ad   :  { %v2087_v16 = vsel %vm2084_vm0, %v2086_v49, %v2082_v58 }
 0x5b0   :  { %v2156_v45 = vpop.f32.mrf.mxu0 }
 0x5b1   :  { %v2157_v25 = vadd.f32 %v3810_v21, %v2156_v45 }
 0x5b2   :  { %v2418_v10 = vpop.eup %2417 }
 0x5b3   :  { %v2094_v47 = vmul.f32 %v2418_v10, %v2087_v16  ;;  %2172 = vst [vmem:[#allocation11 + $0x20] sm:$0xff] %v2157_v25 }
 0x5b5   :  { %2098 = vst [vmem:[#allocation10 + $0x38] sm:$0xff] %v2094_v47  ;;  %2164 = vmatmul.f32.gmra.mxu0 %v2094_v47 }
 0x5b6   :  { %2188 = dma.vmem_to_hbm [thread:$0]  %s2181_s23, 1024, %s2183_s26, [#allocation7], %s2527_s13, %s2527_s13, %s2528_s14  }
 0x5b8   :  { %v2159_v19 = vpop.f32.mrf.mxu0 }
 0x5b9   :  { %v2160_v27 = vadd.f32 %v3810_v21, %v2159_v19 }
 0x5bb   :  { %2173 = vst [vmem:[#allocation11 + $0x28] sm:$0xff] %v2160_v27 }
 0x5c0   :  { %v2162_v30 = vpop.f32.mrf.mxu0 }
 0x5c1   :  { %v2163_v36 = vadd.f32 %v3810_v21, %v2162_v30 }
 0x5c3   :  { %2174 = vst [vmem:[#allocation11 + $0x30] sm:$0xff] %v2163_v36 }
 0x632   :  { %v2165_v41 = vpop.f32.mrf.mxu0 }
 0x633   :  { %v2166_v26 = vadd.f32 %v3810_v21, %v2165_v41 }
 0x635   :  { %2175 = vst [vmem:[#allocation11 + $0x38] sm:$0xff] %v2166_v26 }
 0x636   :  { %2201 = dma.vmem_to_hbm [thread:$0]  %s2194_s28, 1024, %s2196_s6, [#allocation12], %s2527_s13, %s2527_s13, %s2528_s14  }
 0x637   :  { %2519 = dma.done.wait [#allocation7], 1024  }
 0x638   :  { %2520 = vsyncadd [#allocation7], 4294966272 }
 0x639   :  { %2521 = dma.done.wait [#allocation12], 1024  }
 0x63a   :  { %2522 = vsyncadd [#allocation12], 4294966272 }
 0x63b   :  { %2210 = vsyncpa [#allocation6], 1 }
 0x63c   :  { %2211 = vsyncpa [#allocation9], 1 }
 0x63d   :  { %2212 = vsyncpa [#allocation7], 1 }
 0x63e   :  { %2213 = vsyncpa [#allocation12], 1 }

</bundles_post_ra>
